<compile_context>
chip_gen: v7x
topology: tpu7x:2x2x1
jax: 0.10.0
libtpu: 0.0.40
codegen_flags: <defaults>
</compile_context>

<pallas_src>
import functools

import numpy as np
import jax
import jax.numpy as jnp
from jax import lax
from jax.experimental import pallas as pl
from jax.experimental.pallas import tpu as pltpu


# ----------------------------------------------------------------------------
# helpers
# ----------------------------------------------------------------------------
def _round_up(v, m):
    return ((v + m - 1) // m) * m


def _pick_tile(dim, candidates):
    for c in candidates:
        if dim % c == 0:
            return c
    return dim


def _pick_tk(tm, tn, Kp, budget=8 * 1024 * 1024):
    """Largest tk (multiple of 128, divides Kp) whose double-buffered bf16
    A(tm,tk)+B(tk,tn) tiles fit the budget.  Usually returns Kp (single K step)."""
    per = 2 * 2 * (tm + tn)               # bf16, double-buffered, A + B per unit tk
    max_tk = max(128, (budget // per) // 128 * 128)
    if Kp <= max_tk:
        return Kp
    nk = Kp // 128
    for d in range(max_tk // 128, 0, -1):
        if nk % d == 0:
            return d * 128
    return 128


# ----------------------------------------------------------------------------
# Generic Pallas MXU matmul (bf16 in, f32 acc/out) - upsample & final 1x1 convs
# ----------------------------------------------------------------------------
def _matmul_kernel(a_ref, b_ref, o_ref, acc_ref):
    @pl.when(pl.program_id(2) == 0)
    def _():
        acc_ref[...] = jnp.zeros_like(acc_ref)

    acc_ref[...] += jnp.dot(a_ref[...], b_ref[...],
                            preferred_element_type=jnp.float32)

    @pl.when(pl.program_id(2) == pl.num_programs(2) - 1)
    def _():
        o_ref[...] = acc_ref[...].astype(o_ref.dtype)


@jax.jit
def matmul(a, b):
    M, K = a.shape
    K2, N = b.shape
    assert K == K2
    a = a.astype(jnp.bfloat16)
    b = b.astype(jnp.bfloat16)
    Mp, Kp, Np = _round_up(M, 8), _round_up(K, 128), _round_up(N, 128)
    if (Mp, Kp) != (M, K):
        a = jnp.pad(a, ((0, Mp - M), (0, Kp - K)))
    if (Kp, Np) != (K, N):
        b = jnp.pad(b, ((0, Kp - K), (0, Np - N)))
    tm = _pick_tile(Mp, (256, 128, 64, 32, 16, 8))
    tn = _pick_tile(Np, (512, 256, 128))
    tk = _pick_tk(tm, tn, Kp)
    out = pl.pallas_call(
        _matmul_kernel,
        out_shape=jax.ShapeDtypeStruct((Mp, Np), jnp.float32),
        grid_spec=pltpu.PrefetchScalarGridSpec(
            num_scalar_prefetch=0,
            grid=(Mp // tm, Np // tn, Kp // tk),
            in_specs=[pl.BlockSpec((tm, tk), lambda i, j, k: (i, k)),
                      pl.BlockSpec((tk, tn), lambda i, j, k: (k, j))],
            out_specs=pl.BlockSpec((tm, tn), lambda i, j, k: (i, j)),
            scratch_shapes=[pltpu.VMEM((tm, tn), jnp.float32)],
        ),
        compiler_params=pltpu.CompilerParams(
            dimension_semantics=("parallel", "parallel", "arbitrary")),
    )(a, b)
    if (Mp, Np) != (M, N):
        out = out[:M, :N]
    return out


# ----------------------------------------------------------------------------
# im2col glue (NHWC).  Taps whose window lies entirely in zero padding are
# skipped statically (together with their weight rows).
# ----------------------------------------------------------------------------
def _im2col(x, w, stride, padding, dilation):
    N, H, W, Cin = x.shape
    Cout, _, KH, KW = w.shape
    OH = (H + 2 * padding - dilation * (KH - 1) - 1) // stride + 1
    OW = (W + 2 * padding - dilation * (KW - 1) - 1) // stride + 1
    x = x.astype(jnp.bfloat16)
    w = w.astype(jnp.bfloat16)
    if KH == 1 and KW == 1 and padding == 0:
        xs = x[:, ::stride, ::stride, :] if stride > 1 else x
        return xs.reshape(N * OH * OW, Cin), w.reshape(Cout, Cin).T, OH, OW
    xp = jnp.pad(x, ((0, 0), (padding, padding), (padding, padding), (0, 0)))
    wt = w.transpose(2, 3, 1, 0)                   # (KH, KW, Cin, Cout)
    cols, wparts = [], []
    for kh in range(KH):
        hs = kh * dilation
        h_last = hs + (OH - 1) * stride
        if h_last < padding or hs >= padding + H:  # tap rows entirely in padding
            continue
        for kw in range(KW):
            ws = kw * dilation
            w_last = ws + (OW - 1) * stride
            if w_last < padding or ws >= padding + W:
                continue
            cols.append(xp[:, hs:h_last + 1:stride, ws:w_last + 1:stride, :])
            wparts.append(wt[kh, kw])
    patches = jnp.concatenate(cols, axis=-1).reshape(N * OH * OW, len(cols) * Cin)
    wmat = jnp.concatenate(wparts, axis=0)          # (ntaps*Cin, Cout)
    return patches, wmat, OH, OW


# ----------------------------------------------------------------------------
# Fused conv + GroupNorm(32) (+residual) (+ReLU) kernel
# ----------------------------------------------------------------------------
def _conv_gn_kernel(*refs, per_sample, relu, has_res, eps, inv_cnt):
    refs = list(refs)
    a_ref = refs.pop(0)
    b_ref = refs.pop(0)
    g_ref = refs.pop(0)
    bt_ref = refs.pop(0)
    sel_ref = refs.pop(0)
    selT_ref = refs.pop(0)
    if not per_sample:
        rs_ref = refs.pop(0)
        rsT_ref = refs.pop(0)
    if has_res:
        r_ref = refs.pop(0)
    o_ref = refs.pop(0)
    acc_ref = refs.pop(0)

    k = pl.program_id(2)

    @pl.when(k == 0)
    def _():
        acc_ref[...] = jnp.zeros_like(acc_ref)

    acc_ref[...] += jnp.dot(a_ref[...], b_ref[...],
                            preferred_element_type=jnp.float32)

    @pl.when(k == pl.num_programs(2) - 1)
    def _():
        hi = lax.Precision.HIGHEST
        x = acc_ref[...]                          # (tm, tn) f32
        sel = sel_ref[...]                        # (tn, 32) channel -> group
        selT = selT_ref[...]                      # (32, tn)
        if per_sample:
            # one sample per M block: plain column sums
            s_c = jnp.sum(x, axis=0, keepdims=True)                      # (1, tn)
            mean_g = jnp.dot(s_c, sel, precision=hi,
                             preferred_element_type=jnp.float32) * inv_cnt
            mean = jnp.dot(mean_g, selT, precision=hi,
                           preferred_element_type=jnp.float32)           # (1, tn)
            d = x - mean
            var_g = jnp.dot(jnp.sum(d * d, axis=0, keepdims=True), sel,
                            precision=hi,
                            preferred_element_type=jnp.float32) * inv_cnt
            inv = jnp.dot(lax.rsqrt(var_g + eps), selT, precision=hi,
                          preferred_element_type=jnp.float32)            # (1, tn)
        else:
            # multiple samples in the block: per-sample row-selector matmuls
            rs = rs_ref[...]                      # (tm, 32) row -> sample one-hot
            rsT = rsT_ref[...]                    # (32, tm)
            s_c = jnp.dot(rsT, x, precision=hi,
                          preferred_element_type=jnp.float32)            # (32, tn)
            mean_g = jnp.dot(s_c, sel, precision=hi,
                             preferred_element_type=jnp.float32) * inv_cnt
            mean = jnp.dot(rs, jnp.dot(mean_g, selT, precision=hi,
                                       preferred_element_type=jnp.float32),
                           precision=hi, preferred_element_type=jnp.float32)
            d = x - mean
            ss_c = jnp.dot(rsT, d * d, precision=hi,
                           preferred_element_type=jnp.float32)
            var_g = jnp.dot(ss_c, sel, precision=hi,
                            preferred_element_type=jnp.float32) * inv_cnt
            inv = jnp.dot(rs, jnp.dot(lax.rsqrt(var_g + eps), selT, precision=hi,
                                      preferred_element_type=jnp.float32),
                          precision=hi, preferred_element_type=jnp.float32)
        y = d * (inv * g_ref[...]) + bt_ref[...]
        if has_res:
            y = y + r_ref[...].astype(jnp.float32)
        if relu:
            y = jnp.maximum(y, 0.0)
        o_ref[...] = y.astype(o_ref.dtype)


@functools.lru_cache(maxsize=None)
def _group_maps(C, Np, groups=32):
    cpg = C // groups
    sel = np.zeros((Np, groups), np.float32)
    ch = np.arange(C)
    sel[ch, ch // cpg] = 1.0
    return jnp.asarray(sel), jnp.asarray(np.ascontiguousarray(sel.T))


@functools.lru_cache(maxsize=None)
def _row_maps(nsamples, hw):
    assert nsamples <= 32
    M = nsamples * hw
    Mp = _round_up(M, 8)
    rs = np.zeros((Mp, 32), np.float32)
    r = np.arange(M)
    rs[r, r // hw] = 1.0
    return jnp.asarray(rs), jnp.asarray(np.ascontiguousarray(rs.T))


@functools.partial(jax.jit, static_argnames=("stride", "padding", "dilation", "relu"))
def _conv2d_gn_impl(x, w, gamma, beta, sel, selT, rs, rsT, residual,
                    *, stride, padding, dilation, relu):
    N = x.shape[0]
    Cout = w.shape[0]
    patches, wmat, OH, OW = _im2col(x, w, stride, padding, dilation)
    M, K = patches.shape
    hw = OH * OW
    per_sample = (hw % 8 == 0)
    Mp = _round_up(M, 8)
    Kp = _round_up(K, 128)
    Np = sel.shape[0]
    if (Mp, Kp) != (M, K):
        patches = jnp.pad(patches, ((0, Mp - M), (0, Kp - K)))
    if (Kp, Np) != (K, Cout):
        wmat = jnp.pad(wmat, ((0, Kp - K), (0, Np - Cout)))
    g = jnp.pad(gamma.reshape(1, -1).astype(jnp.float32), ((0, 0), (0, Np - Cout)))
    bt = jnp.pad(beta.reshape(1, -1).astype(jnp.float32), ((0, 0), (0, Np - Cout)))
    has_res = residual is not None
    if has_res:
        r = residual.reshape(M, residual.shape[-1]).astype(jnp.bfloat16)
        if (Mp, Np) != r.shape:
            r = jnp.pad(r, ((0, Mp - r.shape[0]), (0, Np - r.shape[1])))

    cpg = Cout // 32
    # split output channels into 2 "parallel" blocks when alignment allows it
    if Np >= 256 and Np == Cout and (Np // 2) % 128 == 0 and (Np // 2) % cpg == 0:
        tn = Np // 2
    else:
        tn = Np
    tm = hw if per_sample else Mp          # one sample per M block when aligned
    nm = Mp // tm
    tk = _pick_tk(tm, tn, Kp)
    nn, kk = Np // tn, Kp // tk
    inv_cnt = 1.0 / float(hw * cpg)

    in_specs = [pl.BlockSpec((tm, tk), lambda j, m, k: (m, k)),
                pl.BlockSpec((tk, tn), lambda j, m, k: (k, j)),
                pl.BlockSpec((1, tn), lambda j, m, k: (0, j)),
                pl.BlockSpec((1, tn), lambda j, m, k: (0, j)),
                pl.BlockSpec((tn, 32), lambda j, m, k: (j, 0)),
                pl.BlockSpec((32, tn), lambda j, m, k: (0, j))]
    args = [patches, wmat, g, bt, sel, selT]
    if not per_sample:
        in_specs += [pl.BlockSpec((tm, 32), lambda j, m, k: (m, 0)),
                     pl.BlockSpec((32, tm), lambda j, m, k: (0, m))]
        args += [rs, rsT]
    if has_res:
        in_specs.append(pl.BlockSpec((tm, tn), lambda j, m, k: (m, j)))
        args.append(r)

    out = pl.pallas_call(
        functools.partial(_conv_gn_kernel, per_sample=per_sample, relu=relu,
                          has_res=has_res, eps=1e-5, inv_cnt=inv_cnt),
        out_shape=jax.ShapeDtypeStruct((Mp, Np), jnp.bfloat16),
        grid_spec=pltpu.PrefetchScalarGridSpec(
            num_scalar_prefetch=0,
            grid=(nn, nm, kk),
            in_specs=in_specs,
            out_specs=pl.BlockSpec((tm, tn), lambda j, m, k: (m, j)),
            scratch_shapes=[pltpu.VMEM((tm, tn), jnp.float32)],
        ),
        compiler_params=pltpu.CompilerParams(
            dimension_semantics=("parallel", "parallel", "arbitrary")),
    )(*args)
    if (Mp, Np) != (M, Cout):
        out = out[:M, :Cout]
    return out.reshape(N, OH, OW, Cout)


def conv2d_gn(x, w, gamma, beta, *, stride=1, padding=0, dilation=1,
              relu=True, residual=None):
    """conv2d (NHWC, PyTorch OIHW weights) fused with GroupNorm(32) [+res] [+ReLU]."""
    N, H, W, _ = x.shape
    Cout, _, KH, KW = w.shape
    assert Cout % 32 == 0
    OH = (H + 2 * padding - dilation * (KH - 1) - 1) // stride + 1
    OW = (W + 2 * padding - dilation * (KW - 1) - 1) // stride + 1
    hw = OH * OW
    Np = _round_up(Cout, 128)
    sel, selT = _group_maps(Cout, Np)
    if hw % 8 == 0:
        rs = rsT = None
    else:
        rs, rsT = _row_maps(N, hw)
    return _conv2d_gn_impl(x, w, gamma, beta, sel, selT, rs, rsT, residual,
                           stride=stride, padding=padding, dilation=dilation,
                           relu=relu)


@functools.partial(jax.jit, static_argnames=("stride", "padding", "dilation"))
def conv2d(x, w, *, stride=1, padding=0, dilation=1):
    """Plain conv (no GN) -> f32 output.  Used for the two classifier 1x1 convs."""
    N = x.shape[0]
    Cout = w.shape[0]
    patches, wmat, OH, OW = _im2col(x, w, stride, padding, dilation)
    y = matmul(patches, wmat)
    return y.reshape(N, OH, OW, Cout)


# ----------------------------------------------------------------------------
# MaxPool 3x3 stride 2 pad 1: fused XLA maximum tree (per perf feedback)
# ----------------------------------------------------------------------------
# TODO(synk): kept as an XLA maximum tree instead of a Pallas kernel (review:
#             avoids the 9x HBM stack amplification; XLA fuses it fully).
@jax.jit
def maxpool_3x3_s2_p1(x):
    N, H, W, C = x.shape
    OH = (H + 2 - 3) // 2 + 1
    OW = (W + 2 - 3) // 2 + 1
    xp = jnp.pad(x, ((0, 0), (1, 1), (1, 1), (0, 0)),
                 constant_values=float("-inf"))
    out = None
    for kh in range(3):
        for kw in range(3):
            sl = xp[:, kh:kh + 2 * (OH - 1) + 1:2, kw:kw + 2 * (OW - 1) + 1:2, :]
            out = sl if out is None else jnp.maximum(out, sl)
    return out


# ----------------------------------------------------------------------------
# Global average pool (AdaptiveAvgPool2d(1)), NHWC, lane-dense
# ----------------------------------------------------------------------------
def _gap_kernel(x_ref, o_ref):
    o_ref[...] = jnp.mean(x_ref[...].astype(jnp.float32), axis=1, keepdims=True)


@jax.jit
def global_avg_pool(x):
    N, H, W, C = x.shape
    xr = x.reshape(N, H * W, C)
    y = pl.pallas_call(
        _gap_kernel,
        out_shape=jax.ShapeDtypeStruct((N, 1, C), jnp.float32),
        grid=(N,),
        in_specs=[pl.BlockSpec((1, H * W, C), lambda n: (n, 0, 0))],
        out_specs=pl.BlockSpec((1, 1, C), lambda n: (n, 0, 0)),
        compiler_params=pltpu.CompilerParams(dimension_semantics=("parallel",)),
    )(xr)
    return y.reshape(N, 1, 1, C)


# ----------------------------------------------------------------------------
# Bilinear upsample (align_corners=False), separable: rows matmul then cols matmul
# ----------------------------------------------------------------------------
def _interp_matrix(out_size, in_size):
    scale = in_size / out_size
    M = np.zeros((out_size, in_size), np.float32)
    for o in range(out_size):
        src = (o + 0.5) * scale - 0.5
        if src < 0.0:
            src = 0.0
        i0 = min(int(np.floor(src)), in_size - 1)
        i1 = min(i0 + 1, in_size - 1)
        l1 = src - i0
        M[o, i0] += 1.0 - l1
        M[o, i1] += l1
    return M


@functools.lru_cache(maxsize=None)
def _interp_matrix_dev(out_size, in_size):
    return jnp.asarray(_interp_matrix(out_size, in_size))


@jax.jit
def _upsample_impl(x, mh, mw):
    N, H, W, C = x.shape
    oh, ow = mh.shape[0], mw.shape[0]
    # height pass: (H, N*W*C) -> (OH, N*W*C)
    xh = jnp.transpose(x, (1, 0, 2, 3)).reshape(H, N * W * C)
    yh = matmul(mh, xh).reshape(oh, N, W, C)
    # width pass: (W, OH*N*C) -> (OW, OH*N*C)
    xw = jnp.transpose(yh, (2, 0, 1, 3)).reshape(W, oh * N * C)
    yw = matmul(mw, xw).reshape(ow, oh, N, C)
    return jnp.transpose(yw, (2, 1, 0, 3))


def upsample_bilinear(x, out_h, out_w):
    mh = _interp_matrix_dev(out_h, x.shape[1])
    mw = _interp_matrix_dev(out_w, x.shape[2])
    return _upsample_impl(x, mh, mw)


# ----------------------------------------------------------------------------
# Deterministic synthetic parameter construction (no checkpoint loading)
# ----------------------------------------------------------------------------
class ParamGen:
    def __init__(self, rng):
        self.rng = rng

    def conv(self, cout, cin, kh, kw):
        fan_in = cin * kh * kw
        std = np.sqrt(2.0 / fan_in)
        w = self.rng.standard_normal((cout, cin, kh, kw)).astype(np.float32) * std
        return jnp.asarray(w)

    def gn(self, c):
        g = (1.0 + 0.1 * self.rng.standard_normal(c)).astype(np.float32)
        b = (0.1 * self.rng.standard_normal(c)).astype(np.float32)
        return jnp.asarray(g), jnp.asarray(b)

    def bias(self, c):
        return jnp.asarray((0.1 * self.rng.standard_normal(c)).astype(np.float32))


def build_params(rng):
    pg = ParamGen(rng)
    P = {}
    P["conv1"] = pg.conv(64, 3, 7, 7)
    P["gn1"] = pg.gn(64)

    state = {"inplanes": 64, "dilation": 1}

    def make_layer(planes, blocks, stride, dilate):
        prev_dil = state["dilation"]
        if dilate:
            state["dilation"] *= stride
            stride = 1
        layer = []
        inplanes = state["inplanes"]
        downsample = (stride != 1) or (inplanes != planes * 4)
        blk = {"conv1": pg.conv(planes, inplanes, 1, 1), "gn1": pg.gn(planes),
               "conv2": pg.conv(planes, planes, 3, 3), "gn2": pg.gn(planes),
               "conv3": pg.conv(planes * 4, planes, 1, 1), "gn3": pg.gn(planes * 4),
               "stride": stride, "dilation": prev_dil}
        if downsample:
            blk["ds_conv"] = pg.conv(planes * 4, inplanes, 1, 1)
            blk["ds_gn"] = pg.gn(planes * 4)
        layer.append(blk)
        state["inplanes"] = planes * 4
        for _ in range(1, blocks):
            layer.append({"conv1": pg.conv(planes, planes * 4, 1, 1), "gn1": pg.gn(planes),
                          "conv2": pg.conv(planes, planes, 3, 3), "gn2": pg.gn(planes),
                          "conv3": pg.conv(planes * 4, planes, 1, 1), "gn3": pg.gn(planes * 4),
                          "stride": 1, "dilation": state["dilation"]})
        return layer

    # ResNet-101, replace_stride_with_dilation=[False, True, True] (output stride 8)
    P["layer1"] = make_layer(64, 3, 1, False)
    P["layer2"] = make_layer(128, 4, 2, False)
    P["layer3"] = make_layer(256, 23, 2, True)
    P["layer4"] = make_layer(512, 3, 2, True)

    aspp = {"rates": (12, 24, 36)}
    aspp["b0_conv"] = pg.conv(256, 2048, 1, 1)
    aspp["b0_gn"] = pg.gn(256)
    for i in range(3):
        aspp[f"b{i + 1}_conv"] = pg.conv(256, 2048, 3, 3)
        aspp[f"b{i + 1}_gn"] = pg.gn(256)
    aspp["pool_conv"] = pg.conv(256, 2048, 1, 1)
    aspp["pool_gn"] = pg.gn(256)
    aspp["proj_conv"] = pg.conv(256, 5 * 256, 1, 1)
    aspp["proj_gn"] = pg.gn(256)
    P["aspp"] = aspp
    P["head_conv"] = pg.conv(256, 256, 3, 3)
    P["head_gn"] = pg.gn(256)
    # classifier[4] replaced: Conv2d(256, 1, kernel_size=(1, 1)) with bias
    P["final_conv"] = pg.conv(1, 256, 1, 1)
    P["final_bias"] = pg.bias(1)

    # aux classifier: FCNHead(1024, 21)
    P["aux_conv1"] = pg.conv(256, 1024, 3, 3)
    P["aux_gn"] = pg.gn(256)
    P["aux_conv2"] = pg.conv(21, 256, 1, 1)
    P["aux_bias"] = pg.bias(21)
    return P


# ----------------------------------------------------------------------------
# Forward pass (activations NHWC, bf16)
# ----------------------------------------------------------------------------
def bottleneck_forward(x, p):
    out = conv2d_gn(x, p["conv1"], *p["gn1"], relu=True)
    out = conv2d_gn(out, p["conv2"], *p["gn2"], stride=p["stride"],
                    padding=p["dilation"], dilation=p["dilation"], relu=True)
    if "ds_conv" in p:
        identity = conv2d_gn(x, p["ds_conv"], *p["ds_gn"],
                             stride=p["stride"], relu=False)
    else:
        identity = x
    # conv3 + GroupNorm + residual add + ReLU fused into one pallas_call
    return conv2d_gn(out, p["conv3"], *p["gn3"], relu=True, residual=identity)


def deeplab_forward(x_nchw, P):
    in_h, in_w = x_nchw.shape[2], x_nchw.shape[3]
    x = jnp.transpose(x_nchw, (0, 2, 3, 1))           # NCHW -> NHWC once

    # ---- backbone ----
    y = conv2d_gn(x, P["conv1"], *P["gn1"], stride=2, padding=3, relu=True)
    y = maxpool_3x3_s2_p1(y)
    aux_feat = None
    for name in ("layer1", "layer2", "layer3", "layer4"):
        for blk in P[name]:
            y = bottleneck_forward(y, blk)
        if name == "layer3":
            aux_feat = y
    out_feat = y

    # ---- classifier: ASPP ----
    a = P["aspp"]
    h, w = out_feat.shape[1], out_feat.shape[2]
    branches = [conv2d_gn(out_feat, a["b0_conv"], *a["b0_gn"], relu=True)]
    for i, r in enumerate(a["rates"]):
        branches.append(conv2d_gn(out_feat, a[f"b{i + 1}_conv"], *a[f"b{i + 1}_gn"],
                                  padding=r, dilation=r, relu=True))
    p = global_avg_pool(out_feat)
    p = conv2d_gn(p, a["pool_conv"], *a["pool_gn"], relu=True)
    # bilinear upsample of a 1x1 map is a constant broadcast
    p = jnp.broadcast_to(p, (p.shape[0], h, w, p.shape[3]))
    branches.append(p)
    cat = jnp.concatenate(branches, axis=-1)
    proj = conv2d_gn(cat, a["proj_conv"], *a["proj_gn"], relu=True)
    # TODO(synk): nn.Dropout(0.5) active in PyTorch train mode; identity here (eval).

    hx = conv2d_gn(proj, P["head_conv"], *P["head_gn"], padding=1, relu=True)
    logits = conv2d(hx, P["final_conv"]) + P["final_bias"].reshape(1, 1, 1, -1)
    out = upsample_bilinear(logits, in_h, in_w)

    # ---- aux classifier (FCNHead) ----
    ax = conv2d_gn(aux_feat, P["aux_conv1"], *P["aux_gn"], padding=1, relu=True)
    # TODO(synk): nn.Dropout(0.1) active in PyTorch train mode; identity here (eval).
    ax = conv2d(ax, P["aux_conv2"]) + P["aux_bias"].reshape(1, 1, 1, -1)
    aux = upsample_bilinear(ax, in_h, in_w)

    return {"out": jnp.transpose(out, (0, 3, 1, 2)),
            "aux": jnp.transpose(aux, (0, 3, 1, 2))}


# ----------------------------------------------------------------------------
if __name__ == "__main__":
    key = jax.random.PRNGKey(0)
    x = jax.random.normal(key, (2, 3, 64, 64), dtype=jnp.float32)

    params = build_params(np.random.default_rng(0))
    result = deeplab_forward(x, params)
    result = jax.block_until_ready(result)

    assert result["out"].shape == (2, 1, 64, 64)
    assert result["aux"].shape == (2, 21, 64, 64)
    print("KERNEL_OK")
</pallas_src>

<mosaic_0001>
module attributes {stable_mosaic.version = 11 : i64} {
  func.func @_conv_gn_kernel(%arg0: i32, %arg1: i32, %arg2: i32, %arg3: memref<1024x256xbf16, #tpu.memory_space<vmem>>, %arg4: memref<256x128xbf16, #tpu.memory_space<vmem>>, %arg5: memref<1x128xf32, #tpu.memory_space<vmem>>, %arg6: memref<1x128xf32, #tpu.memory_space<vmem>>, %arg7: memref<128x32xf32, #tpu.memory_space<vmem>>, %arg8: memref<32x128xf32, #tpu.memory_space<vmem>>, %arg9: memref<1024x128xbf16, #tpu.memory_space<vmem>>, %arg10: memref<1024x128xf32, #tpu.memory_space<vmem>>) attributes {dimension_semantics = [#tpu.dimension_semantics<parallel>, #tpu.dimension_semantics<parallel>, #tpu.dimension_semantics<arbitrary>], iteration_bounds = array<i64: 1, 2, 1>, scalar_prefetch = 0 : i64, scratch_operands = 1 : i64, tpu.core_type = #tpu.core_type<tc>, window_params = [{transform_indices = @transform_0, window_bounds = array<i64: 1024, 256>}, {transform_indices = @transform_1, window_bounds = array<i64: 256, 128>}, {transform_indices = @transform_2, window_bounds = array<i64: 1, 128>}, {transform_indices = @transform_3, window_bounds = array<i64: 1, 128>}, {transform_indices = @transform_4, window_bounds = array<i64: 128, 32>}, {transform_indices = @transform_5, window_bounds = array<i64: 32, 128>}, {transform_indices = @transform_6, window_bounds = array<i64: 1024, 128>}]} {
    %c0_i32 = arith.constant 0 : i32
    %0 = arith.cmpi eq, %arg2, %c0_i32 : i32
    %1 = arith.extui %0 : i1 to i32
    %c0_i32_0 = arith.constant 0 : i32
    %2 = arith.cmpi ne, %1, %c0_i32_0 : i32
    scf.if %2 {
      %cst_10 = arith.constant 0.000000e+00 : f32
      %12 = vector.broadcast %cst_10 : f32 to vector<1024x128xf32>
      %c0_11 = arith.constant 0 : index
      %c0_12 = arith.constant 0 : index
      %13 = vector.load %arg10[%c0_11, %c0_12] : memref<1024x128xf32, #tpu.memory_space<vmem>>, vector<1024x128xf32>
      tpu.vector_store %arg10[%c0_11, %c0_12], %12 {strides = array<i32>} : memref<1024x128xf32, #tpu.memory_space<vmem>>, vector<1024x128xf32>,
    } else {
    }
    %c0 = arith.constant 0 : index
    %c0_1 = arith.constant 0 : index
    %3 = vector.load %arg10[%c0, %c0_1] : memref<1024x128xf32, #tpu.memory_space<vmem>>, vector<1024x128xf32>
    %c0_2 = arith.constant 0 : index
    %c0_3 = arith.constant 0 : index
    %4 = vector.load %arg3[%c0_2, %c0_3] : memref<1024x256xbf16, #tpu.memory_space<vmem>>, vector<1024x256xbf16>
    %c0_4 = arith.constant 0 : index
    %c0_5 = arith.constant 0 : index
    %5 = vector.load %arg4[%c0_4, %c0_5] : memref<256x128xbf16, #tpu.memory_space<vmem>>, vector<256x128xbf16>
    %cst = arith.constant dense<0.000000e+00> : vector<1024x128xf32>
    %6 = tpu.matmul %4, %5, %cst {dimension_numbers = #tpu.dot_dimension_numbers<[1], [0], [0], [1], [0, 0, 1, 1], [], []>} : vector<1024x256xbf16>, vector<256x128xbf16>, vector<1024x128xf32> -> vector<1024x128xf32>
    %7 = arith.addf %3, %6 : vector<1024x128xf32>
    %c0_6 = arith.constant 0 : index
    %c0_7 = arith.constant 0 : index
    %8 = vector.load %arg10[%c0_6, %c0_7] : memref<1024x128xf32, #tpu.memory_space<vmem>>, vector<1024x128xf32>
    tpu.vector_store %arg10[%c0_6, %c0_7], %7 {strides = array<i32>} : memref<1024x128xf32, #tpu.memory_space<vmem>>, vector<1024x128xf32>,
    %c0_i32_8 = arith.constant 0 : i32
    %9 = arith.cmpi eq, %arg2, %c0_i32_8 : i32
    %10 = arith.extui %9 : i1 to i32
    %c0_i32_9 = arith.constant 0 : i32
    %11 = arith.cmpi ne, %10, %c0_i32_9 : i32
    scf.if %11 {
      %c0_10 = arith.constant 0 : index
      %c0_11 = arith.constant 0 : index
      %12 = vector.load %arg10[%c0_10, %c0_11] : memref<1024x128xf32, #tpu.memory_space<vmem>>, vector<1024x128xf32>
      %c0_12 = arith.constant 0 : index
      %c0_13 = arith.constant 0 : index
      %13 = vector.load %arg7[%c0_12, %c0_13] : memref<128x32xf32, #tpu.memory_space<vmem>>, vector<128x32xf32>
      %c0_14 = arith.constant 0 : index
      %c0_15 = arith.constant 0 : index
      %14 = vector.load %arg8[%c0_14, %c0_15] : memref<32x128xf32, #tpu.memory_space<vmem>>, vector<32x128xf32>
      %cst_16 = arith.constant dense<0.000000e+00> : vector<128xf32>
      %15 = vector.multi_reduction <add>, %12, %cst_16 [0] : vector<1024x128xf32> to vector<128xf32>
      %16 = vector.shape_cast %15 : vector<128xf32> to vector<1x128xf32>
      %cst_17 = arith.constant dense<0.000000e+00> : vector<1x32xf32>
      %17 = tpu.matmul %16, %13, %cst_17 {dimension_numbers = #tpu.dot_dimension_numbers<[1], [0], [0], [1], [0, 0, 1, 1], [], []>, precision = #tpu.contract_precision<fp32>} : vector<1x128xf32>, vector<128x32xf32>, vector<1x32xf32> -> vector<1x32xf32>
      %cst_18 = arith.constant 4.8828125E-4 : f32
      %18 = vector.broadcast %cst_18 : f32 to vector<1x32xf32>
      %19 = arith.mulf %17, %18 : vector<1x32xf32>
      %cst_19 = arith.constant dense<0.000000e+00> : vector<1x128xf32>
      %20 = tpu.matmul %19, %14, %cst_19 {dimension_numbers = #tpu.dot_dimension_numbers<[1], [0], [0], [1], [0, 0, 1, 1], [], []>, precision = #tpu.contract_precision<fp32>} : vector<1x32xf32>, vector<32x128xf32>, vector<1x128xf32> -> vector<1x128xf32>
      %21 = vector.broadcast %20 : vector<1x128xf32> to vector<1024x128xf32>
      %22 = arith.subf %12, %21 : vector<1024x128xf32>
      %23 = arith.mulf %22, %22 : vector<1024x128xf32>
      %cst_20 = arith.constant dense<0.000000e+00> : vector<128xf32>
      %24 = vector.multi_reduction <add>, %23, %cst_20 [0] : vector<1024x128xf32> to vector<128xf32>
      %25 = vector.shape_cast %24 : vector<128xf32> to vector<1x128xf32>
      %cst_21 = arith.constant dense<0.000000e+00> : vector<1x32xf32>
      %26 = tpu.matmul %25, %13, %cst_21 {dimension_numbers = #tpu.dot_dimension_numbers<[1], [0], [0], [1], [0, 0, 1, 1], [], []>, precision = #tpu.contract_precision<fp32>} : vector<1x128xf32>, vector<128x32xf32>, vector<1x32xf32> -> vector<1x32xf32>
      %cst_22 = arith.constant 4.8828125E-4 : f32
      %27 = vector.broadcast %cst_22 : f32 to vector<1x32xf32>
      %28 = arith.mulf %26, %27 : vector<1x32xf32>
      %cst_23 = arith.constant 9.99999974E-6 : f32
      %29 = vector.broadcast %cst_23 : f32 to vector<1x32xf32>
      %30 = arith.addf %28, %29 : vector<1x32xf32>
      %31 = math.rsqrt %30 : vector<1x32xf32>
      %cst_24 = arith.constant dense<0.000000e+00> : vector<1x128xf32>
      %32 = tpu.matmul %31, %14, %cst_24 {dimension_numbers = #tpu.dot_dimension_numbers<[1], [0], [0], [1], [0, 0, 1, 1], [], []>, precision = #tpu.contract_precision<fp32>} : vector<1x32xf32>, vector<32x128xf32>, vector<1x128xf32> -> vector<1x128xf32>
      %c0_25 = arith.constant 0 : index
      %c0_26 = arith.constant 0 : index
      %33 = vector.load %arg5[%c0_25, %c0_26] : memref<1x128xf32, #tpu.memory_space<vmem>>, vector<1x128xf32>
      %34 = arith.mulf %32, %33 : vector<1x128xf32>
      %35 = vector.broadcast %34 : vector<1x128xf32> to vector<1024x128xf32>
      %36 = arith.mulf %22, %35 : vector<1024x128xf32>
      %c0_27 = arith.constant 0 : index
      %c0_28 = arith.constant 0 : index
      %37 = vector.load %arg6[%c0_27, %c0_28] : memref<1x128xf32, #tpu.memory_space<vmem>>, vector<1x128xf32>
      %38 = vector.broadcast %37 : vector<1x128xf32> to vector<1024x128xf32>
      %39 = arith.addf %36, %38 : vector<1024x128xf32>
      %cst_29 = arith.constant 0.000000e+00 : f32
      %40 = vector.broadcast %cst_29 : f32 to vector<1024x128xf32>
      %41 = arith.maximumf %39, %40 : vector<1024x128xf32>
      %42 = arith.truncf %41 : vector<1024x128xf32> to vector<1024x128xbf16>
      %c0_30 = arith.constant 0 : index
      %c0_31 = arith.constant 0 : index
      %43 = vector.load %arg9[%c0_30, %c0_31] : memref<1024x128xbf16, #tpu.memory_space<vmem>>, vector<1024x128xbf16>
      tpu.vector_store %arg9[%c0_30, %c0_31], %42 {strides = array<i32>} : memref<1024x128xbf16, #tpu.memory_space<vmem>>, vector<1024x128xbf16>,
    } else {
    }
    return
  }
  func.func @transform_0(%arg0: i32, %arg1: i32, %arg2: i32) -> (i32, i32) {
    %c0_i32 = arith.constant 0 : i32
    return %arg1, %arg2 : i32, i32
  }
  func.func @transform_1(%arg0: i32, %arg1: i32, %arg2: i32) -> (i32, i32) {
    %c0_i32 = arith.constant 0 : i32
    return %arg2, %arg0 : i32, i32
  }
  func.func @transform_2(%arg0: i32, %arg1: i32, %arg2: i32) -> (i32, i32) {
    %c0_i32 = arith.constant 0 : i32
    %c0_i32_0 = arith.constant 0 : i32
    return %c0_i32, %arg0 : i32, i32
  }
  func.func @transform_3(%arg0: i32, %arg1: i32, %arg2: i32) -> (i32, i32) {
    %c0_i32 = arith.constant 0 : i32
    %c0_i32_0 = arith.constant 0 : i32
    return %c0_i32, %arg0 : i32, i32
  }
  func.func @transform_4(%arg0: i32, %arg1: i32, %arg2: i32) -> (i32, i32) {
    %c0_i32 = arith.constant 0 : i32
    %c0_i32_0 = arith.constant 0 : i32
    return %arg0, %c0_i32 : i32, i32
  }
  func.func @transform_5(%arg0: i32, %arg1: i32, %arg2: i32) -> (i32, i32) {
    %c0_i32 = arith.constant 0 : i32
    %c0_i32_0 = arith.constant 0 : i32
    return %c0_i32, %arg0 : i32, i32
  }
  func.func @transform_6(%arg0: i32, %arg1: i32, %arg2: i32) -> (i32, i32) {
    %c0_i32 = arith.constant 0 : i32
    return %arg1, %arg0 : i32, i32
  }
}

</mosaic_0001>

<bundles_post_ra>
// kernel: _conv2d_gn_impl.1
= control target key start
LH: loop header
LB: loop body
LE: loop exit
PB: predicated region body
PF: predicated region fallthrough
CT: control target
= control target key end

     0   :  { %11 = vsyncpa [#allocation4], 0  ;;  %s12566_s0 = inlined_call_operand.vmem [shape: bf16[2048,256], index: 0, kind: input, shape index: {}]   ;;  %s12567_s1 = inlined_call_operand.vmem [shape: bf16[256,128], index: 1, kind: input, shape index: {}]   ;;  %s12568_s2 = inlined_call_operand.vmem [shape: f32[1,128], index: 2, kind: input, shape index: {}]   ;;  %s12569_s3 = inlined_call_operand.vmem [shape: f32[1,128], index: 3, kind: input, shape index: {}]   ;;  %s12570_s4 = inlined_call_operand.vmem [shape: f32[128,32], index: 4, kind: input, shape index: {}]   ;;  %s12571_s5 = inlined_call_operand.vmem [shape: f32[32,128], index: 5, kind: input, shape index: {}]   ;;  %s12572_s6 = inlined_call_operand.hbm [shape: bf16[2048,128], index: 6, kind: output, shape index: {}]  }
   0x1   :  { %13 = vsyncpa [#allocation4 + $0x1], 0  ;;  %s8910_s21 = smov 0   ;;  %s8912_s22 = smov 0  }
   0x2   :  { %s8914_s23 = smov 0   ;;  %s8916_s24 = smov 0  }
   0x3   :  { %s8918_s25 = smov 0   ;;  %s8920_s26 = smov 0  }
   0x4 LB: > { %s6496_s27 = sadd.s32 4294967295, %s8866_s26   ;;  %s6497_s28 = sadd.s32 4294967294, %s8866_s26   ;;  %s8866_s26 = sphi %s8920_s26, %s19_s26   ;;  %s8862_s25 = sphi %s8918_s25, %s14076_s25   ;;  %s8858_s24 = sphi %s8916_s24, %s14075_s24   ;;  %s8854_s23 = sphi %s8914_s23, %s14074_s23   ;;  %s8850_s22 = sphi %s8912_s22, %s14073_s22   ;;  %s8846_s21 = sphi %s8910_s21, %s14072_s21  }
   0x5   : > { %s34_s29 = sadd.s32 1, %s8862_s25  ;;  %s207_s30 = sadd.s32 1, %s8854_s23 }
   0x6   : > { %p36_p0 = scmp.ge.s32.totalorder %s34_s29, 2  ;;  %p217_p1 = scmp.ne.s32.totalorder %s8854_s23, %s8850_s22 }
   0x7   : > { %p218_p2 = scmp.eq.s32.totalorder %s6496_s27, 1  ;;  %p223_p3 = scmp.ne.s32.totalorder %s8850_s22, %s8846_s21 }
   0x8   : > { %s14078_s29 = smov (%p36_p0, %s34_s29), 0  ;;  %p224_p5 = scmp.eq.s32.totalorder %s6497_s28, 1 }
   0x9   : > { %p8950_p4 = por %p218_p2, %p217_p1  ;;  %s202_s8 = ssub.s32 %s8862_s25, %s14078_s29 }
   0xa   : > { %p6505_p6 = scmp.ge.s32.totalorder %s8866_s26, 1  ;;  %p205_p7 = scmp.eq.s32.totalorder %s202_s8, 0 }
   0xb   : > { %p8957_p8 = por %p224_p5, %p223_p3  ;;  %p297_p9 = scmp.lt.s32.totalorder %s8866_s26, 3 }
   0xc   : > { %s8963_s10 = scalar_select %p205_p7, %s8854_s23, %s207_s30  }
   0xd   : > { %p298_p10 = pnand %p6505_p6, %p297_p9 }
   0xf   : > { %301 = sbr.rel (%p298_p10) target bundleno = 2618 (0xa3a), region = 44 }
  0x16   : > { %v8578_v0 = vld [vmem:[%s12567_s1] sm:$0xff]   ;;  %v8868_v1 = vmov 0   ;;  %s6507_s13 = sshll.u32 %s8858_s24, 7  ;;  %v8579_v2 = vld [vmem:[%s12567_s1 + $0x8] sm:$0xff]   ;;  %v8580_v3 = vld [vmem:[%s12567_s1 + $0x10] sm:$0xff]   ;;  %vm8870_vm0 = vmmov 0  }
  0x17   : > { %1550 = vmatprep.subr.bf16.mxu0 %v8868_v1  ;;  %p357_p11 = scmp.lt.s32.totalorder %s6507_s13, 255  ;;  %v8581_v4 = vld [vmem:[%s12567_s1 + $0x18] sm:$0xff]   ;;  %v8582_v5 = vld [vmem:[%s12567_s1 + $0x20] sm:$0xff]   ;;  %v8583_v7 = vld [vmem:[%s12567_s1 + $0x28] sm:$0xff]   ;;  %vm3277_vm1 = vcmask 261120   ;;  %s352_s28 = sand.u32 1, %s8850_s22  }
  0x18   : > { %1551 = vmatpush1.bf16.msra.mxu0 %v8578_v0  ;;  %v8584_v8 = vld [vmem:[%s12567_s1 + $0x30] sm:$0xff]   ;;  %v8585_v9 = vld [vmem:[%s12567_s1 + $0x38] sm:$0xff]   ;;  %v8586_v10 = vld [vmem:[%s12567_s1 + $0x40] sm:$0xff]   ;;  %s6506_s30 = sshll.u32 %s352_s28, 9  ;;  %s6917_s12 = sshll.u32 %s8858_s24, 13 }
  0x19   : > { %1552 = vmatprep.subr.bf16.mxu0 %v8868_v1  ;;  %s14080_s13 = smov (!%p357_p11, %s6507_s13), 255  ;;  %v8587_v11 = vld [vmem:[%s12567_s1 + $0x48] sm:$0xff]   ;;  %v8588_v12 = vld [vmem:[%s12567_s1 + $0x50] sm:$0xff]   ;;  %v8589_v13 = vld [vmem:[%s12567_s1 + $0x58] sm:$0xff]   ;;  %s12219_s8 = scalar_lea.vmem [#allocation3], %s6506_s30 }
  0x1a   : > { %s6788_s20 = sshll.u32 %s14080_s13, 3  ;;  %v8590_v14 = vld [vmem:[%s12567_s1 + $0x60] sm:$0xff]   ;;  %v8591_v15 = vld [vmem:[%s12567_s1 + $0x68] sm:$0xff]   ;;  %v8592_v16 = vld [vmem:[%s12567_s1 + $0x70] sm:$0xff]   ;;  %s6343_s14 = sshll.u32 %s12219_s8, 4  ;;  %s12488_s14 = int_to_ptr.vmem [resolvable:$true] %s6343_s14 }
  0x1b   : > { %s8984_s11 = scalar_lea.vmem %s12566_s0, %s6788_s20  ;;  %v8593_v17 = vld [vmem:[%s12567_s1 + $0x78] sm:$0xff]   ;;  %s12486_s15 = scalar_lea.hbm %s12572_s6, %s6917_s12 }
  0x1c   : > { %1553 = vmatpush1.bf16.msra.mxu0 %v8579_v2  ;;  %v8596_v6 = vld [vmem:[%s8984_s11 + $0x4] ss:$8 sps:$4 sm:$0xff]   ;;  %v8594_v18 = vld [vmem:[%s8984_s11] ss:$8 sps:$4 sm:$0xff]   ;;  %v8597_v19 = vld [vmem:[%s8984_s11 + $0x14] ss:$8 sps:$4 sm:$0xff]  }
  0x1d   : > { %1554 = vmatprep.subr.bf16.mxu0 %v8868_v1  ;;  %1582 = vmatprep.mubr.bf16.mxu0 %v8596_v6  ;;  %v8599_v20 = vld [vmem:[%s8984_s11 + $0x10] ss:$8 sps:$4 sm:$0xff]   ;;  %v8600_v21 = vld [vmem:[%s8984_s11 + $0x24] ss:$8 sps:$4 sm:$0xff]   ;;  %v8602_v22 = vld [vmem:[%s8984_s11 + $0x20] ss:$8 sps:$4 sm:$0xff]  }
  0x1e   : > { %v8603_v23 = vld [vmem:[%s8984_s11 + $0x34] ss:$8 sps:$4 sm:$0xff]   ;;  %v8605_v24 = vld [vmem:[%s8984_s11 + $0x30] ss:$8 sps:$4 sm:$0xff]   ;;  %v8606_v25 = vld [vmem:[%s8984_s11 + $0x44] ss:$8 sps:$4 sm:$0xff]  }
  0x1f   : > { %v8608_v26 = vld [vmem:[%s8984_s11 + $0x40] ss:$8 sps:$4 sm:$0xff]   ;;  %v8609_v27 = vld [vmem:[%s8984_s11 + $0x54] ss:$8 sps:$4 sm:$0xff]   ;;  %v8611_v28 = vld [vmem:[%s8984_s11 + $0x50] ss:$8 sps:$4 sm:$0xff]  }
  0x20   : > { %1555 = vmatpush1.bf16.msra.mxu0 %v8580_v3  ;;  %v8612_v29 = vld [vmem:[%s8984_s11 + $0x64] ss:$8 sps:$4 sm:$0xff]   ;;  %v8614_v30 = vld [vmem:[%s8984_s11 + $0x60] ss:$8 sps:$4 sm:$0xff]   ;;  %v8615_v31 = vld [vmem:[%s8984_s11 + $0x74] ss:$8 sps:$4 sm:$0xff]  }
  0x21   : > { %1556 = vmatprep.subr.bf16.mxu0 %v8868_v1  ;;  %v8617_v32 = vld [vmem:[%s8984_s11 + $0x70] ss:$8 sps:$4 sm:$0xff]   ;;  %v8618_v33 = vld [vmem:[%s8984_s11 + $0x84] ss:$8 sps:$4 sm:$0xff]   ;;  %v8620_v34 = vld [vmem:[%s8984_s11 + $0x80] ss:$8 sps:$4 sm:$0xff]  }
  0x22   : > { %v8621_v35 = vld [vmem:[%s8984_s11 + $0x94] ss:$8 sps:$4 sm:$0xff]   ;;  %v8623_v36 = vld [vmem:[%s8984_s11 + $0x90] ss:$8 sps:$4 sm:$0xff]   ;;  %v8624_v37 = vld [vmem:[%s8984_s11 + $0xa4] ss:$8 sps:$4 sm:$0xff]  }
  0x23   : > { %v8626_v38 = vld [vmem:[%s8984_s11 + $0xa0] ss:$8 sps:$4 sm:$0xff]   ;;  %v8627_v39 = vld [vmem:[%s8984_s11 + $0xb4] ss:$8 sps:$4 sm:$0xff]   ;;  %v8629_v40 = vld [vmem:[%s8984_s11 + $0xb0] ss:$8 sps:$4 sm:$0xff]  }
  0x24   : > { %1557 = vmatpush1.bf16.msra.mxu0 %v8581_v4  ;;  %v8630_v41 = vld [vmem:[%s8984_s11 + $0xc4] ss:$8 sps:$4 sm:$0xff]   ;;  %v8632_v42 = vld [vmem:[%s8984_s11 + $0xc0] ss:$8 sps:$4 sm:$0xff]   ;;  %v8633_v43 = vld [vmem:[%s8984_s11 + $0xd4] ss:$8 sps:$4 sm:$0xff]  }
  0x25   : > { %1558 = vmatprep.subr.bf16.mxu0 %v8868_v1  ;;  %v8635_v44 = vld [vmem:[%s8984_s11 + $0xd0] ss:$8 sps:$4 sm:$0xff]   ;;  %v8636_v45 = vld [vmem:[%s8984_s11 + $0xe4] ss:$8 sps:$4 sm:$0xff]   ;;  %v8638_v46 = vld [vmem:[%s8984_s11 + $0xe0] ss:$8 sps:$4 sm:$0xff]  }
  0x26   : > { %v8639_v47 = vld [vmem:[%s8984_s11 + $0xf4] ss:$8 sps:$4 sm:$0xff]   ;;  %v8641_v48 = vld [vmem:[%s8984_s11 + $0xf0] ss:$8 sps:$4 sm:$0xff]   ;;  %v8642_v49 = vld [vmem:[%s8984_s11 + $0x104] ss:$8 sps:$4 sm:$0xff]  }
  0x27   : > { %v8644_v50 = vld [vmem:[%s8984_s11 + $0x100] ss:$8 sps:$4 sm:$0xff]   ;;  %v8645_v51 = vld [vmem:[%s8984_s11 + $0x114] ss:$8 sps:$4 sm:$0xff]   ;;  %v8647_v52 = vld [vmem:[%s8984_s11 + $0x110] ss:$8 sps:$4 sm:$0xff]  }
  0x28   : > { %1559 = vmatpush1.bf16.msra.mxu0 %v8582_v5  ;;  %v8648_v53 = vld [vmem:[%s8984_s11 + $0x124] ss:$8 sps:$4 sm:$0xff]   ;;  %v8650_v54 = vld [vmem:[%s8984_s11 + $0x120] ss:$8 sps:$4 sm:$0xff]   ;;  %v8651_v55 = vld [vmem:[%s8984_s11 + $0x134] ss:$8 sps:$4 sm:$0xff]  }
  0x29   : > { %1560 = vmatprep.subr.bf16.mxu0 %v8868_v1  ;;  %v8653_v56 = vld [vmem:[%s8984_s11 + $0x130] ss:$8 sps:$4 sm:$0xff]   ;;  %v8654_v57 = vld [vmem:[%s8984_s11 + $0x144] ss:$8 sps:$4 sm:$0xff]   ;;  %v8656_v58 = vld [vmem:[%s8984_s11 + $0x140] ss:$8 sps:$4 sm:$0xff]  }
  0x2a   : > { %v8657_v59 = vld [vmem:[%s8984_s11 + $0x154] ss:$8 sps:$4 sm:$0xff]   ;;  %v8659_v60 = vld [vmem:[%s8984_s11 + $0x150] ss:$8 sps:$4 sm:$0xff]   ;;  %v8660_v61 = vld [vmem:[%s8984_s11 + $0x164] ss:$8 sps:$4 sm:$0xff]  }
  0x2b   : > { %v8662_v62 = vld [vmem:[%s8984_s11 + $0x160] ss:$8 sps:$4 sm:$0xff]   ;;  %v8663_v63 = vld [vmem:[%s8984_s11 + $0x174] ss:$8 sps:$4 sm:$0xff]   ;;  %v8665_v0 = vld [vmem:[%s8984_s11 + $0x170] ss:$8 sps:$4 sm:$0xff]  }
  0x2c   : > { %1561 = vmatpush1.bf16.msra.mxu0 %v8583_v7  ;;  %v8668_v2 = vld [vmem:[%s8984_s11 + $0x180] ss:$8 sps:$4 sm:$0xff]   ;;  %v8669_v3 = vld [vmem:[%s8984_s11 + $0x194] ss:$8 sps:$4 sm:$0xff]   ;;  %v8671_v4 = vld [vmem:[%s8984_s11 + $0x190] ss:$8 sps:$4 sm:$0xff]  }
  0x2d   : > { %1562 = vmatprep.subr.bf16.mxu0 %v8868_v1  ;;  %v8672_v5 = vld [vmem:[%s8984_s11 + $0x1a4] ss:$8 sps:$4 sm:$0xff]   ;;  %v8674_v6 = vld [vmem:[%s8984_s11 + $0x1a0] ss:$8 sps:$4 sm:$0xff]   ;;  %v8675_v7 = vld [vmem:[%s8984_s11 + $0x1b4] ss:$8 sps:$4 sm:$0xff]  }
  0x2e   : > { %s12520_s16 = scalar_lea.sflag [#allocation4], %s352_s28  ;;  %s8788_s17 = scalar_lea.vmem %s12488_s14, 8192 }
  0x2f   : > { %p8789_p12 = scmp.ne.s32.totalorder %s12488_s14, %s8788_s17  ;;  %s8872_s18 = smov [#allocation3]  }
  0x30   : > { %1563 = vmatpush1.bf16.msra.mxu0 %v8584_v8  ;;  %s8792_s19 = sshll.u32 %s8872_s18, 4  ;;  %s8793_s19 = int_to_ptr.vmem [resolvable:$false] %s8792_s19 }
  0x31   : > { %1564 = vmatprep.subr.bf16.mxu0 %v8868_v1  ;;  %p8790_p13 = pnand %p8789_p12, %p8950_p4  ;;  %s8794_s20 = scalar_lea.vmem %s8793_s19, 16384 }
  0x32   : > { %p8795_p1 = scmp.lt.s32.totalorder %s12488_s14, %s8793_s19  ;;  %p8796_p2 = scmp.lt.s32.totalorder %s8794_s20, %s8788_s17 }
  0x33   : > { %p8791_p0 = pneg %p8790_p13 }
  0x34   : > { %1565 = vmatpush1.bf16.msra.mxu0 %v8585_v9  ;;  %p8797_p3 = por %p8796_p2, %p8795_p1 }
  0x35   : > { %1566 = vmatprep.subr.bf16.mxu0 %v8868_v1 }
  0x36   : > { %p8798_p5 = pnand %p8797_p3, %p8791_p0 }
  0x38   : > { %1567 = vmatpush1.bf16.msra.mxu0 %v8586_v10  ;;  %v8677_v10 = vld [vmem:[%s8984_s11 + $0x1b0] ss:$8 sps:$4 sm:$0xff]  }
  0x39   : > { %1568 = vmatprep.subr.bf16.mxu0 %v8868_v1 }
  0x3c   : > { %1569 = vmatpush1.bf16.msra.mxu0 %v8587_v11 }
  0x3d   : > { %1570 = vmatprep.subr.bf16.mxu0 %v8868_v1 }
  0x40   : > { %1571 = vmatpush1.bf16.msra.mxu0 %v8588_v12  ;;  %v8678_v12 = vld [vmem:[%s8984_s11 + $0x1c4] ss:$8 sps:$4 sm:$0xff]  }
  0x41   : > { %1572 = vmatprep.subr.bf16.mxu0 %v8868_v1 }
  0x44   : > { %1573 = vmatpush1.bf16.msra.mxu0 %v8589_v13 }
  0x45   : > { %1574 = vmatprep.subr.bf16.mxu0 %v8868_v1 }
  0x48   : > { %1575 = vmatpush1.bf16.msra.mxu0 %v8590_v14 }
  0x49   : > { %1576 = vmatprep.subr.bf16.mxu0 %v8868_v1 }
  0x4c   : > { %1577 = vmatpush1.bf16.msra.mxu0 %v8591_v15 }
  0x4d   : > { %1578 = vmatprep.subr.bf16.mxu0 %v8868_v1 }
  0x50   : > { %1579 = vmatpush1.bf16.msra.mxu0 %v8592_v16 }
  0x51   : > { %1580 = vmatprep.subr.bf16.mxu0 %v8868_v1  ;;  %v8666_v1 = vld [vmem:[%s8984_s11 + $0x184] ss:$8 sps:$4 sm:$0xff]  }
  0x54   : > { %1581 = vmatpush1.bf16.msra.mxu0 %v8593_v17 }
  0x57   : > { %1583 = vmatmul.mubr.bf16.vlgmr.msra.gmra.mrb[0].mxu0 %v8594_v18  ;;  %v8680_v18 = vld [vmem:[%s8984_s11 + $0x1c0] ss:$8 sps:$4 sm:$0xff]  }
  0x58   : > { %1590 = vmatprep.mubr.bf16.mxu0 %v8597_v19 }
  0x5f   : > { %1591 = vmatmul.mubr.bf16.gmra.mrb[4].mxu0 %v8599_v20  ;;  %v8681_v20 = vld [vmem:[%s8984_s11 + $0x1d4] ss:$8 sps:$4 sm:$0xff]  }
  0x60   : > { %1598 = vmatprep.mubr.bf16.mxu0 %v8600_v21 }
  0x67   : > { %1599 = vmatmul.mubr.bf16.gmra.mrb[8].mxu0 %v8602_v22 }
  0x68   : > { %1606 = vmatprep.mubr.bf16.mxu0 %v8603_v23 }
  0x6f   : > { %1607 = vmatmul.mubr.bf16.gmra.mrb[12].mxu0 %v8605_v24 }
  0x70   : > { %1614 = vmatprep.mubr.bf16.mxu0 %v8606_v25 }
  0x77   : > { %1615 = vmatmul.mubr.bf16.gmra.mrb[16].mxu0 %v8608_v26  ;;  %v8683_v26 = vld [vmem:[%s8984_s11 + $0x1d0] ss:$8 sps:$4 sm:$0xff]  }
  0x78   : > { %1622 = vmatprep.mubr.bf16.mxu0 %v8609_v27 }
  0x7f   : > { %1623 = vmatmul.mubr.bf16.gmra.mrb[20].mxu0 %v8611_v28  ;;  %v8684_v28 = vld [vmem:[%s8984_s11 + $0x1e4] ss:$8 sps:$4 sm:$0xff]  }
  0x80   : > { %1630 = vmatprep.mubr.bf16.mxu0 %v8612_v29 }
  0x87   : > { %1631 = vmatmul.mubr.bf16.gmra.mrb[24].mxu0 %v8614_v30 }
  0x88   : > { %1638 = vmatprep.mubr.bf16.mxu0 %v8615_v31 }
  0x8f   : > { %1639 = vmatmul.mubr.bf16.gmra.mrb[28].mxu0 %v8617_v32 }
  0x90   : > { %1646 = vmatprep.mubr.bf16.mxu0 %v8618_v33 }
  0x97   : > { %1647 = vmatmul.mubr.bf16.gmra.mrb[32].mxu0 %v8620_v34  ;;  %v8686_v34 = vld [vmem:[%s8984_s11 + $0x1e0] ss:$8 sps:$4 sm:$0xff]  }
  0x98   : > { %1654 = vmatprep.mubr.bf16.mxu0 %v8621_v35 }
  0x9f   : > { %1655 = vmatmul.mubr.bf16.gmra.mrb[36].mxu0 %v8623_v36  ;;  %v8687_v36 = vld [vmem:[%s8984_s11 + $0x1f4] ss:$8 sps:$4 sm:$0xff]  }
  0xa0   : > { %1662 = vmatprep.mubr.bf16.mxu0 %v8624_v37 }
  0xa7   : > { %1663 = vmatmul.mubr.bf16.gmra.mrb[40].mxu0 %v8626_v38 }
  0xa8   : > { %1670 = vmatprep.mubr.bf16.mxu0 %v8627_v39 }
  0xaf   : > { %1671 = vmatmul.mubr.bf16.gmra.mrb[44].mxu0 %v8629_v40 }
  0xb0   : > { %1678 = vmatprep.mubr.bf16.mxu0 %v8630_v41 }
  0xb7   : > { %1679 = vmatmul.mubr.bf16.gmra.mrb[48].mxu0 %v8632_v42  ;;  %v8689_v42 = vld [vmem:[%s8984_s11 + $0x1f0] ss:$8 sps:$4 sm:$0xff]  }
  0xb8   : > { %1686 = vmatprep.mubr.bf16.mxu0 %v8633_v43 }
  0xbf   : > { %1687 = vmatmul.mubr.bf16.gmra.mrb[52].mxu0 %v8635_v44  ;;  %v8690_v44 = vld [vmem:[%s8984_s11 + $0x204] ss:$8 sps:$4 sm:$0xff]  }
  0xc0   : > { %1694 = vmatprep.mubr.bf16.mxu0 %v8636_v45 }
  0xc7   : > { %1695 = vmatmul.mubr.bf16.gmra.mrb[56].mxu0 %v8638_v46 }
  0xc8   : > { %1702 = vmatprep.mubr.bf16.mxu0 %v8639_v47 }
  0xcf   : > { %1703 = vmatmul.mubr.bf16.gmra.mrb[60].mxu0 %v8641_v48 }
  0xd0   : > { %1710 = vmatprep.mubr.bf16.mxu0 %v8642_v49 }
  0xd7   : > { %1711 = vmatmul.mubr.bf16.gmra.mrb[64].mxu0 %v8644_v50  ;;  %v8692_v50 = vld [vmem:[%s8984_s11 + $0x200] ss:$8 sps:$4 sm:$0xff]  }
  0xd8   : > { %1718 = vmatprep.mubr.bf16.mxu0 %v8645_v51 }
  0xdf   : > { %1719 = vmatmul.mubr.bf16.gmra.mrb[68].mxu0 %v8647_v52  ;;  %v8693_v52 = vld [vmem:[%s8984_s11 + $0x214] ss:$8 sps:$4 sm:$0xff]  }
  0xe0   : > { %1726 = vmatprep.mubr.bf16.mxu0 %v8648_v53 }
  0xe7   : > { %1727 = vmatmul.mubr.bf16.gmra.mrb[72].mxu0 %v8650_v54 }
  0xe8   : > { %1734 = vmatprep.mubr.bf16.mxu0 %v8651_v55 }
  0xef   : > { %1735 = vmatmul.mubr.bf16.gmra.mrb[76].mxu0 %v8653_v56 }
  0xf0   : > { %1742 = vmatprep.mubr.bf16.mxu0 %v8654_v57 }
  0xf7   : > { %1743 = vmatmul.mubr.bf16.gmra.mrb[80].mxu0 %v8656_v58  ;;  %v8695_v58 = vld [vmem:[%s8984_s11 + $0x210] ss:$8 sps:$4 sm:$0xff]  }
  0xf8   : > { %1750 = vmatprep.mubr.bf16.mxu0 %v8657_v59 }
  0xff   : > { %1751 = vmatmul.mubr.bf16.gmra.mrb[84].mxu0 %v8659_v60  ;;  %v8696_v60 = vld [vmem:[%s8984_s11 + $0x224] ss:$8 sps:$4 sm:$0xff]  }
 0x100   : > { %1758 = vmatprep.mubr.bf16.mxu0 %v8660_v61 }
 0x107   : > { %1759 = vmatmul.mubr.bf16.gmra.mrb[88].mxu0 %v8662_v62 }
 0x108   : > { %1766 = vmatprep.mubr.bf16.mxu0 %v8663_v63 }
 0x10f   : > { %1767 = vmatmul.mubr.bf16.gmra.mrb[92].mxu0 %v8665_v0 }
 0x110   : > { %1774 = vmatprep.mubr.bf16.mxu0 %v8666_v1 }
 0x117   : > { %1775 = vmatmul.mubr.bf16.gmra.mrb[96].mxu0 %v8668_v2  ;;  %v8698_v2 = vld [vmem:[%s8984_s11 + $0x220] ss:$8 sps:$4 sm:$0xff]  }
 0x118   : > { %1782 = vmatprep.mubr.bf16.mxu0 %v8669_v3 }
 0x11f   : > { %1783 = vmatmul.mubr.bf16.gmra.mrb[100].mxu0 %v8671_v4  ;;  %v8699_v4 = vld [vmem:[%s8984_s11 + $0x234] ss:$8 sps:$4 sm:$0xff]  }
 0x120   : > { %1790 = vmatprep.mubr.bf16.mxu0 %v8672_v5 }
 0x127   : > { %1791 = vmatmul.mubr.bf16.gmra.mrb[104].mxu0 %v8674_v6 }
 0x128   : > { %1798 = vmatprep.mubr.bf16.mxu0 %v8675_v7 }
 0x12a   : > { %v9074_v8 = vpop.f32.mrb[0].mxu0 }
 0x12b   : > { %v1586_v9 = vpop.f32.mrb[1].mxu0 }
 0x12c   : > { %v9077_v11 = vpop.f32.mrb[2].mxu0 }
 0x12d   : > { %v2502_v13 = vadd.f32 %v9077_v11, %v9074_v8  ;;  %v1589_v14 = vpop.f32.mrb[3].mxu0 }
 0x12e   : > { %v8702_v14 = vld [vmem:[%s8984_s11 + $0x244] ss:$8 sps:$4 sm:$0xff]  }
 0x12f   : > { %1799 = vmatmul.mubr.bf16.gmra.mrb[108].mxu0 %v8677_v10 }
 0x130   : > { %1806 = vmatprep.mubr.bf16.mxu0 %v8678_v12  ;;  %v8701_v12 = vld [vmem:[%s8984_s11 + $0x230] ss:$8 sps:$4 sm:$0xff]  }
 0x132   : > { %v9082_v15 = vpop.f32.mrb[4].mxu0 }
 0x133   : > { %v2503_v16 = vadd.f32 %v2502_v13, %v9082_v15  ;;  %v1594_v17 = vpop.f32.mrb[5].mxu0 }
 0x134   : > { %v9086_v19 = vpop.f32.mrb[6].mxu0 }
 0x135   : > { %v2504_v21 = vadd.f32 %v2503_v16, %v9086_v19  ;;  %v1597_v22 = vpop.f32.mrb[7].mxu0 }
 0x136   : > { %v8704_v22 = vld [vmem:[%s8984_s11 + $0x240] ss:$8 sps:$4 sm:$0xff]  }
 0x137   : > { %1807 = vmatmul.mubr.bf16.gmra.mrb[112].mxu0 %v8680_v18 }
 0x138   : > { %1814 = vmatprep.mubr.bf16.mxu0 %v8681_v20 }
 0x13a   : > { %v9090_v23 = vpop.f32.mrb[8].mxu0 }
 0x13b   : > { %v2505_v24 = vadd.f32 %v2504_v21, %v9090_v23  ;;  %v1602_v25 = vpop.f32.mrb[9].mxu0 }
 0x13c   : > { %v9094_v27 = vpop.f32.mrb[10].mxu0  ;;  %v8705_v25 = vld [vmem:[%s8984_s11 + $0x254] ss:$8 sps:$4 sm:$0xff]  }
 0x13d   : > { %12958 = vst [vmem:[#allocation6_spill] sm:$0xff] %v9094_v27  ;;  %v2506_v29 = vadd.f32 %v2505_v24, %v9094_v27  ;;  %v1605_v30 = vpop.f32.mrb[11].mxu0 }
 0x13f   : > { %1815 = vmatmul.mubr.bf16.gmra.mrb[116].mxu0 %v8683_v26 }
 0x140   : > { %1822 = vmatprep.mubr.bf16.mxu0 %v8684_v28 }
 0x142   : > { %v9098_v31 = vpop.f32.mrb[12].mxu0 }
 0x143   : > { %12959 = vst [vmem:[#allocation7_spill] sm:$0xff] %v9098_v31  ;;  %v2507_v32 = vadd.f32 %v2506_v29, %v9098_v31  ;;  %v1610_v33 = vpop.f32.mrb[13].mxu0 }
 0x144   : > { %v9102_v35 = vpop.f32.mrb[14].mxu0  ;;  %v8707_v33 = vld [vmem:[%s8984_s11 + $0x250] ss:$8 sps:$4 sm:$0xff]  }
 0x145   : > { %12960 = vst [vmem:[#allocation8_spill] sm:$0xff] %v9102_v35  ;;  %v2508_v37 = vadd.f32 %v2507_v32, %v9102_v35  ;;  %v1613_v38 = vpop.f32.mrb[15].mxu0 }
 0x147   : > { %1823 = vmatmul.mubr.bf16.gmra.mrb[120].mxu0 %v8686_v34 }
 0x148   : > { %1830 = vmatprep.mubr.bf16.mxu0 %v8687_v36  ;;  %v8708_v36 = vld [vmem:[%s8984_s11 + $0x264] ss:$8 sps:$4 sm:$0xff]  }
 0x14a   : > { %v9106_v39 = vpop.f32.mrb[16].mxu0 }
 0x14b   : > { %12961 = vst [vmem:[#allocation9_spill] sm:$0xff] %v9106_v39  ;;  %v2509_v40 = vadd.f32 %v2508_v37, %v9106_v39  ;;  %v1618_v41 = vpop.f32.mrb[17].mxu0 }
 0x14c   : > { %v9110_v43 = vpop.f32.mrb[18].mxu0 }
 0x14d   : > { %12962 = vst [vmem:[#allocation10_spill] sm:$0xff] %v9110_v43  ;;  %v2510_v45 = vadd.f32 %v2509_v40, %v9110_v43  ;;  %v1621_v46 = vpop.f32.mrb[19].mxu0 }
 0x14e   : > { %v8711_v46 = vld [vmem:[%s8984_s11 + $0x274] ss:$8 sps:$4 sm:$0xff]  }
 0x14f   : > { %1831 = vmatmul.mubr.bf16.gmra.mrb[124].mxu0 %v8689_v42 }
 0x150   : > { %1838 = vmatprep.mubr.bf16.mxu0 %v8690_v44  ;;  %v8710_v44 = vld [vmem:[%s8984_s11 + $0x260] ss:$8 sps:$4 sm:$0xff]  }
 0x152   : > { %v9114_v47 = vpop.f32.mrb[20].mxu0 }
 0x153   : > { %12963 = vst [vmem:[#allocation11_spill] sm:$0xff] %v9114_v47  ;;  %v2511_v48 = vadd.f32 %v2510_v45, %v9114_v47  ;;  %v1626_v49 = vpop.f32.mrb[21].mxu0 }
 0x154   : > { %v9118_v51 = vpop.f32.mrb[22].mxu0 }
 0x155   : > { %12964 = vst [vmem:[#allocation12_spill] sm:$0xff] %v9118_v51  ;;  %v2512_v53 = vadd.f32 %v2511_v48, %v9118_v51  ;;  %v1629_v54 = vpop.f32.mrb[23].mxu0 }
 0x156   : > { %v8713_v54 = vld [vmem:[%s8984_s11 + $0x270] ss:$8 sps:$4 sm:$0xff]  }
 0x157   : > { %1839 = vmatmul.mubr.bf16.gmra.mrb[128].mxu0 %v8692_v50 }
 0x158   : > { %1846 = vmatprep.mubr.bf16.mxu0 %v8693_v52 }
 0x15a   : > { %v9122_v55 = vpop.f32.mrb[24].mxu0 }
 0x15b   : > { %12965 = vst [vmem:[#allocation13_spill] sm:$0xff] %v9122_v55  ;;  %v2513_v56 = vadd.f32 %v2512_v53, %v9122_v55  ;;  %v1634_v57 = vpop.f32.mrb[25].mxu0 }
 0x15c   : > { %v9126_v59 = vpop.f32.mrb[26].mxu0  ;;  %v8714_v57 = vld [vmem:[%s8984_s11 + $0x284] ss:$8 sps:$4 sm:$0xff]  }
 0x15d   : > { %12966 = vst [vmem:[#allocation14_spill] sm:$0xff] %v9126_v59  ;;  %v2514_v61 = vadd.f32 %v2513_v56, %v9126_v59  ;;  %v1637_v62 = vpop.f32.mrb[27].mxu0 }
 0x15f   : > { %1847 = vmatmul.mubr.bf16.gmra.mrb[132].mxu0 %v8695_v58 }
 0x160   : > { %1854 = vmatprep.mubr.bf16.mxu0 %v8696_v60 }
 0x162   : > { %v9130_v63 = vpop.f32.mrb[28].mxu0 }
 0x163   : > { %12967 = vst [vmem:[#allocation15_spill] sm:$0xff] %v9130_v63  ;;  %v2515_v0 = vadd.f32 %v2514_v61, %v9130_v63  ;;  %v1642_v1 = vpop.f32.mrb[29].mxu0 }
 0x164   : > { %v9134_v3 = vpop.f32.mrb[30].mxu0  ;;  %v8716_v1 = vld [vmem:[%s8984_s11 + $0x280] ss:$8 sps:$4 sm:$0xff]  }
 0x165   : > { %12968 = vst [vmem:[#allocation16_spill] sm:$0xff] %v9134_v3  ;;  %v2516_v5 = vadd.f32 %v2515_v0, %v9134_v3  ;;  %v1645_v6 = vpop.f32.mrb[31].mxu0 }
 0x167   : > { %1855 = vmatmul.mubr.bf16.gmra.mrb[136].mxu0 %v8698_v2 }
 0x168   : > { %1862 = vmatprep.mubr.bf16.mxu0 %v8699_v4  ;;  %v8717_v4 = vld [vmem:[%s8984_s11 + $0x294] ss:$8 sps:$4 sm:$0xff]  }
 0x16a   : > { %v9138_v7 = vpop.f32.mrb[32].mxu0 }
 0x16b   : > { %12969 = vst [vmem:[#allocation17_spill] sm:$0xff] %v9138_v7  ;;  %v2517_v9 = vadd.f32 %v2516_v5, %v9138_v7  ;;  %v1650_v10 = vpop.f32.mrb[33].mxu0 }
 0x16c   : > { %v9142_v13 = vpop.f32.mrb[34].mxu0 }
 0x16d   : > { %12970 = vst [vmem:[#allocation18_spill] sm:$0xff] %v9142_v13  ;;  %v2518_v16 = vadd.f32 %v2517_v9, %v9142_v13  ;;  %v1653_v17 = vpop.f32.mrb[35].mxu0 }
 0x16e   : > { %v8720_v17 = vld [vmem:[%s8984_s11 + $0x2a4] ss:$8 sps:$4 sm:$0xff]  }
 0x16f   : > { %1863 = vmatmul.mubr.bf16.gmra.mrb[140].mxu0 %v8701_v12 }
 0x170   : > { %1870 = vmatprep.mubr.bf16.mxu0 %v8702_v14  ;;  %v8719_v14 = vld [vmem:[%s8984_s11 + $0x290] ss:$8 sps:$4 sm:$0xff]  }
 0x172   : > { %v9146_v18 = vpop.f32.mrb[36].mxu0 }
 0x173   : > { %12971 = vst [vmem:[#allocation19_spill] sm:$0xff] %v9146_v18  ;;  %v2519_v20 = vadd.f32 %v2518_v16, %v9146_v18  ;;  %v1658_v21 = vpop.f32.mrb[37].mxu0 }
 0x174   : > { %v9150_v24 = vpop.f32.mrb[38].mxu0 }
 0x175   : > { %12972 = vst [vmem:[#allocation20_spill] sm:$0xff] %v9150_v24  ;;  %v2520_v26 = vadd.f32 %v2519_v20, %v9150_v24  ;;  %v1661_v28 = vpop.f32.mrb[39].mxu0 }
 0x176   : > { %v8722_v28 = vld [vmem:[%s8984_s11 + $0x2a0] ss:$8 sps:$4 sm:$0xff]  }
 0x177   : > { %1871 = vmatmul.mubr.bf16.gmra.mrb[144].mxu0 %v8704_v22 }
 0x178   : > { %1878 = vmatprep.mubr.bf16.mxu0 %v8705_v25 }
 0x17a   : > { %v9154_v29 = vpop.f32.mrb[40].mxu0 }
 0x17b   : > { %12973 = vst [vmem:[#allocation21_spill] sm:$0xff] %v9154_v29  ;;  %v2521_v30 = vadd.f32 %v2520_v26, %v9154_v29  ;;  %v1666_v32 = vpop.f32.mrb[41].mxu0 }
 0x17c   : > { %v9158_v34 = vpop.f32.mrb[42].mxu0  ;;  %v8723_v32 = vld [vmem:[%s8984_s11 + $0x2b4] ss:$8 sps:$4 sm:$0xff]  }
 0x17d   : > { %12974 = vst [vmem:[#allocation22_spill] sm:$0xff] %v9158_v34  ;;  %v2522_v37 = vadd.f32 %v2521_v30, %v9158_v34  ;;  %v1669_v38 = vpop.f32.mrb[43].mxu0 }
 0x17f   : > { %1879 = vmatmul.mubr.bf16.gmra.mrb[148].mxu0 %v8707_v33 }
 0x180   : > { %1886 = vmatprep.mubr.bf16.mxu0 %v8708_v36 }
 0x182   : > { %v9162_v40 = vpop.f32.mrb[44].mxu0 }
 0x183   : > { %12975 = vst [vmem:[#allocation23_spill] sm:$0xff] %v9162_v40  ;;  %v2523_v41 = vadd.f32 %v2522_v37, %v9162_v40  ;;  %v1674_v42 = vpop.f32.mrb[45].mxu0 }
 0x184   : > { %v9166_v45 = vpop.f32.mrb[46].mxu0  ;;  %v8725_v42 = vld [vmem:[%s8984_s11 + $0x2b0] ss:$8 sps:$4 sm:$0xff]  }
 0x185   : > { %12976 = vst [vmem:[#allocation24_spill] sm:$0xff] %v9166_v45  ;;  %v2524_v48 = vadd.f32 %v2523_v41, %v9166_v45  ;;  %v1677_v49 = vpop.f32.mrb[47].mxu0 }
 0x187   : > { %1887 = vmatmul.mubr.bf16.gmra.mrb[152].mxu0 %v8710_v44 }
 0x188   : > { %1894 = vmatprep.mubr.bf16.mxu0 %v8711_v46  ;;  %v8726_v46 = vld [vmem:[%s8984_s11 + $0x2c4] ss:$8 sps:$4 sm:$0xff]  }
 0x18a   : > { %v9170_v50 = vpop.f32.mrb[48].mxu0 }
 0x18b   : > { %12977 = vst [vmem:[#allocation25_spill] sm:$0xff] %v9170_v50  ;;  %v2525_v52 = vadd.f32 %v2524_v48, %v9170_v50  ;;  %v1682_v53 = vpop.f32.mrb[49].mxu0 }
 0x18c   : > { %v9174_v56 = vpop.f32.mrb[50].mxu0 }
 0x18d   : > { %12978 = vst [vmem:[#allocation26_spill] sm:$0xff] %v9174_v56  ;;  %v2526_v58 = vadd.f32 %v2525_v52, %v9174_v56  ;;  %v1685_v60 = vpop.f32.mrb[51].mxu0 }
 0x18e   : > { %v8729_v60 = vld [vmem:[%s8984_s11 + $0x2d4] ss:$8 sps:$4 sm:$0xff]  }
 0x18f   : > { %1895 = vmatmul.mubr.bf16.gmra.mrb[156].mxu0 %v8713_v54 }
 0x190   : > { %1902 = vmatprep.mubr.bf16.mxu0 %v8714_v57  ;;  %v8728_v57 = vld [vmem:[%s8984_s11 + $0x2c0] ss:$8 sps:$4 sm:$0xff]  }
 0x192   : > { %v9178_v61 = vpop.f32.mrb[52].mxu0 }
 0x193   : > { %12979 = vst [vmem:[#allocation27_spill] sm:$0xff] %v9178_v61  ;;  %v2527_v62 = vadd.f32 %v2526_v58, %v9178_v61  ;;  %v1690_v0 = vpop.f32.mrb[53].mxu0 }
 0x194   : > { %v9182_v2 = vpop.f32.mrb[54].mxu0 }
 0x195   : > { %12980 = vst [vmem:[#allocation28_spill] sm:$0xff] %v9182_v2  ;;  %v2528_v5 = vadd.f32 %v2527_v62, %v9182_v2  ;;  %v1693_v6 = vpop.f32.mrb[55].mxu0 }
 0x196   : > { %v8731_v6 = vld [vmem:[%s8984_s11 + $0x2d0] ss:$8 sps:$4 sm:$0xff]  }
 0x197   : > { %1903 = vmatmul.mubr.bf16.gmra.mrb[160].mxu0 %v8716_v1 }
 0x198   : > { %1910 = vmatprep.mubr.bf16.mxu0 %v8717_v4 }
 0x19a   : > { %v9186_v9 = vpop.f32.mrb[56].mxu0 }
 0x19b   : > { %12981 = vst [vmem:[#allocation29_spill] sm:$0xff] %v9186_v9  ;;  %v2529_v10 = vadd.f32 %v2528_v5, %v9186_v9  ;;  %v1698_v12 = vpop.f32.mrb[57].mxu0 }
 0x19c   : > { %v9190_v16 = vpop.f32.mrb[58].mxu0  ;;  %v8732_v12 = vld [vmem:[%s8984_s11 + $0x2e4] ss:$8 sps:$4 sm:$0xff]  }
 0x19d   : > { %12982 = vst [vmem:[#allocation30_spill] sm:$0xff] %v9190_v16  ;;  %v2530_v20 = vadd.f32 %v2529_v10, %v9190_v16  ;;  %v1701_v21 = vpop.f32.mrb[59].mxu0 }
 0x19f   : > { %1911 = vmatmul.mubr.bf16.gmra.mrb[164].mxu0 %v8719_v14 }
 0x1a0   : > { %1918 = vmatprep.mubr.bf16.mxu0 %v8720_v17 }
 0x1a2   : > { %v9194_v22 = vpop.f32.mrb[60].mxu0 }
 0x1a3   : > { %12983 = vst [vmem:[#allocation31_spill] sm:$0xff] %v9194_v22  ;;  %v2531_v25 = vadd.f32 %v2530_v20, %v9194_v22  ;;  %v1706_v26 = vpop.f32.mrb[61].mxu0 }
 0x1a4   : > { %v9198_v30 = vpop.f32.mrb[62].mxu0  ;;  %v8734_v26 = vld [vmem:[%s8984_s11 + $0x2e0] ss:$8 sps:$4 sm:$0xff]  }
 0x1a5   : > { %12984 = vst [vmem:[#allocation32_spill] sm:$0xff] %v9198_v30  ;;  %v2532_v33 = vadd.f32 %v2531_v25, %v9198_v30  ;;  %v1709_v36 = vpop.f32.mrb[63].mxu0 }
 0x1a7   : > { %1919 = vmatmul.mubr.bf16.gmra.mrb[168].mxu0 %v8722_v28 }
 0x1a8   : > { %1926 = vmatprep.mubr.bf16.mxu0 %v8723_v32  ;;  %v8735_v32 = vld [vmem:[%s8984_s11 + $0x2f4] ss:$8 sps:$4 sm:$0xff]  }
 0x1aa   : > { %v9202_v37 = vpop.f32.mrb[64].mxu0 }
 0x1ab   : > { %12985 = vst [vmem:[#allocation33_spill] sm:$0xff] %v9202_v37  ;;  %v2533_v38 = vadd.f32 %v2532_v33, %v9202_v37  ;;  %v1714_v41 = vpop.f32.mrb[65].mxu0 }
 0x1ac   : > { %v9206_v44 = vpop.f32.mrb[66].mxu0 }
 0x1ad   : > { %12986 = vst [vmem:[#allocation34_spill] sm:$0xff] %v9206_v44  ;;  %v2534_v48 = vadd.f32 %v2533_v38, %v9206_v44  ;;  %v1717_v49 = vpop.f32.mrb[67].mxu0 }
 0x1ae   : > { %v8738_v49 = vld [vmem:[%s8984_s11 + $0x304] ss:$8 sps:$4 sm:$0xff]  }
 0x1af   : > { %1927 = vmatmul.mubr.bf16.gmra.mrb[172].mxu0 %v8725_v42 }
 0x1b0   : > { %1934 = vmatprep.mubr.bf16.mxu0 %v8726_v46  ;;  %v8737_v46 = vld [vmem:[%s8984_s11 + $0x2f0] ss:$8 sps:$4 sm:$0xff]  }
 0x1b2   : > { %v9210_v52 = vpop.f32.mrb[68].mxu0 }
 0x1b3   : > { %12987 = vst [vmem:[#allocation35_spill] sm:$0xff] %v9210_v52  ;;  %v2535_v53 = vadd.f32 %v2534_v48, %v9210_v52  ;;  %v1722_v54 = vpop.f32.mrb[69].mxu0  ;;  %v9591_v52 = vld [vmem:[%s12570_s4 + $0x78] sm:$0xff] }
 0x1b4   : > { %v9214_v58 = vpop.f32.mrb[70].mxu0 }
 0x1b5   : > { %12988 = vst [vmem:[#allocation36_spill] sm:$0xff] %v9214_v58  ;;  %v2536_v62 = vadd.f32 %v2535_v53, %v9214_v58  ;;  %v1725_v0 = vpop.f32.mrb[71].mxu0  ;;  %v9586_v58 = vld [vmem:[%s12570_s4 + $0x70] sm:$0xff] }
 0x1b6   : > { %v8740_v0 = vld [vmem:[%s8984_s11 + $0x300] ss:$8 sps:$4 sm:$0xff]  }
 0x1b7   : > { %1935 = vmatmul.mubr.bf16.gmra.mrb[176].mxu0 %v8728_v57 }
 0x1b8   : > { %1942 = vmatprep.mubr.bf16.mxu0 %v8729_v60 }
 0x1ba   : > { %v9218_v1 = vpop.f32.mrb[72].mxu0 }
 0x1bb   : > { %12989 = vst [vmem:[#allocation37_spill] sm:$0xff] %v9218_v1  ;;  %v2537_v4 = vadd.f32 %v2536_v62, %v9218_v1  ;;  %v1730_v5 = vpop.f32.mrb[73].mxu0 }
 0x1bc   : > { %v9222_v10 = vpop.f32.mrb[74].mxu0  ;;  %v8741_v5 = vld [vmem:[%s8984_s11 + $0x314] ss:$8 sps:$4 sm:$0xff]  }
 0x1bd   : > { %12990 = vst [vmem:[#allocation38_spill] sm:$0xff] %v9222_v10  ;;  %v2538_v14 = vadd.f32 %v2537_v4, %v9222_v10  ;;  %v1733_v17 = vpop.f32.mrb[75].mxu0 }
 0x1bf   : > { %1943 = vmatmul.mubr.bf16.gmra.mrb[180].mxu0 %v8731_v6 }
 0x1c0   : > { %1950 = vmatprep.mubr.bf16.mxu0 %v8732_v12 }
 0x1c2   : > { %v9226_v20 = vpop.f32.mrb[76].mxu0 }
 0x1c3   : > { %12991 = vst [vmem:[#allocation39_spill] sm:$0xff] %v9226_v20  ;;  %v2539_v21 = vadd.f32 %v2538_v14, %v9226_v20  ;;  %v1738_v25 = vpop.f32.mrb[77].mxu0  ;;  %v9563_v20 = vld [vmem:[%s12570_s4 + $0x60] sm:$0xff] }
 0x1c4   : > { %v9230_v28 = vpop.f32.mrb[78].mxu0  ;;  %v8743_v25 = vld [vmem:[%s8984_s11 + $0x310] ss:$8 sps:$4 sm:$0xff]  }
 0x1c5   : > { %12992 = vst [vmem:[#allocation40_spill] sm:$0xff] %v9230_v28  ;;  %v2540_v33 = vadd.f32 %v2539_v21, %v9230_v28  ;;  %v1741_v36 = vpop.f32.mrb[79].mxu0  ;;  %v9547_v28 = vld [vmem:[%s12570_s4 + $0x58] sm:$0xff] }
 0x1c7   : > { %1951 = vmatmul.mubr.bf16.gmra.mrb[184].mxu0 %v8734_v26 }
 0x1c8   : > { %1958 = vmatprep.mubr.bf16.mxu0 %v8735_v32  ;;  %v8744_v32 = vld [vmem:[%s8984_s11 + $0x324] ss:$8 sps:$4 sm:$0xff]  }
 0x1ca   : > { %v9234_v38 = vpop.f32.mrb[80].mxu0 }
 0x1cb   : > { %12993 = vst [vmem:[#allocation41_spill] sm:$0xff] %v9234_v38  ;;  %v2541_v41 = vadd.f32 %v2540_v33, %v9234_v38  ;;  %v1746_v42 = vpop.f32.mrb[81].mxu0  ;;  %v9542_v38 = vld [vmem:[%s12570_s4 + $0x50] sm:$0xff] }
 0x1cc   : > { %v9238_v48 = vpop.f32.mrb[82].mxu0 }
 0x1cd   : > { %12994 = vst [vmem:[#allocation42_spill] sm:$0xff] %v9238_v48  ;;  %v2542_v53 = vadd.f32 %v2541_v41, %v9238_v48  ;;  %v1749_v54 = vpop.f32.mrb[83].mxu0 }
 0x1ce   : > { %v8747_v54 = vld [vmem:[%s8984_s11 + $0x334] ss:$8 sps:$4 sm:$0xff]  }
 0x1cf   : > { %1959 = vmatmul.mubr.bf16.gmra.mrb[188].mxu0 %v8737_v46 }
 0x1d0   : > { %1966 = vmatprep.mubr.bf16.mxu0 %v8738_v49  ;;  %v8746_v49 = vld [vmem:[%s8984_s11 + $0x320] ss:$8 sps:$4 sm:$0xff]  }
 0x1d2   : > { %v9242_v57 = vpop.f32.mrb[84].mxu0 }
 0x1d3   : > { %12995 = vst [vmem:[#allocation43_spill] sm:$0xff] %v9242_v57  ;;  %v2543_v60 = vadd.f32 %v2542_v53, %v9242_v57  ;;  %v1754_v62 = vpop.f32.mrb[85].mxu0 }
 0x1d4   : > { %v9246_v4 = vpop.f32.mrb[86].mxu0 }
 0x1d5   : > { %12996 = vst [vmem:[#allocation44_spill] sm:$0xff] %v9246_v4  ;;  %v2544_v6 = vadd.f32 %v2543_v60, %v9246_v4  ;;  %v1757_v12 = vpop.f32.mrb[87].mxu0 }
 0x1d6   : > { %v8749_v12 = vld [vmem:[%s8984_s11 + $0x330] ss:$8 sps:$4 sm:$0xff]  }
 0x1d7   : > { %1967 = vmatmul.mubr.bf16.gmra.mrb[192].mxu0 %v8740_v0 }
 0x1d8   : > { %1974 = vmatprep.mubr.bf16.mxu0 %v8741_v5 }
 0x1da   : > { %v9250_v14 = vpop.f32.mrb[88].mxu0 }
 0x1db   : > { %12997 = vst [vmem:[#allocation45_spill] sm:$0xff] %v9250_v14  ;;  %v2545_v17 = vadd.f32 %v2544_v6, %v9250_v14  ;;  %v1762_v21 = vpop.f32.mrb[89].mxu0  ;;  %v9517_v14 = vld [vmem:[%s12570_s4 + $0x40] sm:$0xff] }
 0x1dc   : > { %v9254_v26 = vpop.f32.mrb[90].mxu0  ;;  %v8750_v21 = vld [vmem:[%s8984_s11 + $0x344] ss:$8 sps:$4 sm:$0xff]  }
 0x1dd   : > { %12998 = vst [vmem:[#allocation46_spill] sm:$0xff] %v9254_v26  ;;  %v2546_v33 = vadd.f32 %v2545_v17, %v9254_v26  ;;  %v1765_v36 = vpop.f32.mrb[91].mxu0  ;;  %v9501_v26 = vld [vmem:[%s12570_s4 + $0x38] sm:$0xff] }
 0x1df   : > { %1975 = vmatmul.mubr.bf16.gmra.mrb[196].mxu0 %v8743_v25 }
 0x1e0   : > { %1982 = vmatprep.mubr.bf16.mxu0 %v8744_v32 }
 0x1e2   : > { %v9258_v41 = vpop.f32.mrb[92].mxu0 }
 0x1e3   : > { %12999 = vst [vmem:[#allocation47_spill] sm:$0xff] %v9258_v41  ;;  %v2547_v42 = vadd.f32 %v2546_v33, %v9258_v41  ;;  %v1770_v46 = vpop.f32.mrb[93].mxu0  ;;  %v9496_v41 = vld [vmem:[%s12570_s4 + $0x30] sm:$0xff] }
 0x1e4   : > { %v9262_v53 = vpop.f32.mrb[94].mxu0  ;;  %v8752_v46 = vld [vmem:[%s8984_s11 + $0x340] ss:$8 sps:$4 sm:$0xff]  }
 0x1e5   : > { %13000 = vst [vmem:[#allocation48_spill] sm:$0xff] %v9262_v53  ;;  %v2548_v60 = vadd.f32 %v2547_v42, %v9262_v53  ;;  %v1773_v62 = vpop.f32.mrb[95].mxu0 }
 0x1e7   : > { %1983 = vmatmul.mubr.bf16.gmra.mrb[200].mxu0 %v8746_v49 }
 0x1e8   : > { %1990 = vmatprep.mubr.bf16.mxu0 %v8747_v54  ;;  %v8753_v54 = vld [vmem:[%s8984_s11 + $0x354] ss:$8 sps:$4 sm:$0xff]  }
 0x1ea   : > { %v9266_v0 = vpop.f32.mrb[96].mxu0 }
 0x1eb   : > { %13001 = vst [vmem:[#allocation49_spill] sm:$0xff] %v9266_v0  ;;  %v2549_v5 = vadd.f32 %v2548_v60, %v9266_v0  ;;  %v1778_v6 = vpop.f32.mrb[97].mxu0 }
 0x1ec   : > { %v9270_v17 = vpop.f32.mrb[98].mxu0 }
 0x1ed   : > { %13002 = vst [vmem:[#allocation50_spill] sm:$0xff] %v9270_v17  ;;  %v2550_v25 = vadd.f32 %v2549_v5, %v9270_v17  ;;  %v1781_v32 = vpop.f32.mrb[99].mxu0 }
 0x1ef   : > { %1991 = vmatmul.mubr.bf16.gmra.mrb[204].mxu0 %v8749_v12 }
 0x1f0   : > { %1998 = vmatprep.mubr.bf16.mxu0 %v8750_v21  ;;  %v8755_v21 = vld [vmem:[%s8984_s11 + $0x350] ss:$8 sps:$4 sm:$0xff]  }
 0x1f2   : > { %v9274_v33 = vpop.f32.mrb[100].mxu0 }
 0x1f3   : > { %13003 = vst [vmem:[#allocation51_spill] sm:$0xff] %v9274_v33  ;;  %v2551_v36 = vadd.f32 %v2550_v25, %v9274_v33  ;;  %v1786_v42 = vpop.f32.mrb[101].mxu0  ;;  %v8756_v25 = vld [vmem:[%s8984_s11 + $0x364] ss:$8 sps:$4 sm:$0xff]  }
 0x1f4   : > { %v9278_v49 = vpop.f32.mrb[102].mxu0 }
 0x1f5   : > { %13004 = vst [vmem:[#allocation52_spill] sm:$0xff] %v9278_v49  ;;  %v2552_v60 = vadd.f32 %v2551_v36, %v9278_v49  ;;  %v1789_v62 = vpop.f32.mrb[103].mxu0 }
 0x1f6   : > { %v8758_v62 = vld [vmem:[%s8984_s11 + $0x360] ss:$8 sps:$4 sm:$0xff]  }
 0x1f7   : > { %1999 = vmatmul.mubr.bf16.gmra.mrb[208].mxu0 %v8752_v46 }
 0x1f8   : > { %2006 = vmatprep.mubr.bf16.mxu0 %v8753_v54 }
 0x1fa   : > { %v9282_v5 = vpop.f32.mrb[104].mxu0 }
 0x1fb   : > { %13005 = vst [vmem:[#allocation53_spill] sm:$0xff] %v9282_v5  ;;  %v2553_v6 = vadd.f32 %v2552_v60, %v9282_v5  ;;  %v1794_v12 = vpop.f32.mrb[105].mxu0  ;;  %v8759_v60 = vld [vmem:[%s8984_s11 + $0x374] ss:$8 sps:$4 sm:$0xff]  }
 0x1fc   : > { %v9286_v32 = vpop.f32.mrb[106].mxu0 }
 0x1fd   : > { %13006 = vst [vmem:[#allocation54_spill] sm:$0xff] %v9286_v32  ;;  %v2554_v42 = vadd.f32 %v2553_v6, %v9286_v32  ;;  %v1797_v33 = vpop.f32.mrb[107].mxu0 }
 0x1ff   : > { %2007 = vmatmul.mubr.bf16.gmra.mrb[212].mxu0 %v8755_v21 }
 0x200   : > { %2014 = vmatprep.mubr.bf16.mxu0 %v8756_v25  ;;  %v8761_v25 = vld [vmem:[%s8984_s11 + $0x370] ss:$8 sps:$4 sm:$0xff]  }
 0x202   : > { %v9290_v36 = vpop.f32.mrb[108].mxu0 }
 0x203   : > { %13007 = vst [vmem:[#allocation55_spill] sm:$0xff] %v9290_v36  ;;  %v2555_v46 = vadd.f32 %v2554_v42, %v9290_v36  ;;  %v1802_v54 = vpop.f32.mrb[109].mxu0  ;;  %v8762_v42 = vld [vmem:[%s8984_s11 + $0x384] ss:$8 sps:$4 sm:$0xff]  }
 0x204   : > { %v9294_v49 = vpop.f32.mrb[110].mxu0 }
 0x205   : > { %13008 = vst [vmem:[#allocation56_spill] sm:$0xff] %v9294_v49  ;;  %v2556_v12 = vadd.f32 %v2555_v46, %v9294_v49  ;;  %v1805_v5 = vpop.f32.mrb[111].mxu0 }
 0x207   : > { %2015 = vmatmul.mubr.bf16.gmra.mrb[216].mxu0 %v8758_v62 }
 0x208   : > { %2022 = vmatprep.mubr.bf16.mxu0 %v8759_v60  ;;  %v8764_v60 = vld [vmem:[%s8984_s11 + $0x380] ss:$8 sps:$4 sm:$0xff]  }
 0x20a   : > { %v9298_v33 = vpop.f32.mrb[112].mxu0 }
 0x20b   : > { %13009 = vst [vmem:[#allocation57_spill] sm:$0xff] %v9298_v33  ;;  %v2557_v6 = vadd.f32 %v2556_v12, %v9298_v33  ;;  %v1810_v21 = vpop.f32.mrb[113].mxu0  ;;  %v8765_v12 = vld [vmem:[%s8984_s11 + $0x394] ss:$8 sps:$4 sm:$0xff]  }
 0x20c   : > { %v9302_v32 = vpop.f32.mrb[114].mxu0 }
 0x20d   : > { %13010 = vst [vmem:[#allocation58_spill] sm:$0xff] %v9302_v32  ;;  %v2558_v54 = vadd.f32 %v2557_v6, %v9302_v32  ;;  %v1813_v36 = vpop.f32.mrb[115].mxu0 }
 0x20f   : > { %2023 = vmatmul.mubr.bf16.gmra.mrb[220].mxu0 %v8761_v25 }
 0x210   : > { %2030 = vmatprep.mubr.bf16.mxu0 %v8762_v42  ;;  %v8767_v42 = vld [vmem:[%s8984_s11 + $0x390] ss:$8 sps:$4 sm:$0xff]  }
 0x212   : > { %v9306_v5 = vpop.f32.mrb[116].mxu0 }
 0x213   : > { %13011 = vst [vmem:[#allocation59_spill] sm:$0xff] %v9306_v5  ;;  %v2559_v46 = vadd.f32 %v2558_v54, %v9306_v5  ;;  %v1818_v62 = vpop.f32.mrb[117].mxu0  ;;  %v8768_v54 = vld [vmem:[%s8984_s11 + $0x3a4] ss:$8 sps:$4 sm:$0xff]  }
 0x214   : > { %v9310_v49 = vpop.f32.mrb[118].mxu0 }
 0x215   : > { %13012 = vst [vmem:[#allocation60_spill] sm:$0xff] %v9310_v49  ;;  %v2560_v21 = vadd.f32 %v2559_v46, %v9310_v49  ;;  %v1821_v33 = vpop.f32.mrb[119].mxu0 }
 0x217   : > { %2031 = vmatmul.mubr.bf16.gmra.mrb[224].mxu0 %v8764_v60 }
 0x218   : > { %2038 = vmatprep.mubr.bf16.mxu0 %v8765_v12  ;;  %v8770_v12 = vld [vmem:[%s8984_s11 + $0x3a0] ss:$8 sps:$4 sm:$0xff]  }
 0x21a   : > { %v9314_v36 = vpop.f32.mrb[120].mxu0 }
 0x21b   : > { %13013 = vst [vmem:[#allocation61_spill] sm:$0xff] %v9314_v36  ;;  %v2561_v6 = vadd.f32 %v2560_v21, %v9314_v36  ;;  %v1826_v25 = vpop.f32.mrb[121].mxu0  ;;  %v8771_v21 = vld [vmem:[%s8984_s11 + $0x3b4] ss:$8 sps:$4 sm:$0xff]  }
 0x21c   : > { %v9318_v32 = vpop.f32.mrb[122].mxu0 }
 0x21d   : > { %13014 = vst [vmem:[#allocation62_spill] sm:$0xff] %v9318_v32  ;;  %v2562_v62 = vadd.f32 %v2561_v6, %v9318_v32  ;;  %v1829_v5 = vpop.f32.mrb[123].mxu0 }
 0x21f   : > { %2039 = vmatmul.mubr.bf16.gmra.mrb[228].mxu0 %v8767_v42 }
 0x220   : > { %2046 = vmatprep.mubr.bf16.mxu0 %v8768_v54  ;;  %v8773_v54 = vld [vmem:[%s8984_s11 + $0x3b0] ss:$8 sps:$4 sm:$0xff]  }
 0x222   : > { %v9322_v33 = vpop.f32.mrb[124].mxu0 }
 0x223   : > { %13015 = vst [vmem:[#allocation63_spill] sm:$0xff] %v9322_v33  ;;  %v2563_v46 = vadd.f32 %v2562_v62, %v9322_v33  ;;  %v1834_v60 = vpop.f32.mrb[125].mxu0  ;;  %v8774_v62 = vld [vmem:[%s8984_s11 + $0x3c4] ss:$8 sps:$4 sm:$0xff]  }
 0x224   : > { %v9326_v49 = vpop.f32.mrb[126].mxu0 }
 0x225   : > { %13016 = vst [vmem:[#allocation64_spill] sm:$0xff] %v9326_v49  ;;  %v2564_v25 = vadd.f32 %v2563_v46, %v9326_v49  ;;  %v1837_v36 = vpop.f32.mrb[127].mxu0 }
 0x227   : > { %2047 = vmatmul.mubr.bf16.gmra.mrb[232].mxu0 %v8770_v12 }
 0x228   : > { %2054 = vmatprep.mubr.bf16.mxu0 %v8771_v21  ;;  %v8776_v21 = vld [vmem:[%s8984_s11 + $0x3c0] ss:$8 sps:$4 sm:$0xff]  }
 0x22a   : > { %v9330_v5 = vpop.f32.mrb[128].mxu0 }
 0x22b   : > { %13017 = vst [vmem:[#allocation65_spill] sm:$0xff] %v9330_v5  ;;  %v2565_v6 = vadd.f32 %v2564_v25, %v9330_v5  ;;  %v1842_v42 = vpop.f32.mrb[129].mxu0  ;;  %v8777_v25 = vld [vmem:[%s8984_s11 + $0x3d4] ss:$8 sps:$4 sm:$0xff]  }
 0x22c   : > { %v9334_v32 = vpop.f32.mrb[130].mxu0 }
 0x22d   : > { %13018 = vst [vmem:[#allocation66_spill] sm:$0xff] %v9334_v32  ;;  %v2566_v60 = vadd.f32 %v2565_v6, %v9334_v32  ;;  %v1845_v33 = vpop.f32.mrb[131].mxu0 }
 0x22f   : > { %2055 = vmatmul.mubr.bf16.gmra.mrb[236].mxu0 %v8773_v54 }
 0x230   : > { %2062 = vmatprep.mubr.bf16.mxu0 %v8774_v62  ;;  %v8779_v62 = vld [vmem:[%s8984_s11 + $0x3d0] ss:$8 sps:$4 sm:$0xff]  }
 0x232   : > { %v9338_v36 = vpop.f32.mrb[132].mxu0 }
 0x233   : > { %13019 = vst [vmem:[#allocation67_spill] sm:$0xff] %v9338_v36  ;;  %v2567_v46 = vadd.f32 %v2566_v60, %v9338_v36  ;;  %v1850_v12 = vpop.f32.mrb[133].mxu0  ;;  %v8780_v60 = vld [vmem:[%s8984_s11 + $0x3e4] ss:$8 sps:$4 sm:$0xff]  }
 0x234   : > { %v9342_v49 = vpop.f32.mrb[134].mxu0 }
 0x235   : > { %13020 = vst [vmem:[#allocation68_spill] sm:$0xff] %v9342_v49  ;;  %v2568_v42 = vadd.f32 %v2567_v46, %v9342_v49  ;;  %v1853_v5 = vpop.f32.mrb[135].mxu0 }
 0x237   : > { %2063 = vmatmul.mubr.bf16.gmra.mrb[240].mxu0 %v8776_v21 }
 0x238   : > { %2070 = vmatprep.mubr.bf16.mxu0 %v8777_v25  ;;  %v8782_v25 = vld [vmem:[%s8984_s11 + $0x3e0] ss:$8 sps:$4 sm:$0xff]  }
 0x23a   : > { %v9346_v33 = vpop.f32.mrb[136].mxu0 }
 0x23b   : > { %13021 = vst [vmem:[#allocation69_spill] sm:$0xff] %v9346_v33  ;;  %v2569_v6 = vadd.f32 %v2568_v42, %v9346_v33  ;;  %v1858_v54 = vpop.f32.mrb[137].mxu0  ;;  %v8783_v42 = vld [vmem:[%s8984_s11 + $0x3f4] ss:$8 sps:$4 sm:$0xff]  }
 0x23c   : > { %v9350_v32 = vpop.f32.mrb[138].mxu0 }
 0x23d   : > { %13022 = vst [vmem:[#allocation70_spill] sm:$0xff] %v9350_v32  ;;  %v2570_v12 = vadd.f32 %v2569_v6, %v9350_v32  ;;  %v1861_v36 = vpop.f32.mrb[139].mxu0 }
 0x23f   : > { %2071 = vmatmul.mubr.bf16.gmra.mrb[244].mxu0 %v8779_v62  ;;  %v8785_v62 = vld [vmem:[%s8984_s11 + $0x3f0] ss:$8 sps:$4 sm:$0xff]  }
 0x240   : > { %2078 = vmatprep.mubr.bf16.mxu0 %v8780_v60 }
 0x242   : > { %v9354_v5 = vpop.f32.mrb[140].mxu0 }
 0x243   : > { %13023 = vst [vmem:[#allocation71_spill] sm:$0xff] %v9354_v5  ;;  %v2571_v46 = vadd.f32 %v2570_v12, %v9354_v5  ;;  %v1866_v21 = vpop.f32.mrb[141].mxu0 }
 0x244   : > { %v9358_v49 = vpop.f32.mrb[142].mxu0 }
 0x245   : > { %13024 = vst [vmem:[#allocation72_spill] sm:$0xff] %v9358_v49  ;;  %v2572_v54 = vadd.f32 %v2571_v46, %v9358_v49  ;;  %v1869_v33 = vpop.f32.mrb[143].mxu0 }
 0x247   : > { %2079 = vmatmul.mubr.bf16.gmra.mrb[248].mxu0 %v8782_v25 }
 0x248   : > { %2086 = vmatprep.mubr.bf16.mxu0 %v8783_v42 }
 0x24a   : > { %v9362_v17 = vpop.f32.mrb[144].mxu0 }
 0x24b   : > { %13025 = vst [vmem:[#allocation73_spill] sm:$0xff] %v9362_v17  ;;  %v2573_v36 = vadd.f32 %v2572_v54, %v9362_v17  ;;  %v1874_v6 = vpop.f32.mrb[145].mxu0 }
 0x24c   : > { %v9366_v60 = vpop.f32.mrb[146].mxu0 }
 0x24d   : > { %13026 = vst [vmem:[#allocation74_spill] sm:$0xff] %v9366_v60  ;;  %v2574_v12 = vadd.f32 %v2573_v36, %v9366_v60  ;;  %v1877_v21 = vpop.f32.mrb[147].mxu0 }
 0x24f   : > { %2087 = vmatmul.mubr.bf16.gmra.mrb[252].mxu0 %v8785_v62 }
 0x252   : > { %v9369_v5 = vpop.f32.mrb[148].mxu0 }
 0x253   : > { %13027 = vst [vmem:[#allocation75_spill] sm:$0xff] %v9369_v5  ;;  %v2575_v32 = vadd.f32 %v2574_v12, %v9369_v5  ;;  %v1882_v46 = vpop.f32.mrb[149].mxu0 }
 0x254   : > { %v9372_v33 = vpop.f32.mrb[150].mxu0 }
 0x255   : > { %13028 = vst [vmem:[#allocation76_spill] sm:$0xff] %v9372_v33  ;;  %v2576_v25 = vadd.f32 %v2575_v32, %v9372_v33  ;;  %v1885_v42 = vpop.f32.mrb[151].mxu0 }
 0x25a   : > { %v9375_v49 = vpop.f32.mrb[152].mxu0 }
 0x25b   : > { %13029 = vst [vmem:[#allocation77_spill] sm:$0xff] %v9375_v49  ;;  %v2577_v54 = vadd.f32 %v2576_v25, %v9375_v49  ;;  %v1890_v6 = vpop.f32.mrb[153].mxu0 }
 0x25c   : > { %v9378_v17 = vpop.f32.mrb[154].mxu0 }
 0x25d   : > { %13030 = vst [vmem:[#allocation78_spill] sm:$0xff] %v9378_v17  ;;  %v2578_v36 = vadd.f32 %v2577_v54, %v9378_v17  ;;  %v1893_v62 = vpop.f32.mrb[155].mxu0 }
 0x262   : > { %v9381_v21 = vpop.f32.mrb[156].mxu0 }
 0x263   : > { %13031 = vst [vmem:[#allocation79_spill] sm:$0xff] %v9381_v21  ;;  %v2579_v12 = vadd.f32 %v2578_v36, %v9381_v21  ;;  %v1898_v46 = vpop.f32.mrb[157].mxu0 }
 0x264   : > { %v9384_v5 = vpop.f32.mrb[158].mxu0 }
 0x265   : > { %13032 = vst [vmem:[#allocation80_spill] sm:$0xff] %v9384_v5  ;;  %v2580_v32 = vadd.f32 %v2579_v12, %v9384_v5  ;;  %v1901_v42 = vpop.f32.mrb[159].mxu0 }
 0x26a   : > { %v9387_v33 = vpop.f32.mrb[160].mxu0 }
 0x26b   : > { %13033 = vst [vmem:[#allocation81_spill] sm:$0xff] %v9387_v33  ;;  %v2581_v25 = vadd.f32 %v2580_v32, %v9387_v33  ;;  %v1906_v6 = vpop.f32.mrb[161].mxu0 }
 0x26c   : > { %v9390_v49 = vpop.f32.mrb[162].mxu0 }
 0x26d   : > { %13034 = vst [vmem:[#allocation82_spill] sm:$0xff] %v9390_v49  ;;  %v2582_v54 = vadd.f32 %v2581_v25, %v9390_v49  ;;  %v1909_v62 = vpop.f32.mrb[163].mxu0 }
 0x272   : > { %v9393_v17 = vpop.f32.mrb[164].mxu0 }
 0x273   : > { %13035 = vst [vmem:[#allocation83_spill] sm:$0xff] %v9393_v17  ;;  %v2583_v36 = vadd.f32 %v2582_v54, %v9393_v17  ;;  %v1914_v46 = vpop.f32.mrb[165].mxu0 }
 0x274   : > { %v9396_v21 = vpop.f32.mrb[166].mxu0 }
 0x275   : > { %13036 = vst [vmem:[#allocation84_spill] sm:$0xff] %v9396_v21  ;;  %v2584_v12 = vadd.f32 %v2583_v36, %v9396_v21  ;;  %v1917_v42 = vpop.f32.mrb[167].mxu0 }
 0x27a   : > { %v9399_v5 = vpop.f32.mrb[168].mxu0 }
 0x27b   : > { %13037 = vst [vmem:[#allocation85_spill] sm:$0xff] %v9399_v5  ;;  %v2585_v32 = vadd.f32 %v2584_v12, %v9399_v5  ;;  %v1922_v6 = vpop.f32.mrb[169].mxu0 }
 0x27c   : > { %v9402_v33 = vpop.f32.mrb[170].mxu0 }
 0x27d   : > { %13038 = vst [vmem:[#allocation86_spill] sm:$0xff] %v9402_v33  ;;  %v2586_v25 = vadd.f32 %v2585_v32, %v9402_v33  ;;  %v1925_v62 = vpop.f32.mrb[171].mxu0 }
 0x282   : > { %v9405_v49 = vpop.f32.mrb[172].mxu0 }
 0x283   : > { %13039 = vst [vmem:[#allocation87_spill] sm:$0xff] %v9405_v49  ;;  %v2587_v54 = vadd.f32 %v2586_v25, %v9405_v49  ;;  %v1930_v46 = vpop.f32.mrb[173].mxu0 }
 0x284   : > { %v9408_v17 = vpop.f32.mrb[174].mxu0 }
 0x285   : > { %13040 = vst [vmem:[#allocation88_spill] sm:$0xff] %v9408_v17  ;;  %v2588_v36 = vadd.f32 %v2587_v54, %v9408_v17  ;;  %v1933_v42 = vpop.f32.mrb[175].mxu0  ;;  %v9471_v17 = vld [vmem:[%s12570_s4 + $0x20] sm:$0xff] }
 0x28a   : > { %v9411_v21 = vpop.f32.mrb[176].mxu0 }
 0x28b   : > { %13041 = vst [vmem:[#allocation89_spill] sm:$0xff] %v9411_v21  ;;  %v2589_v12 = vadd.f32 %v2588_v36, %v9411_v21  ;;  %v1938_v6 = vpop.f32.mrb[177].mxu0  ;;  %v9426_v36 = vld [vmem:[%s12570_s4] sm:$0xff] }
 0x28c   : > { %v9414_v5 = vpop.f32.mrb[178].mxu0  ;;  %v12615_v6 = vand.u32 4294901760, %v9426_v36 }
 0x28d   : > { %13042 = vst [vmem:[#allocation90_spill] sm:$0xff] %v9414_v5  ;;  %v2590_v32 = vadd.f32 %v2589_v12, %v9414_v5  ;;  %v1941_v62 = vpop.f32.mrb[179].mxu0  ;;  %v9431_v12 = vld [vmem:[%s12570_s4 + $0x8] sm:$0xff]  ;;  %v9450_v5 = vld [vmem:[%s12570_s4 + $0x10] sm:$0xff] }
 0x28e   : > { %v13062_v37 = vand.u32 4294901760, %v9431_v12 }
 0x290   : > { %v9607_v30 = vsub.f32 %v9431_v12, %v13062_v37 }
 0x292   : > { %v9417_v33 = vpop.f32.mrb[180].mxu0 }
 0x293   : > { %13043 = vst [vmem:[#allocation91_spill] sm:$0xff] %v9417_v33  ;;  %v2591_v25 = vadd.f32 %v2590_v32, %v9417_v33  ;;  %v1946_v46 = vpop.f32.mrb[181].mxu0  ;;  %v12614_v32 = vand.u32 4294901760, %v9431_v12  ;;  %v12618_v33 = vmov 0.0|0.0  }
 0x294   : > { %v9420_v49 = vpop.f32.mrb[182].mxu0  ;;  %8117 = vmatprep.subr.bf16.mxu1 %v12618_v33 }
 0x295   : > { %13044 = vst [vmem:[#allocation92_spill] sm:$0xff] %v9420_v49  ;;  %v2592_v54 = vadd.f32 %v2591_v25, %v9420_v49  ;;  %v1949_v42 = vpop.f32.mrb[183].mxu0 }
 0x296   : > { %v9442_v42 = vpack.c.bf16 %v12614_v32, %v12615_v6  ;;  %v12622_v32 = vand.u32 4294901760, %v9450_v5 }
 0x298   : > { %13046 = vst [vmem:[#allocation94_spill] sm:$0xff] %v9442_v42  ;;  %8119 = vmatpush3.bf16.msra.mxu1 %v9442_v42 }
 0x299   : > { %8120 = vmatprep.subr.bf16.mxu1 %v12618_v33 }
 0x29a   : > { %v9435_v62 = vpop.f32.mrb[184].mxu0 }
 0x29b   : > { %13045 = vst [vmem:[#allocation93_spill] sm:$0xff] %v9435_v62  ;;  %v2593_v46 = vadd.f32 %v2592_v54, %v9435_v62  ;;  %v1954_v25 = vpop.f32.mrb[185].mxu0  ;;  %v9455_v54 = vld [vmem:[%s12570_s4 + $0x18] sm:$0xff] }
 0x29c   : > { %v9444_v49 = vpop.f32.mrb[186].mxu0  ;;  %v12621_v6 = vand.u32 4294901760, %v9455_v54 }
 0x29d   : > { %13047 = vst [vmem:[#allocation95_spill] sm:$0xff] %v9444_v49  ;;  %v2594_v25 = vadd.f32 %v2593_v46, %v9444_v49  ;;  %v1957_v62 = vpop.f32.mrb[187].mxu0  ;;  %v12629_v46 = vand.u32 4294901760, %v9471_v17 }
 0x29e   : > { %v9466_v21 = vpack.c.bf16 %v12621_v6, %v12622_v32  ;;  %v9476_v62 = vld [vmem:[%s12570_s4 + $0x28] sm:$0xff]  ;;  %v13050_v6 = vmov 0.0|0.0  }
 0x29f   : > { %v12628_v33 = vand.u32 4294901760, %v9476_v62 }
 0x2a0   : > { %13048 = vst [vmem:[#allocation96_spill] sm:$0xff] %v9466_v21  ;;  %8122 = vmatpush3.bf16.msra.mxu1 %v9466_v21 }
 0x2a1   : > { %8123 = vmatprep.subr.bf16.mxu1 %v13050_v6  ;;  %v9489_v0 = vpack.c.bf16 %v12628_v33, %v12629_v46  ;;  %v12635_v33 = vand.u32 4294901760, %v9496_v41  ;;  %v12634_v46 = vand.u32 4294901760, %v9501_v26 }
 0x2a2   : > { %v9481_v49 = vpop.f32.mrb[188].mxu0 }
 0x2a3   : > { %13049 = vst [vmem:[#allocation97_spill] sm:$0xff] %v9481_v49  ;;  %v2595_v32 = vadd.f32 %v2594_v25, %v9481_v49  ;;  %v1962_v60 = vpop.f32.mrb[189].mxu0  ;;  %13051 = vst [vmem:[#allocation98_spill] sm:$0xff] %v9489_v0  ;;  %v9512_v49 = vpack.c.bf16 %v12634_v46, %v12635_v33 }
 0x2a4   : > { %v9491_v53 = vpop.f32.mrb[190].mxu0  ;;  %8125 = vmatpush3.bf16.msra.mxu1 %v9489_v0 }
 0x2a5   : > { %13052 = vst [vmem:[#allocation99_spill] sm:$0xff] %v9491_v53  ;;  %v2596_v60 = vadd.f32 %v2595_v32, %v9491_v53  ;;  %v1965_v25 = vpop.f32.mrb[191].mxu0  ;;  %8126 = vmatprep.subr.bf16.mxu1 %v13050_v6  ;;  %13053 = vst [vmem:[#allocation100_spill] sm:$0xff] %v9512_v49  ;;  %v9522_v32 = vld [vmem:[%s12570_s4 + $0x48] sm:$0xff] }
 0x2a6   : > { %v12641_v25 = vand.u32 4294901760, %v9517_v14  ;;  %v12640_v53 = vand.u32 4294901760, %v9522_v32  ;;  %v13079_v40 = vand.u32 4294901760, %v9522_v32 }
 0x2a8   : > { %8128 = vmatpush3.bf16.msra.mxu1 %v9512_v49  ;;  %v9535_v57 = vpack.c.bf16 %v12640_v53, %v12641_v25  ;;  %v12647_v53 = vand.u32 4294901760, %v9542_v38  ;;  %v12646_v25 = vand.u32 4294901760, %v9547_v28 }
 0x2a9   : > { %8129 = vmatprep.subr.bf16.mxu1 %v13050_v6 }
 0x2aa   : > { %v9527_v4 = vpop.f32.mrb[192].mxu0  ;;  %13055 = vst [vmem:[#allocation102_spill] sm:$0xff] %v9535_v57 }
 0x2ab   : > { %13054 = vst [vmem:[#allocation101_spill] sm:$0xff] %v9527_v4  ;;  %v2597_v46 = vadd.f32 %v2596_v60, %v9527_v4  ;;  %v1970_v33 = vpop.f32.mrb[193].mxu0  ;;  %v9558_v4 = vpack.c.bf16 %v12646_v25, %v12647_v53 }
 0x2ac   : > { %v9537_v48 = vpop.f32.mrb[194].mxu0  ;;  %8131 = vmatpush3.bf16.msra.mxu1 %v9535_v57 }
 0x2ad   : > { %13056 = vst [vmem:[#allocation103_spill] sm:$0xff] %v9537_v48  ;;  %v2598_v33 = vadd.f32 %v2597_v46, %v9537_v48  ;;  %v1973_v60 = vpop.f32.mrb[195].mxu0  ;;  %8132 = vmatprep.subr.bf16.mxu1 %v13050_v6  ;;  %13057 = vst [vmem:[#allocation104_spill] sm:$0xff] %v9558_v4  ;;  %v9568_v46 = vld [vmem:[%s12570_s4 + $0x68] sm:$0xff] }
 0x2ae   : > { %v12654_v60 = vand.u32 4294901760, %v9563_v20  ;;  %v12653_v48 = vand.u32 4294901760, %v9568_v46 }
 0x2b0   : > { %8134 = vmatpush3.bf16.msra.mxu1 %v9558_v4  ;;  %v9581_v1 = vpack.c.bf16 %v12653_v48, %v12654_v60  ;;  %v13061_v48 = vand.u32 4294901760, %v9426_v36 }
 0x2b1   : > { %8135 = vmatprep.subr.bf16.mxu1 %v13050_v6 }
 0x2b2   : > { %v9573_v10 = vpop.f32.mrb[196].mxu0  ;;  %13059 = vst [vmem:[#allocation106_spill] sm:$0xff] %v9581_v1  ;;  %v9602_v60 = vsub.f32 %v9426_v36, %v13061_v48  ;;  %v12664_v36 = vand.u32 4294901760, %v9607_v30 }
 0x2b3   : > { %13058 = vst [vmem:[#allocation105_spill] sm:$0xff] %v9573_v10  ;;  %v2599_v25 = vadd.f32 %v2598_v33, %v9573_v10  ;;  %v1978_v53 = vpop.f32.mrb[197].mxu0  ;;  %v12658_v10 = vmov 0.0   ;;  %v13063_v33 = vand.u32 4294901760, %v9586_v58 }
 0x2b4   : > { %v9593_v44 = vpop.f32.mrb[198].mxu0  ;;  %7597 = vmatprep.mubr.msk.f32.mxu1 %vm8870_vm0, %v12658_v10  ;;  %8137 = vmatpush3.bf16.msra.mxu1 %v9581_v1  ;;  %v13064_v10 = vand.u32 4294901760, %v9591_v52  ;;  %v12662_v48 = vand.u32 4294901760, %v9602_v60  ;;  %v2737_v12 = vsub.f32 %v9607_v30, %v12664_v36 }
 0x2b5   : > { %13060 = vst [vmem:[#allocation107_spill] sm:$0xff] %v9593_v44  ;;  %v2600_v22 = vadd.f32 %v2599_v25, %v9593_v44  ;;  %v1981_v53 = vpop.f32.mrb[199].mxu0  ;;  %8138 = vmatprep.subr.bf16.mxu1 %v13050_v6  ;;  %v13066_v25 = vand.u32 4294901760, %v9450_v5 }
 0x2b6   : > { %v9616_v16 = vpack.c.bf16 %v13064_v10, %v13063_v33  ;;  %v2730_v37 = vsub.f32 %v9602_v60, %v12662_v48  ;;  %v13067_v10 = vand.u32 4294901760, %v9455_v54  ;;  %v2738_v9 = vand.u32 4294901760, %v2737_v12 }
 0x2b7   : > { %v9629_v53 = vsub.f32 %v9450_v5, %v13066_v25  ;;  %v13071_v12 = vand.u32 4294901760, %v9471_v17 }
 0x2b8   : > { %13065 = vst [vmem:[#allocation108_spill] sm:$0xff] %v9616_v16  ;;  %v9634_v33 = vsub.f32 %v9455_v54, %v13067_v10  ;;  %8140 = vmatpush3.bf16.msra.mxu1 %v9616_v16  ;;  %v2731_v48 = vand.u32 4294901760, %v2730_v37 }
 0x2b9   : > { %8141 = vmatprep.subr.bf16.mxu1 %v13050_v6  ;;  %v12670_v36 = vand.u32 4294901760, %v9629_v53  ;;  %v9656_v10 = vsub.f32 %v9471_v17, %v13071_v12 }
 0x2ba   : > { %v9637_v44 = vpop.f32.mrb[200].mxu0  ;;  %v12672_v2 = vand.u32 4294901760, %v9634_v33  ;;  %v9645_v56 = vpack.c.bf16 %v2738_v9, %v2731_v48 }
 0x2bb   : > { %13068 = vst [vmem:[#allocation109_spill] sm:$0xff] %v9637_v44  ;;  %v2601_v5 = vadd.f32 %v2600_v22, %v9637_v44  ;;  %v1986_v25 = vpop.f32.mrb[201].mxu0  ;;  %v2744_v54 = vsub.f32 %v9629_v53, %v12670_v36  ;;  %v13072_v44 = vand.u32 4294901760, %v9476_v62  ;;  %v12673_v36 = vand.u32 4294901760, %v9656_v10 }
 0x2bc   : > { %v9643_v61 = vpop.f32.mrb[202].mxu0  ;;  %13070 = vst [vmem:[#allocation111_spill] sm:$0xff] %v9645_v56  ;;  %v2751_v37 = vsub.f32 %v9634_v33, %v12672_v2 }
 0x2bd   : > { %13069 = vst [vmem:[#allocation110_spill] sm:$0xff] %v9643_v61  ;;  %v2602_v22 = vadd.f32 %v2601_v5, %v9643_v61  ;;  %v1989_v25 = vpop.f32.mrb[203].mxu0  ;;  %v9662_v9 = vsub.f32 %v9476_v62, %v13072_v44  ;;  %v2745_v48 = vand.u32 4294901760, %v2744_v54  ;;  %v2758_v17 = vsub.f32 %v9656_v10, %v12673_v36 }
 0x2be   : > { %v2752_v50 = vand.u32 4294901760, %v2751_v37  ;;  %v13074_v5 = vand.u32 4294901760, %v9496_v41  ;;  %v13075_v44 = vand.u32 4294901760, %v9501_v26 }
 0x2bf   : > { %v12675_v45 = vand.u32 4294901760, %v9662_v9  ;;  %v2759_v37 = vand.u32 4294901760, %v2758_v17  ;;  %v13078_v17 = vand.u32 4294901760, %v9517_v14 }
 0x2c0   : > { %v9666_v2 = vpack.c.bf16 %v2752_v50, %v2745_v48  ;;  %v9674_v12 = vsub.f32 %v9496_v41, %v13074_v5  ;;  %v9679_v62 = vsub.f32 %v9501_v26, %v13075_v44 }
 0x2c1   : > { %v2765_v54 = vsub.f32 %v9662_v9, %v12675_v45  ;;  %v9700_v45 = vsub.f32 %v9517_v14, %v13078_v17 }
 0x2c2   : > { %13073 = vst [vmem:[#allocation112_spill] sm:$0xff] %v9666_v2  ;;  %v9684_v50 = vpop.f32.mrb[204].mxu0  ;;  %v12678_v25 = vand.u32 4294901760, %v9674_v12  ;;  %v12681_v48 = vand.u32 4294901760, %v9679_v62 }
 0x2c3   : > { %13076 = vst [vmem:[#allocation113_spill] sm:$0xff] %v9684_v50  ;;  %v2603_v36 = vadd.f32 %v2602_v22, %v9684_v50  ;;  %v1994_v41 = vpop.f32.mrb[205].mxu0  ;;  %v2766_v5 = vand.u32 4294901760, %v2765_v54  ;;  %v9705_v22 = vsub.f32 %v9522_v32, %v13079_v40  ;;  %v12684_v29 = vand.u32 4294901760, %v9700_v45 }
 0x2c4   : > { %v9689_v61 = vpop.f32.mrb[206].mxu0  ;;  %v2772_v26 = vsub.f32 %v9674_v12, %v12678_v25  ;;  %v2779_v44 = vsub.f32 %v9679_v62, %v12681_v48  ;;  %v13082_v32 = vand.u32 4294901760, %v9542_v38 }
 0x2c5   : > { %13077 = vst [vmem:[#allocation114_spill] sm:$0xff] %v9689_v61  ;;  %v2604_v54 = vadd.f32 %v2603_v36, %v9689_v61  ;;  %v1997_v41 = vpop.f32.mrb[207].mxu0  ;;  %v9708_v50 = vpack.c.bf16 %v2766_v5, %v2759_v37  ;;  %v12683_v48 = vand.u32 4294901760, %v9705_v22  ;;  %v2786_v14 = vsub.f32 %v9700_v45, %v12684_v29 }
 0x2c6   : > { %v2773_v25 = vand.u32 4294901760, %v2772_v26  ;;  %v2780_v34 = vand.u32 4294901760, %v2779_v44  ;;  %v9723_v36 = vsub.f32 %v9542_v38, %v13082_v32  ;;  %v13083_v37 = vand.u32 4294901760, %v9547_v28 }
 0x2c7   : > { %13080 = vst [vmem:[#allocation115_spill] sm:$0xff] %v9708_v50  ;;  %v2793_v40 = vsub.f32 %v9705_v22, %v12683_v48  ;;  %v13087_v32 = vand.u32 4294901760, %v9563_v20 }
 0x2c8   : > { %v9712_v24 = vpack.c.bf16 %v2780_v34, %v2773_v25  ;;  %v9728_v5 = vsub.f32 %v9547_v28, %v13083_v37  ;;  %v2787_v25 = vand.u32 4294901760, %v2786_v14  ;;  %v12685_v44 = vand.u32 4294901760, %v9723_v36 }
 0x2c9   : > { %v2794_v26 = vand.u32 4294901760, %v2793_v40  ;;  %v9745_v14 = vsub.f32 %v9563_v20, %v13087_v32  ;;  %v13088_v40 = vand.u32 4294901760, %v9568_v46 }
 0x2ca   : > { %13081 = vst [vmem:[#allocation116_spill] sm:$0xff] %v9712_v24  ;;  %v9730_v34 = vpop.f32.mrb[208].mxu0  ;;  %v12688_v48 = vand.u32 4294901760, %v9728_v5  ;;  %v2800_v28 = vsub.f32 %v9723_v36, %v12685_v44 }
 0x2cb   : > { %13084 = vst [vmem:[#allocation117_spill] sm:$0xff] %v9730_v34  ;;  %v2605_v17 = vadd.f32 %v2604_v54, %v9730_v34  ;;  %v2002_v41 = vpop.f32.mrb[209].mxu0  ;;  %v9737_v38 = vpack.c.bf16 %v2794_v26, %v2787_v25  ;;  %v9750_v54 = vsub.f32 %v9568_v46, %v13088_v40  ;;  %v12689_v44 = vand.u32 4294901760, %v9745_v14 }
 0x2cc   : > { %v9735_v29 = vpop.f32.mrb[210].mxu0  ;;  %v2807_v25 = vsub.f32 %v9728_v5, %v12688_v48  ;;  %v2801_v26 = vand.u32 4294901760, %v2800_v28  ;;  %v13090_v28 = vand.u32 4294901760, %v9591_v52 }
 0x2cd   : > { %13085 = vst [vmem:[#allocation118_spill] sm:$0xff] %v9735_v29  ;;  %13086 = vst [vmem:[#allocation119_spill] sm:$0xff] %v9737_v38  ;;  %v2606_v37 = vadd.f32 %v2605_v17, %v9735_v29  ;;  %v2005_v41 = vpop.f32.mrb[211].mxu0  ;;  %v12691_v34 = vand.u32 4294901760, %v9750_v54  ;;  %v2814_v20 = vsub.f32 %v9745_v14, %v12689_v44  ;;  %v13089_v17 = vand.u32 4294901760, %v9586_v58 }
 0x2ce   : > { %v2808_v61 = vand.u32 4294901760, %v2807_v25  ;;  %v9772_v40 = vsub.f32 %v9591_v52, %v13090_v28 }
 0x2cf   : > { %v2821_v46 = vsub.f32 %v9750_v54, %v12691_v34  ;;  %v9767_v32 = vsub.f32 %v9586_v58, %v13089_v17  ;;  %v2815_v48 = vand.u32 4294901760, %v2814_v20 }
 0x2d0   : > { %v9774_v41 = vpack.c.bf16 %v2808_v61, %v2801_v26  ;;  %v12696_v34 = vand.u32 4294901760, %v9772_v40 }
 0x2d1   : > { %v2822_v44 = vand.u32 4294901760, %v2821_v46  ;;  %v12695_v29 = vand.u32 4294901760, %v9767_v32 }
 0x2d2   : > { %13091 = vst [vmem:[#allocation120_spill] sm:$0xff] %v9774_v41  ;;  %v9776_v25 = vpop.f32.mrb[212].mxu0  ;;  %v2835_v52 = vsub.f32 %v9772_v40, %v12696_v34 }
 0x2d3   : > { %13092 = vst [vmem:[#allocation121_spill] sm:$0xff] %v9776_v25  ;;  %v2607_v18 = vadd.f32 %v2606_v37, %v9776_v25  ;;  %v2010_v13 = vpop.f32.mrb[213].mxu0  ;;  %v9783_v17 = vpack.c.bf16 %v2822_v44, %v2815_v48  ;;  %v2828_v61 = vsub.f32 %v9767_v32, %v12695_v29  ;;  %v9801_v29 = vpack.c.bf16 %v9607_v30, %v9602_v60 }
 0x2d4   : > { %v9781_v58 = vpop.f32.mrb[214].mxu0  ;;  %v2836_v28 = vand.u32 4294901760, %v2835_v52 }
 0x2d5   : > { %13093 = vst [vmem:[#allocation122_spill] sm:$0xff] %v9781_v58  ;;  %13094 = vst [vmem:[#allocation123_spill] sm:$0xff] %v9783_v17  ;;  %v2608_v26 = vadd.f32 %v2607_v18, %v9781_v58  ;;  %v2013_v20 = vpop.f32.mrb[215].mxu0  ;;  %v2829_v46 = vand.u32 4294901760, %v2828_v61  ;;  %v9806_v18 = vpack.c.bf16 %v9634_v33, %v9629_v53 }
 0x2d6   : > { %13098 = vst [vmem:[#allocation127_spill] sm:$0xff] %v9801_v29 }
 0x2d7   : > { %v9792_v7 = vpack.c.bf16 %v2836_v28, %v2829_v46  ;;  %13099 = vst [vmem:[#allocation128_spill] sm:$0xff] %v9806_v18 }
 0x2d9   : > { %13095 = vst [vmem:[#allocation124_spill] sm:$0xff] %v9792_v7 }
 0x2da   : > { %v9794_v13 = vpop.f32.mrb[216].mxu0 }
 0x2db   : > { %13096 = vst [vmem:[#allocation125_spill] sm:$0xff] %v9794_v13  ;;  %v2609_v48 = vadd.f32 %v2608_v26, %v9794_v13  ;;  %v2018_v44 = vpop.f32.mrb[217].mxu0  ;;  %v9813_v26 = vpack.c.bf16 %v9662_v9, %v9656_v10 }
 0x2dc   : > { %v9797_v37 = vpop.f32.mrb[218].mxu0 }
 0x2dd   : > { %13097 = vst [vmem:[#allocation126_spill] sm:$0xff] %v9797_v37  ;;  %v2610_v34 = vadd.f32 %v2609_v48, %v9797_v37  ;;  %v2021_v25 = vpop.f32.mrb[219].mxu0  ;;  %13101 = vst [vmem:[#allocation130_spill] sm:$0xff] %v9813_v26 }
 0x2de   : > { %v9820_v25 = vpack.c.bf16 %v9679_v62, %v9674_v12 }
 0x2e0   : > { %13103 = vst [vmem:[#allocation132_spill] sm:$0xff] %v9820_v25 }
 0x2e2   : > { %v9808_v61 = vpop.f32.mrb[220].mxu0 }
 0x2e3   : > { %13100 = vst [vmem:[#allocation129_spill] sm:$0xff] %v9808_v61  ;;  %v2611_v52 = vadd.f32 %v2610_v34, %v9808_v61  ;;  %v2026_v20 = vpop.f32.mrb[221].mxu0  ;;  %v9827_v34 = vpack.c.bf16 %v9705_v22, %v9700_v45 }
 0x2e4   : > { %v9815_v46 = vpop.f32.mrb[222].mxu0 }
 0x2e5   : > { %13102 = vst [vmem:[#allocation131_spill] sm:$0xff] %v9815_v46  ;;  %v2612_v28 = vadd.f32 %v2611_v52, %v9815_v46  ;;  %v2029_v44 = vpop.f32.mrb[223].mxu0  ;;  %13105 = vst [vmem:[#allocation134_spill] sm:$0xff] %v9827_v34  ;;  %v9834_v52 = vpack.c.bf16 %v9728_v5, %v9723_v36 }
 0x2e7   : > { %13107 = vst [vmem:[#allocation136_spill] sm:$0xff] %v9834_v52 }
 0x2ea   : > { %v9822_v48 = vpop.f32.mrb[224].mxu0 }
 0x2eb   : > { %13104 = vst [vmem:[#allocation133_spill] sm:$0xff] %v9822_v48  ;;  %v2613_v37 = vadd.f32 %v2612_v28, %v9822_v48  ;;  %v2034_v13 = vpop.f32.mrb[225].mxu0 }
 0x2ec   : > { %v9829_v20 = vpop.f32.mrb[226].mxu0  ;;  %v9841_v13 = vpack.c.bf16 %v9750_v54, %v9745_v14 }
 0x2ed   : > { %13106 = vst [vmem:[#allocation135_spill] sm:$0xff] %v9829_v20  ;;  %v2614_v61 = vadd.f32 %v2613_v37, %v9829_v20  ;;  %v2037_v58 = vpop.f32.mrb[227].mxu0 }
 0x2ee   : > { %13109 = vst [vmem:[#allocation138_spill] sm:$0xff] %v9841_v13  ;;  %v9848_v58 = vpack.c.bf16 %v9772_v40, %v9767_v32 }
 0x2f0   : > { %13111 = vst [vmem:[#allocation140_spill] sm:$0xff] %v9848_v58 }
 0x2f2   : > { %v9836_v44 = vpop.f32.mrb[228].mxu0 }
 0x2f3   : > { %13108 = vst [vmem:[#allocation137_spill] sm:$0xff] %v9836_v44  ;;  %v2615_v46 = vadd.f32 %v2614_v61, %v9836_v44  ;;  %v2042_v3 = vpop.f32.mrb[229].mxu0 }
 0x2f4   : > { %v9843_v28 = vpop.f32.mrb[230].mxu0 }
 0x2f5   : > { %13110 = vst [vmem:[#allocation139_spill] sm:$0xff] %v9843_v28  ;;  %v2616_v48 = vadd.f32 %v2615_v46, %v9843_v28  ;;  %v2045_v63 = vpop.f32.mrb[231].mxu0 }
 0x2fa   : > { %v9850_v37 = vpop.f32.mrb[232].mxu0 }
 0x2fb   : > { %13112 = vst [vmem:[#allocation141_spill] sm:$0xff] %v9850_v37  ;;  %v2617_v20 = vadd.f32 %v2616_v48, %v9850_v37  ;;  %v2050_v59 = vpop.f32.mrb[233].mxu0 }
 0x2fc   : > { %v9853_v61 = vpop.f32.mrb[234].mxu0 }
 0x2fd   : > { %13113 = vst [vmem:[#allocation142_spill] sm:$0xff] %v9853_v61  ;;  %v2618_v3 = vadd.f32 %v2617_v20, %v9853_v61  ;;  %v2053_v44 = vpop.f32.mrb[235].mxu0 }
 0x302   : > { %v9856_v55 = vpop.f32.mrb[236].mxu0 }
 0x303   : > { %13114 = vst [vmem:[#allocation143_spill] sm:$0xff] %v9856_v55  ;;  %v2619_v51 = vadd.f32 %v2618_v3, %v9856_v55  ;;  %v2058_v46 = vpop.f32.mrb[237].mxu0 }
 0x304   : > { %v9859_v63 = vpop.f32.mrb[238].mxu0 }
 0x305   : > { %13115 = vst [vmem:[#allocation144_spill] sm:$0xff] %v9859_v63  ;;  %v2620_v28 = vadd.f32 %v2619_v51, %v9859_v63  ;;  %v2061_v47 = vpop.f32.mrb[239].mxu0 }
 0x30a   : > { %v9862_v43 = vpop.f32.mrb[240].mxu0 }
 0x30b   : > { %13116 = vst [vmem:[#allocation145_spill] sm:$0xff] %v9862_v43  ;;  %v2621_v48 = vadd.f32 %v2620_v28, %v9862_v43  ;;  %v2066_v59 = vpop.f32.mrb[241].mxu0 }
 0x30c   : > { %v9865_v37 = vpop.f32.mrb[242].mxu0 }
 0x30d   : > { %13117 = vst [vmem:[#allocation146_spill] sm:$0xff] %v9865_v37  ;;  %v2622_v20 = vadd.f32 %v2621_v48, %v9865_v37  ;;  %v2069_v44 = vpop.f32.mrb[243].mxu0 }
 0x312   : > { %v9868_v61 = vpop.f32.mrb[244].mxu0 }
 0x313   : > { %13118 = vst [vmem:[#allocation147_spill] sm:$0xff] %v9868_v61  ;;  %v2623_v3 = vadd.f32 %v2622_v20, %v9868_v61  ;;  %v2074_v46 = vpop.f32.mrb[245].mxu0 }
 0x314   : > { %v9871_v55 = vpop.f32.mrb[246].mxu0 }
 0x315   : > { %13119 = vst [vmem:[#allocation148_spill] sm:$0xff] %v9871_v55  ;;  %v2624_v51 = vadd.f32 %v2623_v3, %v9871_v55  ;;  %v2077_v47 = vpop.f32.mrb[247].mxu0 }
 0x31a   : > { %v9874_v63 = vpop.f32.mrb[248].mxu0 }
 0x31b   : > { %13120 = vst [vmem:[#allocation149_spill] sm:$0xff] %v9874_v63  ;;  %v2625_v28 = vadd.f32 %v2624_v51, %v9874_v63  ;;  %v2082_v59 = vpop.f32.mrb[249].mxu0 }
 0x31c   : > { %v9877_v43 = vpop.f32.mrb[250].mxu0 }
 0x31d   : > { %13121 = vst [vmem:[#allocation150_spill] sm:$0xff] %v9877_v43  ;;  %v2626_v48 = vadd.f32 %v2625_v28, %v9877_v43  ;;  %v2085_v44 = vpop.f32.mrb[251].mxu0 }
 0x322   : > { %v9880_v37 = vpop.f32.mrb[252].mxu0 }
 0x323   : > { %v2627_v20 = vadd.f32 %v2626_v48, %v9880_v37  ;;  %v2090_v46 = vpop.f32.mrb[253].mxu0  ;;  %v13122_v48 = vmov 0.0  }
 0x324   : > { %v9883_v61 = vpop.f32.mrb[254].mxu0 }
 0x325   : > { %v2628_v3 = vadd.f32 %v2627_v20, %v9883_v61  ;;  %v2093_v47 = vpop.f32.mrb[255].mxu0 }
 0x327   : > { %v2629_v55 = vrot.slane %v2628_v3, 4 }
 0x329   : > { %v2630_v39 = vadd.f32 %v2629_v55, %v2628_v3  ;;  %v13127_v55 = vand.u32 4294901760, %v9634_v33  ;;  %v13133_v33 = vand.u32 4294901760, %v9679_v62  ;;  %v13139_v62 = vand.u32 4294901760, %v9728_v5 }
 0x32a   : > { %v13145_v5 = vand.u32 4294901760, %v9772_v40 }
 0x32b   : > { %v2631_v35 = vrot.slane %v2630_v39, 2 }
 0x32d   : > { %v2632_v51 = vadd.f32 %v2631_v35, %v2630_v39  ;;  %v13124_v35 = vand.u32 4294901760, %v9607_v30  ;;  %v13129_v30 = vand.u32 4294901760, %v9656_v10  ;;  %v13135_v10 = vand.u32 4294901760, %v9700_v45 }
 0x32e   : > { %v13141_v45 = vand.u32 4294901760, %v9745_v14  ;;  %v2498_v14 = vld [vmem:[%s12571_s5] sm:$0xff] }
 0x32f   : > { %v2633_v59 = vrot.slane %v2632_v51, 1 }
 0x331   : > { %v2634_v63 = vadd.f32 %v2633_v59, %v2632_v51 }
 0x333   : > { %v9886_v31 = vand.u32 4294901760, %v2634_v63 }
 0x335   : > { %v2717_v28 = vsub.f32 %v2634_v63, %v9886_v31 }
 0x337   : > { %v2718_v44 = vand.u32 4294901760, %v2717_v28 }
 0x339   : > { %v2719_v43 = vsub.f32 %v2717_v28, %v2718_v44 }
 0x33b   : > { %v2720_v27 = vand.u32 4294901760, %v2719_v43  ;;  %v13126_v43 = vand.u32 4294901760, %v9629_v53  ;;  %v13132_v53 = vand.u32 4294901760, %v9674_v12  ;;  %v13138_v12 = vand.u32 4294901760, %v9723_v36 }
 0x33c   : > { %v13144_v36 = vand.u32 4294901760, %v9767_v32  ;;  %v3282_v32 = vand.u32 4294901760, %v2498_v14 }
 0x33d   : > { %7598 = vmatmul.mubr.f32.vlgmr.msra.gmra.mrb[0].mxu1 %v2720_v27  ;;  %v13123_v27 = vand.u32 4294901760, %v9602_v60  ;;  %v9955_v63 = vpack.c.bf16 %v13127_v55, %v13126_v43  ;;  %v13130_v60 = vand.u32 4294901760, %v9662_v9  ;;  %v9973_v46 = vpack.c.bf16 %v13133_v33, %v13132_v53 }
 0x33e   : > { %8143 = vmatpush3.bf16.msra.mxu1 %v9645_v56  ;;  %7632 = vmatprep.mubr.msk.f32.mxu1 %vm8870_vm0, %v13122_v48  ;;  %v13136_v9 = vand.u32 4294901760, %v9705_v22  ;;  %v9989_v47 = vpack.c.bf16 %v13139_v62, %v13138_v12  ;;  %v13142_v22 = vand.u32 4294901760, %v9750_v54  ;;  %v10005_v59 = vpack.c.bf16 %v13145_v5, %v13144_v36  ;;  %v2499_v54 = vld [vmem:[%s12571_s5 + $0x8] sm:$0xff]  ;;  %v13219_v56 = vld [vmem:[#allocation56_spill] sm:$0xff] }
 0x33f   : > { %8144 = vmatprep.subr.bf16.mxu1 %v13050_v6  ;;  %v9947_v39 = vpack.c.bf16 %v13124_v35, %v13123_v27  ;;  %13128 = vst [vmem:[#allocation152_spill] sm:$0xff] %v9955_v63  ;;  %v9965_v20 = vpack.c.bf16 %v13130_v60, %v13129_v30  ;;  %13134 = vst [vmem:[#allocation154_spill] sm:$0xff] %v9973_v46  ;;  %v3285_v40 = vand.u32 4294901760, %v2499_v54  ;;  %v2501_v35 = vld [vmem:[%s12571_s5 + $0x18] sm:$0xff] }
 0x340   : > { %v9981_v3 = vpack.c.bf16 %v13136_v9, %v13135_v10  ;;  %13140 = vst [vmem:[#allocation156_spill] sm:$0xff] %v9989_v47  ;;  %v9997_v51 = vpack.c.bf16 %v13142_v22, %v13141_v45  ;;  %13146 = vst [vmem:[#allocation158_spill] sm:$0xff] %v10005_v59  ;;  %v3291_v55 = vand.u32 4294901760, %v2501_v35 }
 0x341   : > { %13125 = vst [vmem:[#allocation151_spill] sm:$0xff] %v9947_v39  ;;  %13131 = vst [vmem:[#allocation153_spill] sm:$0xff] %v9965_v20  ;;  %v3369_v27 = vsub.f32 %v2499_v54, %v3285_v40 }
 0x342   : > { %8146 = vmatpush3.bf16.msra.mxu1 %v9666_v2  ;;  %13137 = vst [vmem:[#allocation155_spill] sm:$0xff] %v9981_v3  ;;  %13143 = vst [vmem:[#allocation157_spill] sm:$0xff] %v9997_v51  ;;  %v3383_v12 = vsub.f32 %v2501_v35, %v3291_v55  ;;  %v13213_v2 = vld [vmem:[#allocation53_spill] sm:$0xff] }
 0x343   : > { %8147 = vmatprep.subr.bf16.mxu1 %v13050_v6  ;;  %v3370_v60 = vand.u32 4294901760, %v3369_v27 }
 0x344   : > { %v3384_v36 = vand.u32 4294901760, %v3383_v12 }
 0x345   : > { %v3371_v10 = vsub.f32 %v3369_v27, %v3370_v60 }
 0x346   : > { %8149 = vmatpush3.bf16.msra.mxu1 %v9708_v50  ;;  %v3385_v54 = vsub.f32 %v3383_v12, %v3384_v36  ;;  %v13211_v50 = vld [vmem:[#allocation52_spill] sm:$0xff] }
 0x347   : > { %8150 = vmatprep.subr.bf16.mxu1 %v13050_v6  ;;  %v3372_v45 = vand.u32 4294901760, %v3371_v10 }
 0x34a   : > { %8152 = vmatpush3.bf16.msra.mxu1 %v9712_v24  ;;  %v13209_v24 = vld [vmem:[#allocation51_spill] sm:$0xff] }
 0x34b   : > { %8153 = vmatprep.subr.bf16.mxu1 %v13050_v6 }
 0x34e   : > { %8155 = vmatpush3.bf16.msra.mxu1 %v9737_v38  ;;  %v13207_v38 = vld [vmem:[#allocation50_spill] sm:$0xff] }
 0x34f   : > { %8156 = vmatprep.subr.bf16.mxu1 %v13050_v6 }
 0x352   : > { %8158 = vmatpush3.bf16.msra.mxu1 %v9774_v41  ;;  %v13205_v41 = vld [vmem:[#allocation49_spill] sm:$0xff] }
 0x353   : > { %8159 = vmatprep.subr.bf16.mxu1 %v13050_v6 }
 0x356   : > { %8161 = vmatpush3.bf16.msra.mxu1 %v9783_v17  ;;  %v13203_v17 = vld [vmem:[#allocation48_spill] sm:$0xff] }
 0x357   : > { %8162 = vmatprep.subr.bf16.mxu1 %v13050_v6 }
 0x35a   : > { %8164 = vmatpush3.bf16.msra.mxu1 %v9792_v7  ;;  %v13201_v7 = vld [vmem:[#allocation47_spill] sm:$0xff] }
 0x35b   : > { %8165 = vmatprep.subr.bf16.mxu1 %v13050_v6 }
 0x35d   : > { %7633 = vmatmul.mubr.f32.vlgmr.msra.gmra.mrb[0].mxu1 %v9886_v31 }
 0x35e   : > { %8167 = vmatpush3.bf16.msra.mxu1 %v9801_v29  ;;  %7667 = vmatprep.mubr.msk.f32.mxu1 %vm8870_vm0, %v13122_v48  ;;  %v13199_v29 = vld [vmem:[#allocation46_spill] sm:$0xff] }
 0x35f   : > { %8168 = vmatprep.subr.bf16.mxu1 %v13050_v6 }
 0x362   : > { %8170 = vmatpush3.bf16.msra.mxu1 %v9806_v18  ;;  %v13198_v18 = vld [vmem:[#allocation45_spill] sm:$0xff] }
 0x363   : > { %8171 = vmatprep.subr.bf16.mxu1 %v13050_v6 }
 0x366   : > { %8173 = vmatpush3.bf16.msra.mxu1 %v9813_v26  ;;  %v13197_v26 = vld [vmem:[#allocation44_spill] sm:$0xff] }
 0x367   : > { %8174 = vmatprep.subr.bf16.mxu1 %v13050_v6 }
 0x36a   : > { %8176 = vmatpush3.bf16.msra.mxu1 %v9820_v25  ;;  %v13196_v25 = vld [vmem:[#allocation43_spill] sm:$0xff] }
 0x36b   : > { %8177 = vmatprep.subr.bf16.mxu1 %v13050_v6 }
 0x36e   : > { %8179 = vmatpush3.bf16.msra.mxu1 %v9827_v34  ;;  %v13195_v34 = vld [vmem:[#allocation42_spill] sm:$0xff] }
 0x36f   : > { %8180 = vmatprep.subr.bf16.mxu1 %v13050_v6 }
 0x372   : > { %8182 = vmatpush3.bf16.msra.mxu1 %v9834_v52  ;;  %v13194_v52 = vld [vmem:[#allocation41_spill] sm:$0xff] }
 0x373   : > { %8183 = vmatprep.subr.bf16.mxu1 %v13050_v6 }
 0x376   : > { %8185 = vmatpush3.bf16.msra.mxu1 %v9841_v13  ;;  %v13193_v13 = vld [vmem:[#allocation40_spill] sm:$0xff] }
 0x377   : > { %8186 = vmatprep.subr.bf16.mxu1 %v13050_v6 }
 0x37a   : > { %8188 = vmatpush3.bf16.msra.mxu1 %v9848_v58  ;;  %v13192_v58 = vld [vmem:[#allocation39_spill] sm:$0xff] }
 0x37b   : > { %8189 = vmatprep.subr.bf16.mxu1 %v13050_v6 }
 0x37d   : > { %7668 = vmatmul.mubr.f32.vlgmr.msra.gmra.mrb[0].mxu1 %v2717_v28  ;;  %v10038_v28 = vpack.c.bf16 %v3285_v40, %v3282_v32  ;;  %v3386_v40 = vand.u32 4294901760, %v3385_v54 }
 0x37e   : > { %8191 = vmatpush3.bf16.msra.mxu1 %v9442_v42  ;;  %7702 = vmatprep.mubr.msk.f32.mxu1 %vm8870_vm0, %v13122_v48 }
 0x37f   : > { %8192 = vmatprep.subr.bf16.mxu1 %v13050_v6  ;;  %13147 = vst [vmem:[#allocation159_spill] sm:$0xff] %v10038_v28 }
 0x382   : > { %8194 = vmatpush3.bf16.msra.mxu1 %v9466_v21 }
 0x383   : > { %8195 = vmatprep.subr.bf16.mxu1 %v13050_v6 }
 0x386   : > { %8197 = vmatpush3.bf16.msra.mxu1 %v9489_v0 }
 0x387   : > { %8198 = vmatprep.subr.bf16.mxu1 %v13050_v6 }
 0x38a   : > { %8200 = vmatpush3.bf16.msra.mxu1 %v9512_v49 }
 0x38b   : > { %8201 = vmatprep.subr.bf16.mxu1 %v13050_v6 }
 0x38e   : > { %8203 = vmatpush3.bf16.msra.mxu1 %v9535_v57 }
 0x38f   : > { %8204 = vmatprep.subr.bf16.mxu1 %v13050_v6 }
 0x392   : > { %8206 = vmatpush3.bf16.msra.mxu1 %v9558_v4 }
 0x393   : > { %8207 = vmatprep.subr.bf16.mxu1 %v13050_v6 }
 0x396   : > { %8209 = vmatpush3.bf16.msra.mxu1 %v9581_v1 }
 0x397   : > { %8210 = vmatprep.subr.bf16.mxu1 %v13050_v6 }
 0x39a   : > { %8212 = vmatpush3.bf16.msra.mxu1 %v9616_v16 }
 0x39b   : > { %8213 = vmatprep.subr.bf16.mxu1 %v13050_v6 }
 0x39d   : > { %7703 = vmatmul.mubr.f32.vlgmr.msra.gmra.mrb[0].mxu1 %v2718_v44  ;;  %v3362_v44 = vsub.f32 %v2498_v14, %v3282_v32 }
 0x39e   : > { %8215 = vmatpush3.bf16.msra.mxu1 %v9947_v39  ;;  %7737 = vmatprep.mubr.msk.f32.mxu1 %vm8870_vm0, %v13122_v48  ;;  %v13183_v39 = vld [vmem:[#allocation30_spill] sm:$0xff] }
 0x39f   : > { %8216 = vmatprep.subr.bf16.mxu1 %v13050_v6  ;;  %v3363_v30 = vand.u32 4294901760, %v3362_v44 }
 0x3a1   : > { %v3364_v33 = vsub.f32 %v3362_v44, %v3363_v30  ;;  %v10060_v35 = vpack.c.bf16 %v3370_v60, %v3363_v30 }
 0x3a2   : > { %8218 = vmatpush3.bf16.msra.mxu1 %v9955_v63  ;;  %v13182_v63 = vld [vmem:[#allocation29_spill] sm:$0xff] }
 0x3a3   : > { %8219 = vmatprep.subr.bf16.mxu1 %v13050_v6  ;;  %v3365_v62 = vand.u32 4294901760, %v3364_v33  ;;  %13153 = vst [vmem:[#allocation165_spill] sm:$0xff] %v10060_v35 }
 0x3a5   : > { %v10052_v5 = vpack.c.bf16 %v3372_v45, %v3365_v62 }
 0x3a6   : > { %8221 = vmatpush3.bf16.msra.mxu1 %v9965_v20  ;;  %v13181_v20 = vld [vmem:[#allocation28_spill] sm:$0xff] }
 0x3a7   : > { %8222 = vmatprep.subr.bf16.mxu1 %v13050_v6  ;;  %13149 = vst [vmem:[#allocation161_spill] sm:$0xff] %v10052_v5 }
 0x3aa   : > { %8224 = vmatpush3.bf16.msra.mxu1 %v9973_v46  ;;  %v13180_v46 = vld [vmem:[#allocation27_spill] sm:$0xff] }
 0x3ab   : > { %8225 = vmatprep.subr.bf16.mxu1 %v13050_v6 }
 0x3ae   : > { %8227 = vmatpush3.bf16.msra.mxu1 %v9981_v3  ;;  %v13179_v3 = vld [vmem:[#allocation26_spill] sm:$0xff] }
 0x3af   : > { %8228 = vmatprep.subr.bf16.mxu1 %v13050_v6 }
 0x3b2   : > { %8230 = vmatpush3.bf16.msra.mxu1 %v9989_v47 }
 0x3b3   : > { %8231 = vmatprep.subr.bf16.mxu1 %v13050_v6 }
 0x3b6   : > { %8233 = vmatpush3.bf16.msra.mxu1 %v9997_v51  ;;  %v10056_v51 = vpack.c.bf16 %v3369_v27, %v3362_v44 }
 0x3b7   : > { %8234 = vmatprep.subr.bf16.mxu1 %v13050_v6 }
 0x3b8   : > { %13151 = vst [vmem:[#allocation163_spill] sm:$0xff] %v10056_v51 }
 0x3ba   : > { %8236 = vmatpush3.bf16.msra.mxu1 %v10005_v59 }
 0x3bb   : > { %8237 = vmatprep.subr.bf16.mxu1 %v13050_v6 }
 0x3bd   : > { %7738 = vmatmul.mubr.f32.vlgmr.msra.gmra.mrb[0].mxu1 %v9886_v31 }
 0x3be   : > { %8239 = vmatpush3.bf16.msra.mxu1 %v9442_v42  ;;  %7772 = vmatprep.mubr.msk.f32.mxu1 %vm8870_vm0, %v13122_v48 }
 0x3bf   : > { %8240 = vmatprep.subr.bf16.mxu1 %v13050_v6 }
 0x3c2   : > { %8242 = vmatpush3.bf16.msra.mxu1 %v9466_v21 }
 0x3c3   : > { %8243 = vmatprep.subr.bf16.mxu1 %v13050_v6 }
 0x3c6   : > { %8245 = vmatpush3.bf16.msra.mxu1 %v9489_v0 }
 0x3c7   : > { %8246 = vmatprep.subr.bf16.mxu1 %v13050_v6 }
 0x3ca   : > { %8248 = vmatpush3.bf16.msra.mxu1 %v9512_v49 }
 0x3cb   : > { %8249 = vmatprep.subr.bf16.mxu1 %v13050_v6 }
 0x3ce   : > { %8251 = vmatpush3.bf16.msra.mxu1 %v9535_v57 }
 0x3cf   : > { %8252 = vmatprep.subr.bf16.mxu1 %v13050_v6 }
 0x3d2   : > { %8254 = vmatpush3.bf16.msra.mxu1 %v9558_v4 }
 0x3d3   : > { %8255 = vmatprep.subr.bf16.mxu1 %v13050_v6 }
 0x3d6   : > { %8257 = vmatpush3.bf16.msra.mxu1 %v9581_v1 }
 0x3d7   : > { %8258 = vmatprep.subr.bf16.mxu1 %v13050_v6 }
 0x3da   : > { %8260 = vmatpush3.bf16.msra.mxu1 %v9616_v16 }
 0x3db   : > { %8261 = vmatprep.subr.bf16.mxu1 %v13050_v6 }
 0x3dd   : > { %7773 = vmatmul.mubr.f32.vlgmr.msra.gmra.mrb[0].mxu1 %v9886_v31  ;;  %v2500_v31 = vld [vmem:[%s12571_s5 + $0x10] sm:$0xff] }
 0x3de   : > { %7783 = vmatprep.mubr.msk.f32.mxu1 %vm8870_vm0, %v13122_v48  ;;  %8263 = vmatpush3.bf16.msra.mxu1 %v10038_v28  ;;  %v3288_v43 = vand.u32 4294901760, %v2500_v31 }
 0x3df   : > { %8264 = vmatprep.subr.bf16.mxu1 %v13050_v6 }
 0x3e0   : > { %v10048_v53 = vpack.c.bf16 %v3291_v55, %v3288_v43  ;;  %v3376_v9 = vsub.f32 %v2500_v31, %v3288_v43 }
 0x3e2   : > { %13148 = vst [vmem:[#allocation160_spill] sm:$0xff] %v10048_v53  ;;  %8266 = vmatpush3.bf16.msra.mxu1 %v10048_v53  ;;  %v3377_v22 = vand.u32 4294901760, %v3376_v9  ;;  %v10058_v31 = vpack.c.bf16 %v3383_v12, %v3376_v9 }
 0x3e3   : > { %8267 = vmatprep.subr.bf16.mxu1 %v13050_v6 }
 0x3e4   : > { %v3378_v14 = vsub.f32 %v3376_v9, %v3377_v22  ;;  %13152 = vst [vmem:[#allocation164_spill] sm:$0xff] %v10058_v31  ;;  %v10062_v43 = vpack.c.bf16 %v3384_v36, %v3377_v22 }
 0x3e6   : > { %v3379_v32 = vand.u32 4294901760, %v3378_v14  ;;  %13154 = vst [vmem:[#allocation166_spill] sm:$0xff] %v10062_v43 }
 0x3e8   : > { %v10054_v59 = vpack.c.bf16 %v3386_v40, %v3379_v32 }
 0x3ea   : > { %13150 = vst [vmem:[#allocation162_spill] sm:$0xff] %v10054_v59 }
 0x4b0   : > { %v3272_v55 = vpop.f32.mrb[0].mxu1 }
 0x4b1   : > { %v3276_v33 = vmul.f32 0.00048828125, %v3272_v55  ;;  %v7774_v10 = vpop.f32.mrb[1].mxu1 }
 0x4b2   : > { %v13160_v10 = vld [vmem:[#allocation7_spill] sm:$0xff] }
 0x4b3   : > { %v3279_v62 = vsel %vm3277_vm1, %v3276_v33, 0  ;;  %v13159_v33 = vld [vmem:[#allocation6_spill] sm:$0xff] }
 0x4b4   : > { %v3350_v45 = vand.u32 4294901760, %v3279_v62 }
 0x4b6   : > { %v3351_v47 = vsub.f32 %v3279_v62, %v3350_v45  ;;  %v13161_v62 = vld [vmem:[#allocation8_spill] sm:$0xff] }
 0x4b8   : > { %v3352_v14 = vand.u32 4294901760, %v3351_v47 }
 0x4ba   : > { %v3353_v54 = vsub.f32 %v3351_v47, %v3352_v14 }
 0x4bc   : > { %v3354_v32 = vand.u32 4294901760, %v3353_v54  ;;  %v13164_v54 = vld [vmem:[#allocation11_spill] sm:$0xff] }
 0x4be   : > { %7784 = vmatmul.mubr.f32.vlgmr.msra.gmra.mrb[2].mxu1 %v3354_v32 }
 0x4bf   : > { %8269 = vmatpush3.bf16.msra.mxu1 %v10052_v5  ;;  %7794 = vmatprep.mubr.msk.f32.mxu1 %vm8870_vm0, %v13122_v48  ;;  %v13176_v5 = vld [vmem:[#allocation23_spill] sm:$0xff] }
 0x4c0   : > { %8270 = vmatprep.subr.bf16.mxu1 %v13050_v6 }
 0x4c3   : > { %8272 = vmatpush3.bf16.msra.mxu1 %v10054_v59  ;;  %v13175_v59 = vld [vmem:[#allocation22_spill] sm:$0xff] }
 0x4c4   : > { %8273 = vmatprep.subr.bf16.mxu1 %v13050_v6 }
 0x4c6   : > { %7795 = vmatmul.mubr.f32.vlgmr.msra.gmra.mrb[2].mxu1 %v3350_v45 }
 0x4c7   : > { %8275 = vmatpush3.bf16.msra.mxu1 %v10056_v51  ;;  %7805 = vmatprep.mubr.msk.f32.mxu1 %vm8870_vm0, %v13122_v48  ;;  %v13174_v51 = vld [vmem:[#allocation21_spill] sm:$0xff] }
 0x4c8   : > { %8276 = vmatprep.subr.bf16.mxu1 %v13050_v6 }
 0x4cb   : > { %8278 = vmatpush3.bf16.msra.mxu1 %v10058_v31  ;;  %v13173_v31 = vld [vmem:[#allocation20_spill] sm:$0xff] }
 0x4cc   : > { %8279 = vmatprep.subr.bf16.mxu1 %v13050_v6 }
 0x4ce   : > { %7806 = vmatmul.mubr.f32.vlgmr.msra.gmra.mrb[2].mxu1 %v3351_v47  ;;  %v3766_v47 = vlaneseq }
 0x4cf   : > { %8281 = vmatpush3.bf16.msra.mxu1 %v10038_v28  ;;  %7816 = vmatprep.mubr.msk.f32.mxu1 %vm8870_vm0, %v13122_v48 }
 0x4d0   : > { %8282 = vmatprep.subr.bf16.mxu1 %v13050_v6  ;;  %v10113_v44 = vshrl.u32 %v3766_v47, 7  ;;  %v13165_v47 = vld [vmem:[#allocation12_spill] sm:$0xff] }
 0x4d2   : > { %13155 = vst [vmem:[#allocation167_spill] sm:$0xff] %v10113_v44  ;;  %v12731_v27 = vsub.s32 0, %v10113_v44  ;;  %v13170_v44 = vld [vmem:[#allocation17_spill] sm:$0xff] }
 0x4d3   : > { %8284 = vmatpush3.bf16.msra.mxu1 %v10048_v53 }
 0x4d4   : > { %8285 = vmatprep.subr.bf16.mxu1 %v13050_v6 }
 0x4d6   : > { %7817 = vmatmul.mubr.f32.vlgmr.msra.gmra.mrb[2].mxu1 %v3352_v14  ;;  %v13163_v14 = vld [vmem:[#allocation10_spill] sm:$0xff] }
 0x4d7   : > { %8287 = vmatpush3.bf16.msra.mxu1 %v10060_v35  ;;  %7827 = vmatprep.mubr.msk.f32.mxu1 %vm8870_vm0, %v13122_v48  ;;  %v13172_v35 = vld [vmem:[#allocation19_spill] sm:$0xff] }
 0x4d8   : > { %8288 = vmatprep.subr.bf16.mxu1 %v13050_v6 }
 0x4db   : > { %8290 = vmatpush3.bf16.msra.mxu1 %v10062_v43  ;;  %v13171_v43 = vld [vmem:[#allocation18_spill] sm:$0xff] }
 0x4dc   : > { %8291 = vmatprep.subr.bf16.mxu1 %v13050_v6 }
 0x4de   : > { %7828 = vmatmul.mubr.f32.vlgmr.msra.gmra.mrb[2].mxu1 %v3350_v45 }
 0x4df   : > { %8293 = vmatpush3.bf16.msra.mxu1 %v10038_v28  ;;  %7838 = vmatprep.mubr.msk.f32.mxu1 %vm8870_vm0, %v13122_v48  ;;  %v13178_v28 = vld [vmem:[#allocation25_spill] sm:$0xff] }
 0x4e0   : > { %8294 = vmatprep.subr.bf16.mxu1 %v13050_v6 }
 0x4e3   : > { %8296 = vmatpush3.bf16.msra.mxu1 %v10048_v53  ;;  %v13177_v53 = vld [vmem:[#allocation24_spill] sm:$0xff] }
 0x4e4   : > { %8297 = vmatprep.subr.bf16.mxu1 %v13050_v6 }
 0x4e6   : > { %7839 = vmatmul.mubr.f32.vlgmr.msra.gmra.mrb[2].mxu1 %v3350_v45  ;;  %v13162_v45 = vld [vmem:[#allocation9_spill] sm:$0xff] }
 0x4e7   : > { %8299 = vmatpush3.bf16.msra.mxu1 %v9442_v42  ;;  %7873 = vmatprep.mubr.msk.f32.mxu1 %vm8870_vm0, %v13122_v48  ;;  %v13191_v42 = vld [vmem:[#allocation38_spill] sm:$0xff]  ;;  %v13217_v48 = vld [vmem:[#allocation55_spill] sm:$0xff] }
 0x4e8   : > { %8300 = vmatprep.subr.bf16.mxu1 %v13050_v6 }
 0x4eb   : > { %8302 = vmatpush3.bf16.msra.mxu1 %v9466_v21  ;;  %v13190_v21 = vld [vmem:[#allocation37_spill] sm:$0xff] }
 0x4ec   : > { %8303 = vmatprep.subr.bf16.mxu1 %v13050_v6 }
 0x4ef   : > { %8305 = vmatpush3.bf16.msra.mxu1 %v9489_v0  ;;  %v13189_v0 = vld [vmem:[#allocation36_spill] sm:$0xff] }
 0x4f0   : > { %8306 = vmatprep.subr.bf16.mxu1 %v13050_v6 }
 0x4f3   : > { %8308 = vmatpush3.bf16.msra.mxu1 %v9512_v49  ;;  %v13188_v49 = vld [vmem:[#allocation35_spill] sm:$0xff] }
 0x4f4   : > { %8309 = vmatprep.subr.bf16.mxu1 %v13050_v6 }
 0x4f7   : > { %8311 = vmatpush3.bf16.msra.mxu1 %v9535_v57  ;;  %v13187_v57 = vld [vmem:[#allocation34_spill] sm:$0xff] }
 0x4f8   : > { %8312 = vmatprep.subr.bf16.mxu1 %v13050_v6 }
 0x4fb   : > { %8314 = vmatpush3.bf16.msra.mxu1 %v9558_v4  ;;  %v13186_v4 = vld [vmem:[#allocation33_spill] sm:$0xff] }
 0x4fc   : > { %8315 = vmatprep.subr.bf16.mxu1 %v13050_v6 }
 0x4ff   : > { %8317 = vmatpush3.bf16.msra.mxu1 %v9581_v1  ;;  %v13185_v1 = vld [vmem:[#allocation32_spill] sm:$0xff] }
 0x500   : > { %8318 = vmatprep.subr.bf16.mxu1 %v13050_v6 }
 0x503   : > { %8320 = vmatpush3.bf16.msra.mxu1 %v9616_v16  ;;  %v13184_v16 = vld [vmem:[#allocation31_spill] sm:$0xff] }
 0x504   : > { %8321 = vmatprep.subr.bf16.mxu1 %v13050_v6  ;;  %v13215_v6 = vld [vmem:[#allocation54_spill] sm:$0xff] }
 0x5b9   : > { %v3762_v30 = vpop.f32.mrb[2].mxu1 }
 0x5ba   : > { %v10118_v60 = vrot.slane %v3762_v30, %v12731_v27  ;;  %v7840_v9 = vpop.f32.mrb[3].mxu1  ;;  %v13169_v27 = vld [vmem:[#allocation16_spill] sm:$0xff] }
 0x5bb   : > { %v13166_v9 = vld [vmem:[#allocation13_spill] sm:$0xff] }
 0x5bc   : > { %v10122_v12 = vsub.f32 %v9074_v8, %v10118_v60  ;;  %v10126_v22 = vsub.f32 %v9077_v11, %v10118_v60  ;;  %v10130_v36 = vsub.f32 %v9082_v15, %v10118_v60  ;;  %v10134_v40 = vsub.f32 %v9086_v19, %v10118_v60 }
 0x5bd   : > { %v10138_v55 = vsub.f32 %v9090_v23, %v10118_v60  ;;  %v10142_v8 = vsub.f32 %v13159_v33, %v10118_v60  ;;  %v10146_v11 = vsub.f32 %v13160_v10, %v10118_v60  ;;  %v10150_v15 = vsub.f32 %v13161_v62, %v10118_v60  ;;  %v13167_v10 = vld [vmem:[#allocation14_spill] sm:$0xff] }
 0x5be   : > { %13156 = vst [vmem:[#allocation168_spill] sm:$0xff] %v10122_v12  ;;  %13157 = vst [vmem:[#allocation169_spill] sm:$0xff] %v10126_v22  ;;  %v10154_v19 = vsub.f32 %v13162_v45, %v10118_v60  ;;  %v10158_v23 = vsub.f32 %v13163_v14, %v10118_v60  ;;  %v10162_v32 = vsub.f32 %v13164_v54, %v10118_v60  ;;  %v13168_v45 = vld [vmem:[#allocation15_spill] sm:$0xff] }
 0x5bf   : > { %13158 = vst [vmem:[#allocation170_spill] sm:$0xff] %v10130_v36  ;;  %v10166_v30 = vsub.f32 %v13165_v47, %v10118_v60  ;;  %v10170_v33 = vsub.f32 %v13166_v9, %v10118_v60  ;;  %v10174_v62 = vsub.f32 %v13167_v10, %v10118_v60  ;;  %v10178_v14 = vsub.f32 %v13168_v45, %v10118_v60 }
 0x5c0   : > { %v10182_v54 = vsub.f32 %v13169_v27, %v10118_v60  ;;  %v10186_v47 = vsub.f32 %v13170_v44, %v10118_v60  ;;  %v10190_v9 = vsub.f32 %v13171_v43, %v10118_v60  ;;  %v10194_v10 = vsub.f32 %v13172_v35, %v10118_v60 }
 0x5c1   : > { %v10198_v45 = vsub.f32 %v13173_v31, %v10118_v60  ;;  %v10202_v27 = vsub.f32 %v13174_v51, %v10118_v60  ;;  %v10206_v44 = vsub.f32 %v13175_v59, %v10118_v60  ;;  %v10210_v43 = vsub.f32 %v13176_v5, %v10118_v60 }
 0x5c2   : > { %v10214_v35 = vsub.f32 %v13177_v53, %v10118_v60  ;;  %v10218_v31 = vsub.f32 %v13178_v28, %v10118_v60  ;;  %v10222_v51 = vsub.f32 %v13179_v3, %v10118_v60  ;;  %v10226_v59 = vsub.f32 %v13180_v46, %v10118_v60 }
 0x5c3   : > { %v10230_v5 = vsub.f32 %v13181_v20, %v10118_v60  ;;  %v10234_v53 = vsub.f32 %v13182_v63, %v10118_v60  ;;  %v10238_v28 = vsub.f32 %v13183_v39, %v10118_v60  ;;  %v10242_v3 = vsub.f32 %v13184_v16, %v10118_v60 }
 0x5c4   : > { %v10246_v46 = vsub.f32 %v13185_v1, %v10118_v60  ;;  %v10250_v20 = vsub.f32 %v13186_v4, %v10118_v60  ;;  %v10254_v63 = vsub.f32 %v13187_v57, %v10118_v60  ;;  %v10258_v39 = vsub.f32 %v13188_v49, %v10118_v60 }
 0x5c5   : > { %v10262_v16 = vsub.f32 %v13189_v0, %v10118_v60  ;;  %v10266_v1 = vsub.f32 %v13190_v21, %v10118_v60  ;;  %v10270_v4 = vsub.f32 %v13191_v42, %v10118_v60  ;;  %v10274_v57 = vsub.f32 %v13192_v58, %v10118_v60 }
 0x5c6   : > { %v10278_v49 = vsub.f32 %v13193_v13, %v10118_v60  ;;  %v10282_v0 = vsub.f32 %v13194_v52, %v10118_v60  ;;  %v10286_v21 = vsub.f32 %v13195_v34, %v10118_v60  ;;  %v10290_v42 = vsub.f32 %v13196_v25, %v10118_v60 }
 0x5c7   : > { %v10294_v58 = vsub.f32 %v13197_v26, %v10118_v60  ;;  %v10298_v13 = vsub.f32 %v13198_v18, %v10118_v60  ;;  %v10302_v52 = vsub.f32 %v13199_v29, %v10118_v60  ;;  %v10306_v34 = vsub.f32 %v13201_v7, %v10118_v60 }
 0x5c8   : > { %v10310_v25 = vsub.f32 %v13203_v17, %v10118_v60  ;;  %v10314_v26 = vsub.f32 %v13205_v41, %v10118_v60  ;;  %v10318_v18 = vsub.f32 %v13207_v38, %v10118_v60  ;;  %v10322_v29 = vsub.f32 %v13209_v24, %v10118_v60 }
 0x5c9   : > { %13200 = vst [vmem:[#allocation6_spill] sm:$0xff] %v10302_v52  ;;  %13202 = vst [vmem:[#allocation7_spill] sm:$0xff] %v10306_v34  ;;  %v10326_v7 = vsub.f32 %v13211_v50, %v10118_v60  ;;  %v10330_v17 = vsub.f32 %v13213_v2, %v10118_v60  ;;  %v10334_v41 = vsub.f32 %v13215_v6, %v10118_v60 }
 0x5ca   : > { %13204 = vst [vmem:[#allocation8_spill] sm:$0xff] %v10310_v25  ;;  %13206 = vst [vmem:[#allocation9_spill] sm:$0xff] %v10314_v26  ;;  %v10338_v38 = vsub.f32 %v13217_v48, %v10118_v60  ;;  %v10342_v24 = vsub.f32 %v13219_v56, %v10118_v60 }
 0x5cb   : > { %13208 = vst [vmem:[#allocation10_spill] sm:$0xff] %v10318_v18  ;;  %13210 = vst [vmem:[#allocation11_spill] sm:$0xff] %v10322_v29  ;;  %v13221_v29 = vld [vmem:[#allocation57_spill] sm:$0xff] }
 0x5cc   : > { %13212 = vst [vmem:[#allocation12_spill] sm:$0xff] %v10326_v7  ;;  %13214 = vst [vmem:[#allocation13_spill] sm:$0xff] %v10330_v17  ;;  %v10346_v50 = vsub.f32 %v13221_v29, %v10118_v60  ;;  %v13223_v7 = vld [vmem:[#allocation58_spill] sm:$0xff]  ;;  %v13225_v17 = vld [vmem:[#allocation59_spill] sm:$0xff] }
 0x5cd   : > { %13216 = vst [vmem:[#allocation14_spill] sm:$0xff] %v10334_v41  ;;  %13218 = vst [vmem:[#allocation15_spill] sm:$0xff] %v10338_v38  ;;  %v10350_v2 = vsub.f32 %v13223_v7, %v10118_v60  ;;  %v10354_v6 = vsub.f32 %v13225_v17, %v10118_v60  ;;  %v13227_v41 = vld [vmem:[#allocation60_spill] sm:$0xff]  ;;  %v13229_v38 = vld [vmem:[#allocation61_spill] sm:$0xff] }
 0x5ce   : > { %13220 = vst [vmem:[#allocation16_spill] sm:$0xff] %v10342_v24  ;;  %13222 = vst [vmem:[#allocation17_spill] sm:$0xff] %v10346_v50  ;;  %v10358_v48 = vsub.f32 %v13227_v41, %v10118_v60  ;;  %v10362_v56 = vsub.f32 %v13229_v38, %v10118_v60  ;;  %v13231_v24 = vld [vmem:[#allocation62_spill] sm:$0xff]  ;;  %v13233_v50 = vld [vmem:[#allocation63_spill] sm:$0xff] }
 0x5cf   : > { %13224 = vst [vmem:[#allocation18_spill] sm:$0xff] %v10350_v2  ;;  %13226 = vst [vmem:[#allocation19_spill] sm:$0xff] %v10354_v6  ;;  %v10366_v29 = vsub.f32 %v13231_v24, %v10118_v60  ;;  %v10370_v7 = vsub.f32 %v13233_v50, %v10118_v60  ;;  %v13235_v2 = vld [vmem:[#allocation64_spill] sm:$0xff]  ;;  %v13237_v6 = vld [vmem:[#allocation65_spill] sm:$0xff] }
 0x5d0   : > { %13228 = vst [vmem:[#allocation20_spill] sm:$0xff] %v10358_v48  ;;  %13230 = vst [vmem:[#allocation21_spill] sm:$0xff] %v10362_v56  ;;  %v10374_v17 = vsub.f32 %v13235_v2, %v10118_v60  ;;  %v10378_v41 = vsub.f32 %v13237_v6, %v10118_v60  ;;  %v13239_v48 = vld [vmem:[#allocation66_spill] sm:$0xff]  ;;  %v13241_v56 = vld [vmem:[#allocation67_spill] sm:$0xff] }
 0x5d1   : > { %13232 = vst [vmem:[#allocation22_spill] sm:$0xff] %v10366_v29  ;;  %13234 = vst [vmem:[#allocation23_spill] sm:$0xff] %v10370_v7  ;;  %v10382_v38 = vsub.f32 %v13239_v48, %v10118_v60  ;;  %v10386_v24 = vsub.f32 %v13241_v56, %v10118_v60  ;;  %v13243_v29 = vld [vmem:[#allocation68_spill] sm:$0xff]  ;;  %v13245_v7 = vld [vmem:[#allocation69_spill] sm:$0xff] }
 0x5d2   : > { %13236 = vst [vmem:[#allocation24_spill] sm:$0xff] %v10374_v17  ;;  %13238 = vst [vmem:[#allocation25_spill] sm:$0xff] %v10378_v41  ;;  %v10390_v50 = vsub.f32 %v13243_v29, %v10118_v60  ;;  %v10394_v2 = vsub.f32 %v13245_v7, %v10118_v60  ;;  %v13247_v17 = vld [vmem:[#allocation70_spill] sm:$0xff]  ;;  %v13249_v41 = vld [vmem:[#allocation71_spill] sm:$0xff] }
 0x5d3   : > { %13240 = vst [vmem:[#allocation26_spill] sm:$0xff] %v10382_v38  ;;  %13242 = vst [vmem:[#allocation27_spill] sm:$0xff] %v10386_v24  ;;  %v10398_v6 = vsub.f32 %v13247_v17, %v10118_v60  ;;  %v10402_v48 = vsub.f32 %v13249_v41, %v10118_v60  ;;  %v13251_v38 = vld [vmem:[#allocation72_spill] sm:$0xff]  ;;  %v13253_v24 = vld [vmem:[#allocation73_spill] sm:$0xff] }
 0x5d4   : > { %13244 = vst [vmem:[#allocation28_spill] sm:$0xff] %v10390_v50  ;;  %13246 = vst [vmem:[#allocation29_spill] sm:$0xff] %v10394_v2  ;;  %v10406_v56 = vsub.f32 %v13251_v38, %v10118_v60  ;;  %v10410_v29 = vsub.f32 %v13253_v24, %v10118_v60  ;;  %v13255_v50 = vld [vmem:[#allocation74_spill] sm:$0xff]  ;;  %v13257_v2 = vld [vmem:[#allocation75_spill] sm:$0xff] }
 0x5d5   : > { %13248 = vst [vmem:[#allocation30_spill] sm:$0xff] %v10398_v6  ;;  %13250 = vst [vmem:[#allocation31_spill] sm:$0xff] %v10402_v48  ;;  %v10414_v7 = vsub.f32 %v13255_v50, %v10118_v60  ;;  %v10418_v17 = vsub.f32 %v13257_v2, %v10118_v60  ;;  %v13259_v6 = vld [vmem:[#allocation76_spill] sm:$0xff]  ;;  %v13261_v48 = vld [vmem:[#allocation77_spill] sm:$0xff] }
 0x5d6   : > { %13252 = vst [vmem:[#allocation32_spill] sm:$0xff] %v10406_v56  ;;  %13254 = vst [vmem:[#allocation33_spill] sm:$0xff] %v10410_v29  ;;  %v10422_v41 = vsub.f32 %v13259_v6, %v10118_v60  ;;  %v10426_v38 = vsub.f32 %v13261_v48, %v10118_v60  ;;  %v13263_v56 = vld [vmem:[#allocation78_spill] sm:$0xff]  ;;  %v13265_v29 = vld [vmem:[#allocation79_spill] sm:$0xff] }
 0x5d7   : > { %13256 = vst [vmem:[#allocation34_spill] sm:$0xff] %v10414_v7  ;;  %13258 = vst [vmem:[#allocation35_spill] sm:$0xff] %v10418_v17  ;;  %v10430_v24 = vsub.f32 %v13263_v56, %v10118_v60  ;;  %v10434_v50 = vsub.f32 %v13265_v29, %v10118_v60  ;;  %v13267_v7 = vld [vmem:[#allocation80_spill] sm:$0xff]  ;;  %v13269_v17 = vld [vmem:[#allocation81_spill] sm:$0xff] }
 0x5d8   : > { %13260 = vst [vmem:[#allocation36_spill] sm:$0xff] %v10422_v41  ;;  %13262 = vst [vmem:[#allocation37_spill] sm:$0xff] %v10426_v38  ;;  %v10438_v2 = vsub.f32 %v13267_v7, %v10118_v60  ;;  %v10442_v6 = vsub.f32 %v13269_v17, %v10118_v60  ;;  %v13271_v41 = vld [vmem:[#allocation82_spill] sm:$0xff]  ;;  %v13273_v38 = vld [vmem:[#allocation83_spill] sm:$0xff] }
 0x5d9   : > { %13264 = vst [vmem:[#allocation38_spill] sm:$0xff] %v10430_v24  ;;  %13266 = vst [vmem:[#allocation39_spill] sm:$0xff] %v10434_v50  ;;  %v10446_v48 = vsub.f32 %v13271_v41, %v10118_v60  ;;  %v10450_v56 = vsub.f32 %v13273_v38, %v10118_v60  ;;  %v13275_v24 = vld [vmem:[#allocation84_spill] sm:$0xff]  ;;  %v13277_v50 = vld [vmem:[#allocation85_spill] sm:$0xff] }
 0x5da   : > { %13268 = vst [vmem:[#allocation40_spill] sm:$0xff] %v10438_v2  ;;  %13270 = vst [vmem:[#allocation41_spill] sm:$0xff] %v10442_v6  ;;  %v10454_v29 = vsub.f32 %v13275_v24, %v10118_v60  ;;  %v10458_v7 = vsub.f32 %v13277_v50, %v10118_v60  ;;  %v13279_v2 = vld [vmem:[#allocation86_spill] sm:$0xff]  ;;  %v13281_v6 = vld [vmem:[#allocation87_spill] sm:$0xff] }
 0x5db   : > { %13272 = vst [vmem:[#allocation42_spill] sm:$0xff] %v10446_v48  ;;  %13274 = vst [vmem:[#allocation43_spill] sm:$0xff] %v10450_v56  ;;  %v10462_v17 = vsub.f32 %v13279_v2, %v10118_v60  ;;  %v10466_v41 = vsub.f32 %v13281_v6, %v10118_v60  ;;  %v13283_v48 = vld [vmem:[#allocation88_spill] sm:$0xff]  ;;  %v13285_v56 = vld [vmem:[#allocation89_spill] sm:$0xff] }
 0x5dc   : > { %13276 = vst [vmem:[#allocation44_spill] sm:$0xff] %v10454_v29  ;;  %13278 = vst [vmem:[#allocation45_spill] sm:$0xff] %v10458_v7  ;;  %v10470_v38 = vsub.f32 %v13283_v48, %v10118_v60  ;;  %v10474_v24 = vsub.f32 %v13285_v56, %v10118_v60  ;;  %v13287_v29 = vld [vmem:[#allocation90_spill] sm:$0xff]  ;;  %v13289_v7 = vld [vmem:[#allocation91_spill] sm:$0xff] }
 0x5dd   : > { %13280 = vst [vmem:[#allocation46_spill] sm:$0xff] %v10462_v17  ;;  %13282 = vst [vmem:[#allocation47_spill] sm:$0xff] %v10466_v41  ;;  %v10478_v50 = vsub.f32 %v13287_v29, %v10118_v60  ;;  %v10482_v2 = vsub.f32 %v13289_v7, %v10118_v60  ;;  %v13291_v17 = vld [vmem:[#allocation92_spill] sm:$0xff]  ;;  %v13293_v41 = vld [vmem:[#allocation93_spill] sm:$0xff] }
 0x5de   : > { %13284 = vst [vmem:[#allocation48_spill] sm:$0xff] %v10470_v38  ;;  %13286 = vst [vmem:[#allocation49_spill] sm:$0xff] %v10474_v24  ;;  %v10486_v6 = vsub.f32 %v13291_v17, %v10118_v60  ;;  %v10490_v48 = vsub.f32 %v13293_v41, %v10118_v60  ;;  %v13295_v38 = vld [vmem:[#allocation95_spill] sm:$0xff]  ;;  %v13297_v24 = vld [vmem:[#allocation97_spill] sm:$0xff] }
 0x5df   : > { %13288 = vst [vmem:[#allocation50_spill] sm:$0xff] %v10478_v50  ;;  %13290 = vst [vmem:[#allocation51_spill] sm:$0xff] %v10482_v2  ;;  %v10494_v56 = vsub.f32 %v13295_v38, %v10118_v60  ;;  %v10498_v29 = vsub.f32 %v13297_v24, %v10118_v60  ;;  %v13299_v50 = vld [vmem:[#allocation99_spill] sm:$0xff]  ;;  %v13301_v2 = vld [vmem:[#allocation101_spill] sm:$0xff] }
 0x5e0   : > { %13292 = vst [vmem:[#allocation52_spill] sm:$0xff] %v10486_v6  ;;  %13294 = vst [vmem:[#allocation53_spill] sm:$0xff] %v10490_v48  ;;  %v10502_v7 = vsub.f32 %v13299_v50, %v10118_v60  ;;  %v10506_v17 = vsub.f32 %v13301_v2, %v10118_v60  ;;  %v13303_v6 = vld [vmem:[#allocation103_spill] sm:$0xff]  ;;  %v13305_v48 = vld [vmem:[#allocation105_spill] sm:$0xff] }
 0x5e1   : > { %13296 = vst [vmem:[#allocation54_spill] sm:$0xff] %v10494_v56  ;;  %13298 = vst [vmem:[#allocation55_spill] sm:$0xff] %v10498_v29  ;;  %v10510_v41 = vsub.f32 %v13303_v6, %v10118_v60  ;;  %v10514_v38 = vsub.f32 %v13305_v48, %v10118_v60  ;;  %v13307_v56 = vld [vmem:[#allocation107_spill] sm:$0xff]  ;;  %v13309_v29 = vld [vmem:[#allocation109_spill] sm:$0xff] }
 0x5e2   : > { %13300 = vst [vmem:[#allocation56_spill] sm:$0xff] %v10502_v7  ;;  %13302 = vst [vmem:[#allocation57_spill] sm:$0xff] %v10506_v17  ;;  %v10518_v24 = vsub.f32 %v13307_v56, %v10118_v60  ;;  %v10522_v50 = vsub.f32 %v13309_v29, %v10118_v60  ;;  %v13311_v7 = vld [vmem:[#allocation110_spill] sm:$0xff]  ;;  %v13313_v17 = vld [vmem:[#allocation113_spill] sm:$0xff] }
 0x5e3   : > { %13304 = vst [vmem:[#allocation58_spill] sm:$0xff] %v10510_v41  ;;  %13306 = vst [vmem:[#allocation59_spill] sm:$0xff] %v10514_v38  ;;  %v10526_v2 = vsub.f32 %v13311_v7, %v10118_v60  ;;  %v10530_v6 = vsub.f32 %v13313_v17, %v10118_v60  ;;  %v13315_v41 = vld [vmem:[#allocation114_spill] sm:$0xff]  ;;  %v13317_v38 = vld [vmem:[#allocation117_spill] sm:$0xff] }
 0x5e4   : > { %13308 = vst [vmem:[#allocation60_spill] sm:$0xff] %v10518_v24  ;;  %13310 = vst [vmem:[#allocation61_spill] sm:$0xff] %v10522_v50  ;;  %v10534_v48 = vsub.f32 %v13315_v41, %v10118_v60  ;;  %v10538_v56 = vsub.f32 %v13317_v38, %v10118_v60  ;;  %v13319_v24 = vld [vmem:[#allocation118_spill] sm:$0xff]  ;;  %v13321_v50 = vld [vmem:[#allocation121_spill] sm:$0xff] }
 0x5e5   : > { %13312 = vst [vmem:[#allocation62_spill] sm:$0xff] %v10526_v2  ;;  %13314 = vst [vmem:[#allocation63_spill] sm:$0xff] %v10530_v6  ;;  %v10542_v29 = vsub.f32 %v13319_v24, %v10118_v60  ;;  %v10546_v7 = vsub.f32 %v13321_v50, %v10118_v60  ;;  %v13323_v2 = vld [vmem:[#allocation122_spill] sm:$0xff]  ;;  %v13325_v6 = vld [vmem:[#allocation125_spill] sm:$0xff] }
 0x5e6   : > { %13316 = vst [vmem:[#allocation64_spill] sm:$0xff] %v10534_v48  ;;  %13318 = vst [vmem:[#allocation65_spill] sm:$0xff] %v10538_v56  ;;  %v10550_v17 = vsub.f32 %v13323_v2, %v10118_v60  ;;  %v10554_v41 = vsub.f32 %v13325_v6, %v10118_v60  ;;  %v13327_v48 = vld [vmem:[#allocation126_spill] sm:$0xff]  ;;  %v13329_v56 = vld [vmem:[#allocation129_spill] sm:$0xff] }
 0x5e7   : > { %13320 = vst [vmem:[#allocation66_spill] sm:$0xff] %v10542_v29  ;;  %13322 = vst [vmem:[#allocation67_spill] sm:$0xff] %v10546_v7  ;;  %v10558_v38 = vsub.f32 %v13327_v48, %v10118_v60  ;;  %v10562_v24 = vsub.f32 %v13329_v56, %v10118_v60  ;;  %v13331_v29 = vld [vmem:[#allocation131_spill] sm:$0xff]  ;;  %v13333_v7 = vld [vmem:[#allocation133_spill] sm:$0xff] }
 0x5e8   : > { %13324 = vst [vmem:[#allocation68_spill] sm:$0xff] %v10550_v17  ;;  %13326 = vst [vmem:[#allocation69_spill] sm:$0xff] %v10554_v41  ;;  %v10566_v50 = vsub.f32 %v13331_v29, %v10118_v60  ;;  %v10570_v2 = vsub.f32 %v13333_v7, %v10118_v60  ;;  %v13335_v17 = vld [vmem:[#allocation135_spill] sm:$0xff]  ;;  %v13337_v41 = vld [vmem:[#allocation137_spill] sm:$0xff] }
 0x5e9   : > { %13328 = vst [vmem:[#allocation70_spill] sm:$0xff] %v10558_v38  ;;  %13330 = vst [vmem:[#allocation71_spill] sm:$0xff] %v10562_v24  ;;  %v10574_v6 = vsub.f32 %v13335_v17, %v10118_v60  ;;  %v10578_v48 = vsub.f32 %v13337_v41, %v10118_v60  ;;  %v13339_v38 = vld [vmem:[#allocation139_spill] sm:$0xff]  ;;  %v13341_v24 = vld [vmem:[#allocation141_spill] sm:$0xff] }
 0x5ea   : > { %13332 = vst [vmem:[#allocation72_spill] sm:$0xff] %v10566_v50  ;;  %13334 = vst [vmem:[#allocation73_spill] sm:$0xff] %v10570_v2  ;;  %v10582_v56 = vsub.f32 %v13339_v38, %v10118_v60  ;;  %v10586_v29 = vsub.f32 %v13341_v24, %v10118_v60  ;;  %v13343_v50 = vld [vmem:[#allocation142_spill] sm:$0xff]  ;;  %v13345_v2 = vld [vmem:[#allocation143_spill] sm:$0xff] }
 0x5eb   : > { %13336 = vst [vmem:[#allocation74_spill] sm:$0xff] %v10574_v6  ;;  %13338 = vst [vmem:[#allocation75_spill] sm:$0xff] %v10578_v48  ;;  %v10590_v7 = vsub.f32 %v13343_v50, %v10118_v60  ;;  %v10594_v17 = vsub.f32 %v13345_v2, %v10118_v60  ;;  %v13347_v6 = vld [vmem:[#allocation144_spill] sm:$0xff]  ;;  %v13349_v48 = vld [vmem:[#allocation145_spill] sm:$0xff] }
 0x5ec   : > { %13340 = vst [vmem:[#allocation76_spill] sm:$0xff] %v10582_v56  ;;  %13342 = vst [vmem:[#allocation77_spill] sm:$0xff] %v10586_v29  ;;  %v10598_v41 = vsub.f32 %v13347_v6, %v10118_v60  ;;  %v10602_v38 = vsub.f32 %v13349_v48, %v10118_v60  ;;  %v13351_v56 = vld [vmem:[#allocation146_spill] sm:$0xff]  ;;  %v13353_v29 = vld [vmem:[#allocation147_spill] sm:$0xff] }
 0x5ed   : > { %13344 = vst [vmem:[#allocation78_spill] sm:$0xff] %v10590_v7  ;;  %13346 = vst [vmem:[#allocation79_spill] sm:$0xff] %v10594_v17  ;;  %v10606_v24 = vsub.f32 %v13351_v56, %v10118_v60  ;;  %v10610_v50 = vsub.f32 %v13353_v29, %v10118_v60  ;;  %v13355_v7 = vld [vmem:[#allocation148_spill] sm:$0xff]  ;;  %v13357_v17 = vld [vmem:[#allocation149_spill] sm:$0xff]  ;;  %v10626_v56 = vsub.f32 %v9880_v37, %v10118_v60 }
 0x5ee   : > { %13348 = vst [vmem:[#allocation80_spill] sm:$0xff] %v10598_v41  ;;  %13350 = vst [vmem:[#allocation81_spill] sm:$0xff] %v10602_v38  ;;  %v10614_v2 = vsub.f32 %v13355_v7, %v10118_v60  ;;  %v10618_v6 = vsub.f32 %v13357_v17, %v10118_v60  ;;  %v13359_v41 = vld [vmem:[#allocation150_spill] sm:$0xff]  ;;  %v10630_v29 = vsub.f32 %v9883_v61, %v10118_v60 }
 0x5ef   : > { %13352 = vst [vmem:[#allocation82_spill] sm:$0xff] %v10606_v24  ;;  %13354 = vst [vmem:[#allocation83_spill] sm:$0xff] %v10610_v50  ;;  %v10622_v48 = vsub.f32 %v13359_v41, %v10118_v60  ;;  %v3898_v7 = vmul.f32 %v10122_v12, %v10122_v12  ;;  %v3900_v17 = vmul.f32 %v10130_v36, %v10130_v36 }
 0x5f0   : > { %13356 = vst [vmem:[#allocation84_spill] sm:$0xff] %v10614_v2  ;;  %13358 = vst [vmem:[#allocation85_spill] sm:$0xff] %v10618_v6  ;;  %v3899_v2 = vmul.f32 %v10126_v22, %v10126_v22  ;;  %v3901_v41 = vmul.f32 %v10134_v40, %v10134_v40  ;;  %v3902_v37 = vmul.f32 %v10138_v55, %v10138_v55 }
 0x5f1   : > { %13360 = vst [vmem:[#allocation86_spill] sm:$0xff] %v10622_v48  ;;  %13361 = vst [vmem:[#allocation87_spill] sm:$0xff] %v10626_v56  ;;  %v3903_v61 = vmul.f32 %v10142_v8, %v10142_v8  ;;  %v3904_v12 = vmul.f32 %v10146_v11, %v10146_v11  ;;  %v3905_v36 = vmul.f32 %v10150_v15, %v10150_v15 }
 0x5f2   : > { %v4026_v6 = vadd.f32 %v3899_v2, %v3898_v7  ;;  %v3906_v7 = vmul.f32 %v10154_v19, %v10154_v19 }
 0x5f4   : > { %v4027_v48 = vadd.f32 %v4026_v6, %v3900_v17  ;;  %v3907_v17 = vmul.f32 %v10158_v23, %v10158_v23 }
 0x5f6   : > { %v4028_v56 = vadd.f32 %v4027_v48, %v3901_v41  ;;  %v3908_v41 = vmul.f32 %v10162_v32, %v10162_v32 }
 0x5f8   : > { %v4029_v60 = vadd.f32 %v4028_v56, %v3902_v37  ;;  %v3909_v37 = vmul.f32 %v10166_v30, %v10166_v30 }
 0x5fa   : > { %v4030_v22 = vadd.f32 %v4029_v60, %v3903_v61  ;;  %v3910_v60 = vmul.f32 %v10170_v33, %v10170_v33 }
 0x5fc   : > { %v4031_v2 = vadd.f32 %v4030_v22, %v3904_v12  ;;  %v3911_v22 = vmul.f32 %v10174_v62, %v10174_v62 }
 0x5fe   : > { %v4032_v6 = vadd.f32 %v4031_v2, %v3905_v36  ;;  %v3912_v2 = vmul.f32 %v10178_v14, %v10178_v14 }
 0x600   : > { %v4033_v48 = vadd.f32 %v4032_v6, %v3906_v7  ;;  %v3913_v6 = vmul.f32 %v10182_v54, %v10182_v54 }
 0x602   : > { %v4034_v56 = vadd.f32 %v4033_v48, %v3907_v17  ;;  %v3914_v48 = vmul.f32 %v10186_v47, %v10186_v47 }
 0x604   : > { %v4035_v61 = vadd.f32 %v4034_v56, %v3908_v41  ;;  %v3915_v56 = vmul.f32 %v10190_v9, %v10190_v9 }
 0x606   : > { %v4036_v12 = vadd.f32 %v4035_v61, %v3909_v37  ;;  %v3916_v61 = vmul.f32 %v10194_v10, %v10194_v10 }
 0x608   : > { %v4037_v36 = vadd.f32 %v4036_v12, %v3910_v60  ;;  %v3917_v12 = vmul.f32 %v10198_v45, %v10198_v45 }
 0x60a   : > { %v4038_v7 = vadd.f32 %v4037_v36, %v3911_v22  ;;  %v3918_v36 = vmul.f32 %v10202_v27, %v10202_v27 }
 0x60c   : > { %v4039_v17 = vadd.f32 %v4038_v7, %v3912_v2  ;;  %v3919_v7 = vmul.f32 %v10206_v44, %v10206_v44 }
 0x60e   : > { %v4040_v41 = vadd.f32 %v4039_v17, %v3913_v6  ;;  %v3920_v17 = vmul.f32 %v10210_v43, %v10210_v43 }
 0x610   : > { %v4041_v37 = vadd.f32 %v4040_v41, %v3914_v48  ;;  %v3921_v41 = vmul.f32 %v10214_v35, %v10214_v35 }
 0x612   : > { %v4042_v60 = vadd.f32 %v4041_v37, %v3915_v56  ;;  %v3922_v37 = vmul.f32 %v10218_v31, %v10218_v31 }
 0x614   : > { %v4043_v22 = vadd.f32 %v4042_v60, %v3916_v61  ;;  %v3923_v60 = vmul.f32 %v10222_v51, %v10222_v51 }
 0x616   : > { %v4044_v2 = vadd.f32 %v4043_v22, %v3917_v12  ;;  %v3924_v22 = vmul.f32 %v10226_v59, %v10226_v59 }
 0x618   : > { %v4045_v6 = vadd.f32 %v4044_v2, %v3918_v36  ;;  %v3925_v2 = vmul.f32 %v10230_v5, %v10230_v5 }
 0x61a   : > { %v4046_v48 = vadd.f32 %v4045_v6, %v3919_v7  ;;  %v3926_v6 = vmul.f32 %v10234_v53, %v10234_v53 }
 0x61c   : > { %v4047_v56 = vadd.f32 %v4046_v48, %v3920_v17  ;;  %v3927_v48 = vmul.f32 %v10238_v28, %v10238_v28 }
 0x61e   : > { %v4048_v61 = vadd.f32 %v4047_v56, %v3921_v41  ;;  %v3928_v56 = vmul.f32 %v10242_v3, %v10242_v3 }
 0x620   : > { %v4049_v12 = vadd.f32 %v4048_v61, %v3922_v37  ;;  %v3929_v61 = vmul.f32 %v10246_v46, %v10246_v46 }
 0x622   : > { %v4050_v36 = vadd.f32 %v4049_v12, %v3923_v60  ;;  %v3930_v12 = vmul.f32 %v10250_v20, %v10250_v20 }
 0x624   : > { %v4051_v7 = vadd.f32 %v4050_v36, %v3924_v22  ;;  %v3931_v36 = vmul.f32 %v10254_v63, %v10254_v63 }
 0x626   : > { %v4052_v17 = vadd.f32 %v4051_v7, %v3925_v2  ;;  %v3932_v7 = vmul.f32 %v10258_v39, %v10258_v39 }
 0x628   : > { %v4053_v41 = vadd.f32 %v4052_v17, %v3926_v6  ;;  %v3933_v17 = vmul.f32 %v10262_v16, %v10262_v16 }
 0x62a   : > { %v4054_v37 = vadd.f32 %v4053_v41, %v3927_v48  ;;  %v3934_v41 = vmul.f32 %v10266_v1, %v10266_v1 }
 0x62c   : > { %v4055_v60 = vadd.f32 %v4054_v37, %v3928_v56  ;;  %v3935_v37 = vmul.f32 %v10270_v4, %v10270_v4 }
 0x62e   : > { %v4056_v22 = vadd.f32 %v4055_v60, %v3929_v61  ;;  %v3936_v60 = vmul.f32 %v10274_v57, %v10274_v57 }
 0x630   : > { %v4057_v2 = vadd.f32 %v4056_v22, %v3930_v12  ;;  %v3937_v22 = vmul.f32 %v10278_v49, %v10278_v49 }
 0x632   : > { %v4058_v6 = vadd.f32 %v4057_v2, %v3931_v36  ;;  %v3938_v2 = vmul.f32 %v10282_v0, %v10282_v0 }
 0x634   : > { %v4059_v48 = vadd.f32 %v4058_v6, %v3932_v7  ;;  %v3939_v6 = vmul.f32 %v10286_v21, %v10286_v21 }
 0x636   : > { %v4060_v56 = vadd.f32 %v4059_v48, %v3933_v17  ;;  %v3940_v48 = vmul.f32 %v10290_v42, %v10290_v42 }
 0x638   : > { %v4061_v61 = vadd.f32 %v4060_v56, %v3934_v41  ;;  %v3941_v56 = vmul.f32 %v10294_v58, %v10294_v58 }
 0x63a   : > { %v4062_v12 = vadd.f32 %v4061_v61, %v3935_v37  ;;  %v3942_v61 = vmul.f32 %v10298_v13, %v10298_v13 }
 0x63c   : > { %v4063_v36 = vadd.f32 %v4062_v12, %v3936_v60  ;;  %v3943_v12 = vmul.f32 %v10302_v52, %v10302_v52 }
 0x63e   : > { %v4064_v7 = vadd.f32 %v4063_v36, %v3937_v22  ;;  %v3944_v36 = vmul.f32 %v10306_v34, %v10306_v34 }
 0x640   : > { %v4065_v17 = vadd.f32 %v4064_v7, %v3938_v2  ;;  %v3945_v7 = vmul.f32 %v10310_v25, %v10310_v25 }
 0x642   : > { %v4066_v41 = vadd.f32 %v4065_v17, %v3939_v6  ;;  %v3946_v17 = vmul.f32 %v10314_v26, %v10314_v26 }
 0x644   : > { %v4067_v37 = vadd.f32 %v4066_v41, %v3940_v48  ;;  %v3947_v41 = vmul.f32 %v10318_v18, %v10318_v18 }
 0x646   : > { %v4068_v60 = vadd.f32 %v4067_v37, %v3941_v56  ;;  %v13362_v37 = vld [vmem:[#allocation11_spill] sm:$0xff] }
 0x647   : > { %v3948_v52 = vmul.f32 %v13362_v37, %v13362_v37 }
 0x648   : > { %v4069_v22 = vadd.f32 %v4068_v60, %v3942_v61  ;;  %v13363_v60 = vld [vmem:[#allocation12_spill] sm:$0xff] }
 0x649   : > { %v3949_v34 = vmul.f32 %v13363_v60, %v13363_v60 }
 0x64a   : > { %v4070_v2 = vadd.f32 %v4069_v22, %v3943_v12  ;;  %v13364_v22 = vld [vmem:[#allocation13_spill] sm:$0xff] }
 0x64b   : > { %v3950_v25 = vmul.f32 %v13364_v22, %v13364_v22 }
 0x64c   : > { %v4071_v6 = vadd.f32 %v4070_v2, %v3944_v36  ;;  %v13365_v2 = vld [vmem:[#allocation14_spill] sm:$0xff] }
 0x64d   : > { %v3951_v26 = vmul.f32 %v13365_v2, %v13365_v2 }
 0x64e   : > { %v4072_v48 = vadd.f32 %v4071_v6, %v3945_v7  ;;  %v13366_v6 = vld [vmem:[#allocation15_spill] sm:$0xff] }
 0x64f   : > { %v3952_v18 = vmul.f32 %v13366_v6, %v13366_v6 }
 0x650   : > { %v4073_v56 = vadd.f32 %v4072_v48, %v3946_v17  ;;  %v13367_v48 = vld [vmem:[#allocation16_spill] sm:$0xff] }
 0x651   : > { %v3953_v37 = vmul.f32 %v13367_v48, %v13367_v48 }
 0x652   : > { %v4074_v61 = vadd.f32 %v4073_v56, %v3947_v41  ;;  %v13368_v56 = vld [vmem:[#allocation17_spill] sm:$0xff] }
 0x653   : > { %v3954_v60 = vmul.f32 %v13368_v56, %v13368_v56 }
 0x654   : > { %v4075_v12 = vadd.f32 %v4074_v61, %v3948_v52  ;;  %v13369_v61 = vld [vmem:[#allocation18_spill] sm:$0xff] }
 0x655   : > { %v3955_v22 = vmul.f32 %v13369_v61, %v13369_v61 }
 0x656   : > { %v4076_v36 = vadd.f32 %v4075_v12, %v3949_v34  ;;  %v13370_v12 = vld [vmem:[#allocation19_spill] sm:$0xff] }
 0x657   : > { %v3956_v2 = vmul.f32 %v13370_v12, %v13370_v12 }
 0x658   : > { %v4077_v7 = vadd.f32 %v4076_v36, %v3950_v25  ;;  %v13371_v36 = vld [vmem:[#allocation20_spill] sm:$0xff] }
 0x659   : > { %v3957_v6 = vmul.f32 %v13371_v36, %v13371_v36 }
 0x65a   : > { %v4078_v17 = vadd.f32 %v4077_v7, %v3951_v26  ;;  %v13372_v7 = vld [vmem:[#allocation21_spill] sm:$0xff] }
 0x65b   : > { %v3958_v48 = vmul.f32 %v13372_v7, %v13372_v7 }
 0x65c   : > { %v4079_v41 = vadd.f32 %v4078_v17, %v3952_v18  ;;  %v13373_v17 = vld [vmem:[#allocation22_spill] sm:$0xff] }
 0x65d   : > { %v3959_v56 = vmul.f32 %v13373_v17, %v13373_v17 }
 0x65e   : > { %v4080_v52 = vadd.f32 %v4079_v41, %v3953_v37  ;;  %v13374_v41 = vld [vmem:[#allocation23_spill] sm:$0xff] }
 0x65f   : > { %v3960_v61 = vmul.f32 %v13374_v41, %v13374_v41 }
 0x660   : > { %v4081_v34 = vadd.f32 %v4080_v52, %v3954_v60  ;;  %v13375_v52 = vld [vmem:[#allocation24_spill] sm:$0xff] }
 0x661   : > { %v3961_v12 = vmul.f32 %v13375_v52, %v13375_v52 }
 0x662   : > { %v4082_v25 = vadd.f32 %v4081_v34, %v3955_v22  ;;  %v13376_v34 = vld [vmem:[#allocation25_spill] sm:$0xff] }
 0x663   : > { %v3962_v36 = vmul.f32 %v13376_v34, %v13376_v34 }
 0x664   : > { %v4083_v26 = vadd.f32 %v4082_v25, %v3956_v2  ;;  %v13377_v25 = vld [vmem:[#allocation26_spill] sm:$0xff] }
 0x665   : > { %v3963_v7 = vmul.f32 %v13377_v25, %v13377_v25 }
 0x666   : > { %v4084_v18 = vadd.f32 %v4083_v26, %v3957_v6  ;;  %v13378_v26 = vld [vmem:[#allocation27_spill] sm:$0xff] }
 0x667   : > { %v3964_v17 = vmul.f32 %v13378_v26, %v13378_v26 }
 0x668   : > { %v4085_v37 = vadd.f32 %v4084_v18, %v3958_v48  ;;  %v13379_v18 = vld [vmem:[#allocation28_spill] sm:$0xff] }
 0x669   : > { %v3965_v41 = vmul.f32 %v13379_v18, %v13379_v18 }
 0x66a   : > { %v4086_v60 = vadd.f32 %v4085_v37, %v3959_v56  ;;  %v13380_v37 = vld [vmem:[#allocation29_spill] sm:$0xff] }
 0x66b   : > { %v3966_v52 = vmul.f32 %v13380_v37, %v13380_v37 }
 0x66c   : > { %v4087_v22 = vadd.f32 %v4086_v60, %v3960_v61  ;;  %v13381_v60 = vld [vmem:[#allocation30_spill] sm:$0xff] }
 0x66d   : > { %v3967_v34 = vmul.f32 %v13381_v60, %v13381_v60 }
 0x66e   : > { %v4088_v2 = vadd.f32 %v4087_v22, %v3961_v12  ;;  %v13382_v22 = vld [vmem:[#allocation31_spill] sm:$0xff] }
 0x66f   : > { %v3968_v25 = vmul.f32 %v13382_v22, %v13382_v22 }
 0x670   : > { %v4089_v6 = vadd.f32 %v4088_v2, %v3962_v36  ;;  %v13383_v2 = vld [vmem:[#allocation32_spill] sm:$0xff] }
 0x671   : > { %v3969_v26 = vmul.f32 %v13383_v2, %v13383_v2 }
 0x672   : > { %v4090_v48 = vadd.f32 %v4089_v6, %v3963_v7  ;;  %v13384_v6 = vld [vmem:[#allocation33_spill] sm:$0xff] }
 0x673   : > { %v3970_v18 = vmul.f32 %v13384_v6, %v13384_v6 }
 0x674   : > { %v4091_v56 = vadd.f32 %v4090_v48, %v3964_v17  ;;  %v13385_v48 = vld [vmem:[#allocation34_spill] sm:$0xff] }
 0x675   : > { %v3971_v37 = vmul.f32 %v13385_v48, %v13385_v48 }
 0x676   : > { %v4092_v61 = vadd.f32 %v4091_v56, %v3965_v41  ;;  %v13386_v56 = vld [vmem:[#allocation35_spill] sm:$0xff] }
 0x677   : > { %v3972_v60 = vmul.f32 %v13386_v56, %v13386_v56 }
 0x678   : > { %v4093_v12 = vadd.f32 %v4092_v61, %v3966_v52  ;;  %v13387_v61 = vld [vmem:[#allocation36_spill] sm:$0xff] }
 0x679   : > { %v3973_v22 = vmul.f32 %v13387_v61, %v13387_v61 }
 0x67a   : > { %v4094_v36 = vadd.f32 %v4093_v12, %v3967_v34  ;;  %v13388_v12 = vld [vmem:[#allocation37_spill] sm:$0xff] }
 0x67b   : > { %v3974_v2 = vmul.f32 %v13388_v12, %v13388_v12 }
 0x67c   : > { %v4095_v7 = vadd.f32 %v4094_v36, %v3968_v25  ;;  %v13389_v36 = vld [vmem:[#allocation38_spill] sm:$0xff] }
 0x67d   : > { %v3975_v6 = vmul.f32 %v13389_v36, %v13389_v36 }
 0x67e   : > { %v4096_v17 = vadd.f32 %v4095_v7, %v3969_v26  ;;  %v13390_v7 = vld [vmem:[#allocation39_spill] sm:$0xff] }
 0x67f   : > { %v3976_v48 = vmul.f32 %v13390_v7, %v13390_v7 }
 0x680   : > { %v4097_v41 = vadd.f32 %v4096_v17, %v3970_v18  ;;  %v13391_v17 = vld [vmem:[#allocation40_spill] sm:$0xff] }
 0x681   : > { %v3977_v56 = vmul.f32 %v13391_v17, %v13391_v17 }
 0x682   : > { %v4098_v52 = vadd.f32 %v4097_v41, %v3971_v37  ;;  %v13392_v41 = vld [vmem:[#allocation41_spill] sm:$0xff] }
 0x683   : > { %v3978_v61 = vmul.f32 %v13392_v41, %v13392_v41 }
 0x684   : > { %v4099_v34 = vadd.f32 %v4098_v52, %v3972_v60  ;;  %v13393_v52 = vld [vmem:[#allocation42_spill] sm:$0xff] }
 0x685   : > { %v3979_v12 = vmul.f32 %v13393_v52, %v13393_v52 }
 0x686   : > { %v4100_v25 = vadd.f32 %v4099_v34, %v3973_v22  ;;  %v13394_v34 = vld [vmem:[#allocation43_spill] sm:$0xff] }
 0x687   : > { %v3980_v36 = vmul.f32 %v13394_v34, %v13394_v34 }
 0x688   : > { %v4101_v26 = vadd.f32 %v4100_v25, %v3974_v2  ;;  %v13395_v25 = vld [vmem:[#allocation44_spill] sm:$0xff] }
 0x689   : > { %v3981_v7 = vmul.f32 %v13395_v25, %v13395_v25 }
 0x68a   : > { %v4102_v18 = vadd.f32 %v4101_v26, %v3975_v6  ;;  %v13396_v26 = vld [vmem:[#allocation45_spill] sm:$0xff] }
 0x68b   : > { %v3982_v17 = vmul.f32 %v13396_v26, %v13396_v26 }
 0x68c   : > { %v4103_v37 = vadd.f32 %v4102_v18, %v3976_v48  ;;  %v13397_v18 = vld [vmem:[#allocation46_spill] sm:$0xff] }
 0x68d   : > { %v3983_v41 = vmul.f32 %v13397_v18, %v13397_v18 }
 0x68e   : > { %v4104_v60 = vadd.f32 %v4103_v37, %v3977_v56  ;;  %v13398_v37 = vld [vmem:[#allocation47_spill] sm:$0xff] }
 0x68f   : > { %v3984_v52 = vmul.f32 %v13398_v37, %v13398_v37 }
 0x690   : > { %v4105_v22 = vadd.f32 %v4104_v60, %v3978_v61  ;;  %v13399_v60 = vld [vmem:[#allocation48_spill] sm:$0xff] }
 0x691   : > { %v3985_v34 = vmul.f32 %v13399_v60, %v13399_v60 }
 0x692   : > { %v4106_v2 = vadd.f32 %v4105_v22, %v3979_v12  ;;  %v13400_v22 = vld [vmem:[#allocation49_spill] sm:$0xff] }
 0x693   : > { %v3986_v25 = vmul.f32 %v13400_v22, %v13400_v22 }
 0x694   : > { %v4107_v6 = vadd.f32 %v4106_v2, %v3980_v36  ;;  %v13401_v2 = vld [vmem:[#allocation50_spill] sm:$0xff] }
 0x695   : > { %v3987_v26 = vmul.f32 %v13401_v2, %v13401_v2 }
 0x696   : > { %v4108_v48 = vadd.f32 %v4107_v6, %v3981_v7  ;;  %v13402_v6 = vld [vmem:[#allocation51_spill] sm:$0xff] }
 0x697   : > { %v3988_v18 = vmul.f32 %v13402_v6, %v13402_v6 }
 0x698   : > { %v4109_v56 = vadd.f32 %v4108_v48, %v3982_v17  ;;  %v13403_v48 = vld [vmem:[#allocation52_spill] sm:$0xff] }
 0x699   : > { %v3989_v37 = vmul.f32 %v13403_v48, %v13403_v48 }
 0x69a   : > { %v4110_v61 = vadd.f32 %v4109_v56, %v3983_v41  ;;  %v13404_v56 = vld [vmem:[#allocation53_spill] sm:$0xff] }
 0x69b   : > { %v3990_v60 = vmul.f32 %v13404_v56, %v13404_v56 }
 0x69c   : > { %v4111_v12 = vadd.f32 %v4110_v61, %v3984_v52  ;;  %v13405_v61 = vld [vmem:[#allocation54_spill] sm:$0xff] }
 0x69d   : > { %v3991_v22 = vmul.f32 %v13405_v61, %v13405_v61 }
 0x69e   : > { %v4112_v36 = vadd.f32 %v4111_v12, %v3985_v34  ;;  %v13406_v12 = vld [vmem:[#allocation55_spill] sm:$0xff] }
 0x69f   : > { %v3992_v2 = vmul.f32 %v13406_v12, %v13406_v12 }
 0x6a0   : > { %v4113_v7 = vadd.f32 %v4112_v36, %v3986_v25  ;;  %v13407_v36 = vld [vmem:[#allocation56_spill] sm:$0xff] }
 0x6a1   : > { %v3993_v6 = vmul.f32 %v13407_v36, %v13407_v36 }
 0x6a2   : > { %v4114_v17 = vadd.f32 %v4113_v7, %v3987_v26  ;;  %v13408_v7 = vld [vmem:[#allocation57_spill] sm:$0xff] }
 0x6a3   : > { %v3994_v48 = vmul.f32 %v13408_v7, %v13408_v7 }
 0x6a4   : > { %v4115_v41 = vadd.f32 %v4114_v17, %v3988_v18  ;;  %v13409_v17 = vld [vmem:[#allocation58_spill] sm:$0xff] }
 0x6a5   : > { %v3995_v56 = vmul.f32 %v13409_v17, %v13409_v17 }
 0x6a6   : > { %v4116_v52 = vadd.f32 %v4115_v41, %v3989_v37  ;;  %v13410_v41 = vld [vmem:[#allocation59_spill] sm:$0xff] }
 0x6a7   : > { %v3996_v61 = vmul.f32 %v13410_v41, %v13410_v41 }
 0x6a8   : > { %v4117_v34 = vadd.f32 %v4116_v52, %v3990_v60  ;;  %v13411_v52 = vld [vmem:[#allocation60_spill] sm:$0xff] }
 0x6a9   : > { %v3997_v12 = vmul.f32 %v13411_v52, %v13411_v52 }
 0x6aa   : > { %v4118_v25 = vadd.f32 %v4117_v34, %v3991_v22  ;;  %v13412_v34 = vld [vmem:[#allocation61_spill] sm:$0xff] }
 0x6ab   : > { %v3998_v36 = vmul.f32 %v13412_v34, %v13412_v34 }
 0x6ac   : > { %v4119_v26 = vadd.f32 %v4118_v25, %v3992_v2  ;;  %v13413_v25 = vld [vmem:[#allocation62_spill] sm:$0xff] }
 0x6ad   : > { %v3999_v7 = vmul.f32 %v13413_v25, %v13413_v25 }
 0x6ae   : > { %v4120_v18 = vadd.f32 %v4119_v26, %v3993_v6  ;;  %v13414_v26 = vld [vmem:[#allocation63_spill] sm:$0xff] }
 0x6af   : > { %v4000_v17 = vmul.f32 %v13414_v26, %v13414_v26 }
 0x6b0   : > { %v4121_v37 = vadd.f32 %v4120_v18, %v3994_v48  ;;  %v13415_v18 = vld [vmem:[#allocation64_spill] sm:$0xff] }
 0x6b1   : > { %v4001_v41 = vmul.f32 %v13415_v18, %v13415_v18 }
 0x6b2   : > { %v4122_v60 = vadd.f32 %v4121_v37, %v3995_v56  ;;  %v13416_v37 = vld [vmem:[#allocation65_spill] sm:$0xff] }
 0x6b3   : > { %v4002_v52 = vmul.f32 %v13416_v37, %v13416_v37 }
 0x6b4   : > { %v4123_v22 = vadd.f32 %v4122_v60, %v3996_v61  ;;  %v13417_v60 = vld [vmem:[#allocation66_spill] sm:$0xff] }
 0x6b5   : > { %v4003_v34 = vmul.f32 %v13417_v60, %v13417_v60 }
 0x6b6   : > { %v4124_v2 = vadd.f32 %v4123_v22, %v3997_v12  ;;  %v13418_v22 = vld [vmem:[#allocation67_spill] sm:$0xff] }
 0x6b7   : > { %v4004_v25 = vmul.f32 %v13418_v22, %v13418_v22 }
 0x6b8   : > { %v4125_v6 = vadd.f32 %v4124_v2, %v3998_v36  ;;  %v13419_v2 = vld [vmem:[#allocation68_spill] sm:$0xff] }
 0x6b9   : > { %v4005_v26 = vmul.f32 %v13419_v2, %v13419_v2 }
 0x6ba   : > { %v4126_v48 = vadd.f32 %v4125_v6, %v3999_v7  ;;  %v13420_v6 = vld [vmem:[#allocation69_spill] sm:$0xff] }
 0x6bb   : > { %v4006_v18 = vmul.f32 %v13420_v6, %v13420_v6 }
 0x6bc   : > { %v4127_v56 = vadd.f32 %v4126_v48, %v4000_v17  ;;  %v13421_v48 = vld [vmem:[#allocation70_spill] sm:$0xff] }
 0x6bd   : > { %v4007_v37 = vmul.f32 %v13421_v48, %v13421_v48 }
 0x6be   : > { %v4128_v61 = vadd.f32 %v4127_v56, %v4001_v41  ;;  %v13422_v56 = vld [vmem:[#allocation71_spill] sm:$0xff] }
 0x6bf   : > { %v4008_v60 = vmul.f32 %v13422_v56, %v13422_v56 }
 0x6c0   : > { %v4129_v12 = vadd.f32 %v4128_v61, %v4002_v52  ;;  %v13423_v61 = vld [vmem:[#allocation72_spill] sm:$0xff] }
 0x6c1   : > { %v4009_v22 = vmul.f32 %v13423_v61, %v13423_v61 }
 0x6c2   : > { %v4130_v36 = vadd.f32 %v4129_v12, %v4003_v34  ;;  %v13424_v12 = vld [vmem:[#allocation73_spill] sm:$0xff] }
 0x6c3   : > { %v4010_v2 = vmul.f32 %v13424_v12, %v13424_v12 }
 0x6c4   : > { %v4131_v7 = vadd.f32 %v4130_v36, %v4004_v25  ;;  %v13425_v36 = vld [vmem:[#allocation74_spill] sm:$0xff] }
 0x6c5   : > { %v4011_v6 = vmul.f32 %v13425_v36, %v13425_v36 }
 0x6c6   : > { %v4132_v17 = vadd.f32 %v4131_v7, %v4005_v26  ;;  %v13426_v7 = vld [vmem:[#allocation75_spill] sm:$0xff] }
 0x6c7   : > { %v4012_v48 = vmul.f32 %v13426_v7, %v13426_v7 }
 0x6c8   : > { %v4133_v41 = vadd.f32 %v4132_v17, %v4006_v18  ;;  %v13427_v17 = vld [vmem:[#allocation76_spill] sm:$0xff] }
 0x6c9   : > { %v4013_v56 = vmul.f32 %v13427_v17, %v13427_v17 }
 0x6ca   : > { %v4134_v52 = vadd.f32 %v4133_v41, %v4007_v37  ;;  %v13428_v41 = vld [vmem:[#allocation77_spill] sm:$0xff] }
 0x6cb   : > { %v4014_v61 = vmul.f32 %v13428_v41, %v13428_v41 }
 0x6cc   : > { %v4135_v34 = vadd.f32 %v4134_v52, %v4008_v60  ;;  %v13429_v52 = vld [vmem:[#allocation78_spill] sm:$0xff] }
 0x6cd   : > { %v4015_v12 = vmul.f32 %v13429_v52, %v13429_v52 }
 0x6ce   : > { %v4136_v25 = vadd.f32 %v4135_v34, %v4009_v22  ;;  %v13430_v34 = vld [vmem:[#allocation79_spill] sm:$0xff] }
 0x6cf   : > { %v4016_v36 = vmul.f32 %v13430_v34, %v13430_v34 }
 0x6d0   : > { %v4137_v26 = vadd.f32 %v4136_v25, %v4010_v2  ;;  %v13431_v25 = vld [vmem:[#allocation80_spill] sm:$0xff] }
 0x6d1   : > { %v4017_v7 = vmul.f32 %v13431_v25, %v13431_v25 }
 0x6d2   : > { %v4138_v18 = vadd.f32 %v4137_v26, %v4011_v6  ;;  %v4018_v26 = vmul.f32 %v10602_v38, %v10602_v38 }
 0x6d4   : > { %v4139_v37 = vadd.f32 %v4138_v18, %v4012_v48  ;;  %v4019_v18 = vmul.f32 %v10606_v24, %v10606_v24 }
 0x6d6   : > { %v4140_v60 = vadd.f32 %v4139_v37, %v4013_v56  ;;  %v4020_v37 = vmul.f32 %v10610_v50, %v10610_v50 }
 0x6d8   : > { %v4141_v22 = vadd.f32 %v4140_v60, %v4014_v61  ;;  %v13432_v60 = vld [vmem:[#allocation84_spill] sm:$0xff] }
 0x6d9   : > { %v4021_v34 = vmul.f32 %v13432_v60, %v13432_v60 }
 0x6da   : > { %v4142_v2 = vadd.f32 %v4141_v22, %v4015_v12  ;;  %v13433_v22 = vld [vmem:[#allocation85_spill] sm:$0xff] }
 0x6db   : > { %v4022_v25 = vmul.f32 %v13433_v22, %v13433_v22 }
 0x6dc   : > { %v4143_v6 = vadd.f32 %v4142_v2, %v4016_v36  ;;  %v13434_v2 = vld [vmem:[#allocation86_spill] sm:$0xff] }
 0x6dd   : > { %v4023_v38 = vmul.f32 %v13434_v2, %v13434_v2 }
 0x6de   : > { %v4144_v48 = vadd.f32 %v4143_v6, %v4017_v7  ;;  %v13435_v6 = vld [vmem:[#allocation87_spill] sm:$0xff] }
 0x6df   : > { %v4024_v24 = vmul.f32 %v13435_v6, %v13435_v6 }
 0x6e0   : > { %v4145_v56 = vadd.f32 %v4144_v48, %v4018_v26  ;;  %v4025_v48 = vmul.f32 %v10630_v29, %v10630_v29 }
 0x6e2   : > { %v4146_v61 = vadd.f32 %v4145_v56, %v4019_v18 }
 0x6e4   : > { %v4147_v12 = vadd.f32 %v4146_v61, %v4020_v37 }
 0x6e6   : > { %v4148_v36 = vadd.f32 %v4147_v12, %v4021_v34 }
 0x6e8   : > { %v4149_v7 = vadd.f32 %v4148_v36, %v4022_v25 }
 0x6ea   : > { %v4150_v26 = vadd.f32 %v4149_v7, %v4023_v38  ;;  %v13436_v38 = vld [vmem:[#allocation111_spill] sm:$0xff]  ;;  %v13437_v7 = vmov 0.0  }
 0x6ec   : > { %v4151_v18 = vadd.f32 %v4150_v26, %v4024_v24  ;;  %v13438_v24 = vmov 0.0|0.0   ;;  %v13444_v26 = vld [vmem:[#allocation123_spill] sm:$0xff] }
 0x6ee   : > { %v4152_v56 = vadd.f32 %v4151_v18, %v4025_v48  ;;  %v13445_v48 = vld [vmem:[#allocation124_spill] sm:$0xff]  ;;  %v13446_v18 = vld [vmem:[#allocation127_spill] sm:$0xff] }
 0x6f0   : > { %v4153_v50 = vrot.slane %v4152_v56, 4 }
 0x6f2   : > { %v4154_v60 = vadd.f32 %v4153_v50, %v4152_v56  ;;  %v13439_v50 = vld [vmem:[#allocation112_spill] sm:$0xff] }
 0x6f3   : > { %v13447_v56 = vld [vmem:[#allocation128_spill] sm:$0xff] }
 0x6f4   : > { %v4155_v37 = vrot.slane %v4154_v60, 2 }
 0x6f6   : > { %v4156_v61 = vadd.f32 %v4155_v37, %v4154_v60  ;;  %v13441_v60 = vld [vmem:[#allocation116_spill] sm:$0xff]  ;;  %v13448_v37 = vld [vmem:[#allocation130_spill] sm:$0xff] }
 0x6f8   : > { %v4157_v52 = vrot.slane %v4156_v61, 1 }
 0x6fa   : > { %v4158_v22 = vadd.f32 %v4157_v52, %v4156_v61  ;;  %v13440_v52 = vld [vmem:[#allocation115_spill] sm:$0xff]  ;;  %v13449_v61 = vld [vmem:[#allocation132_spill] sm:$0xff] }
 0x6fc   : > { %v10888_v34 = vand.u32 4294901760, %v4158_v22 }
 0x6fe   : > { %v4241_v12 = vsub.f32 %v4158_v22, %v10888_v34  ;;  %v13442_v22 = vld [vmem:[#allocation119_spill] sm:$0xff] }
 0x700   : > { %v4242_v25 = vand.u32 4294901760, %v4241_v12 }
 0x702   : > { %v4243_v36 = vsub.f32 %v4241_v12, %v4242_v25 }
 0x704   : > { %v4244_v2 = vand.u32 4294901760, %v4243_v36  ;;  %v13450_v36 = vld [vmem:[#allocation134_spill] sm:$0xff] }
 0x706   : > { %7874 = vmatmul.mubr.f32.vlgmr.msra.gmra.mrb[4].mxu1 %v4244_v2  ;;  %v13443_v2 = vld [vmem:[#allocation120_spill] sm:$0xff] }
 0x707   : > { %8323 = vmatpush3.bf16.msra.mxu1 %v13436_v38  ;;  %7908 = vmatprep.mubr.msk.f32.mxu1 %vm8870_vm0, %v13437_v7  ;;  %v13451_v38 = vld [vmem:[#allocation136_spill] sm:$0xff] }
 0x708   : > { %8324 = vmatprep.subr.bf16.mxu1 %v13438_v24 }
 0x70b   : > { %8326 = vmatpush3.bf16.msra.mxu1 %v13439_v50  ;;  %v13452_v50 = vld [vmem:[#allocation138_spill] sm:$0xff] }
 0x70c   : > { %8327 = vmatprep.subr.bf16.mxu1 %v13438_v24 }
 0x70f   : > { %8329 = vmatpush3.bf16.msra.mxu1 %v13440_v52  ;;  %v13453_v52 = vld [vmem:[#allocation140_spill] sm:$0xff] }
 0x710   : > { %8330 = vmatprep.subr.bf16.mxu1 %v13438_v24 }
 0x713   : > { %8332 = vmatpush3.bf16.msra.mxu1 %v13441_v60  ;;  %v13454_v60 = vld [vmem:[#allocation94_spill] sm:$0xff] }
 0x714   : > { %8333 = vmatprep.subr.bf16.mxu1 %v13438_v24 }
 0x717   : > { %8335 = vmatpush3.bf16.msra.mxu1 %v13442_v22  ;;  %v13455_v22 = vld [vmem:[#allocation96_spill] sm:$0xff] }
 0x718   : > { %8336 = vmatprep.subr.bf16.mxu1 %v13438_v24 }
 0x71b   : > { %8338 = vmatpush3.bf16.msra.mxu1 %v13443_v2  ;;  %v13456_v2 = vld [vmem:[#allocation98_spill] sm:$0xff] }
 0x71c   : > { %8339 = vmatprep.subr.bf16.mxu1 %v13438_v24 }
 0x71f   : > { %8341 = vmatpush3.bf16.msra.mxu1 %v13444_v26  ;;  %v13457_v26 = vld [vmem:[#allocation100_spill] sm:$0xff] }
 0x720   : > { %8342 = vmatprep.subr.bf16.mxu1 %v13438_v24 }
 0x723   : > { %8344 = vmatpush3.bf16.msra.mxu1 %v13445_v48  ;;  %v13459_v48 = vld [vmem:[#allocation104_spill] sm:$0xff] }
 0x724   : > { %8345 = vmatprep.subr.bf16.mxu1 %v13438_v24 }
 0x726   : > { %7909 = vmatmul.mubr.f32.vlgmr.msra.gmra.mrb[4].mxu1 %v10888_v34 }
 0x727   : > { %8347 = vmatpush3.bf16.msra.mxu1 %v13446_v18  ;;  %7943 = vmatprep.mubr.msk.f32.mxu1 %vm8870_vm0, %v13437_v7  ;;  %v13460_v18 = vld [vmem:[#allocation106_spill] sm:$0xff] }
 0x728   : > { %8348 = vmatprep.subr.bf16.mxu1 %v13438_v24 }
 0x72b   : > { %8350 = vmatpush3.bf16.msra.mxu1 %v13447_v56  ;;  %v13461_v56 = vld [vmem:[#allocation108_spill] sm:$0xff] }
 0x72c   : > { %8351 = vmatprep.subr.bf16.mxu1 %v13438_v24 }
 0x72f   : > { %8353 = vmatpush3.bf16.msra.mxu1 %v13448_v37  ;;  %v13462_v37 = vld [vmem:[#allocation151_spill] sm:$0xff] }
 0x730   : > { %8354 = vmatprep.subr.bf16.mxu1 %v13438_v24 }
 0x733   : > { %8356 = vmatpush3.bf16.msra.mxu1 %v13449_v61  ;;  %v13463_v61 = vld [vmem:[#allocation152_spill] sm:$0xff] }
 0x734   : > { %8357 = vmatprep.subr.bf16.mxu1 %v13438_v24 }
 0x737   : > { %8359 = vmatpush3.bf16.msra.mxu1 %v13450_v36  ;;  %v13464_v36 = vld [vmem:[#allocation153_spill] sm:$0xff] }
 0x738   : > { %8360 = vmatprep.subr.bf16.mxu1 %v13438_v24 }
 0x73b   : > { %8362 = vmatpush3.bf16.msra.mxu1 %v13451_v38  ;;  %v13465_v38 = vld [vmem:[#allocation154_spill] sm:$0xff] }
 0x73c   : > { %8363 = vmatprep.subr.bf16.mxu1 %v13438_v24 }
 0x73f   : > { %8365 = vmatpush3.bf16.msra.mxu1 %v13452_v50  ;;  %v13467_v50 = vld [vmem:[#allocation156_spill] sm:$0xff] }
 0x740   : > { %8366 = vmatprep.subr.bf16.mxu1 %v13438_v24 }
 0x743   : > { %8368 = vmatpush3.bf16.msra.mxu1 %v13453_v52  ;;  %v13468_v52 = vld [vmem:[#allocation157_spill] sm:$0xff] }
 0x744   : > { %8369 = vmatprep.subr.bf16.mxu1 %v13438_v24 }
 0x746   : > { %7944 = vmatmul.mubr.f32.vlgmr.msra.gmra.mrb[4].mxu1 %v4241_v12  ;;  %v13458_v12 = vld [vmem:[#allocation102_spill] sm:$0xff] }
 0x747   : > { %8371 = vmatpush3.bf16.msra.mxu1 %v13454_v60  ;;  %7978 = vmatprep.mubr.msk.f32.mxu1 %vm8870_vm0, %v13437_v7 }
 0x748   : > { %8372 = vmatprep.subr.bf16.mxu1 %v13438_v24 }
 0x74b   : > { %8374 = vmatpush3.bf16.msra.mxu1 %v13455_v22 }
 0x74c   : > { %8375 = vmatprep.subr.bf16.mxu1 %v13438_v24 }
 0x74f   : > { %8377 = vmatpush3.bf16.msra.mxu1 %v13456_v2 }
 0x750   : > { %8378 = vmatprep.subr.bf16.mxu1 %v13438_v24 }
 0x753   : > { %8380 = vmatpush3.bf16.msra.mxu1 %v13457_v26 }
 0x754   : > { %8381 = vmatprep.subr.bf16.mxu1 %v13438_v24 }
 0x757   : > { %8383 = vmatpush3.bf16.msra.mxu1 %v13458_v12 }
 0x758   : > { %8384 = vmatprep.subr.bf16.mxu1 %v13438_v24 }
 0x75b   : > { %8386 = vmatpush3.bf16.msra.mxu1 %v13459_v48 }
 0x75c   : > { %8387 = vmatprep.subr.bf16.mxu1 %v13438_v24 }
 0x75f   : > { %8389 = vmatpush3.bf16.msra.mxu1 %v13460_v18 }
 0x760   : > { %8390 = vmatprep.subr.bf16.mxu1 %v13438_v24 }
 0x763   : > { %8392 = vmatpush3.bf16.msra.mxu1 %v13461_v56 }
 0x764   : > { %8393 = vmatprep.subr.bf16.mxu1 %v13438_v24 }
 0x766   : > { %7979 = vmatmul.mubr.f32.vlgmr.msra.gmra.mrb[4].mxu1 %v4242_v25  ;;  %v13466_v25 = vld [vmem:[#allocation155_spill] sm:$0xff] }
 0x767   : > { %8395 = vmatpush3.bf16.msra.mxu1 %v13462_v37  ;;  %8013 = vmatprep.mubr.msk.f32.mxu1 %vm8870_vm0, %v13437_v7  ;;  %v13469_v37 = vld [vmem:[#allocation158_spill] sm:$0xff] }
 0x768   : > { %8396 = vmatprep.subr.bf16.mxu1 %v13438_v24 }
 0x76b   : > { %8398 = vmatpush3.bf16.msra.mxu1 %v13463_v61 }
 0x76c   : > { %8399 = vmatprep.subr.bf16.mxu1 %v13438_v24 }
 0x76f   : > { %8401 = vmatpush3.bf16.msra.mxu1 %v13464_v36 }
 0x770   : > { %8402 = vmatprep.subr.bf16.mxu1 %v13438_v24 }
 0x773   : > { %8404 = vmatpush3.bf16.msra.mxu1 %v13465_v38 }
 0x774   : > { %8405 = vmatprep.subr.bf16.mxu1 %v13438_v24 }
 0x777   : > { %8407 = vmatpush3.bf16.msra.mxu1 %v13466_v25 }
 0x778   : > { %8408 = vmatprep.subr.bf16.mxu1 %v13438_v24 }
 0x77b   : > { %8410 = vmatpush3.bf16.msra.mxu1 %v13467_v50  ;;  %v13472_v50 = vld [vmem:[#allocation161_spill] sm:$0xff] }
 0x77c   : > { %8411 = vmatprep.subr.bf16.mxu1 %v13438_v24 }
 0x77f   : > { %8413 = vmatpush3.bf16.msra.mxu1 %v13468_v52  ;;  %v13473_v52 = vld [vmem:[#allocation162_spill] sm:$0xff] }
 0x780   : > { %8414 = vmatprep.subr.bf16.mxu1 %v13438_v24 }
 0x783   : > { %8416 = vmatpush3.bf16.msra.mxu1 %v13469_v37  ;;  %v13474_v37 = vld [vmem:[#allocation163_spill] sm:$0xff] }
 0x784   : > { %8417 = vmatprep.subr.bf16.mxu1 %v13438_v24 }
 0x786   : > { %8014 = vmatmul.mubr.f32.vlgmr.msra.gmra.mrb[4].mxu1 %v10888_v34 }
 0x787   : > { %8419 = vmatpush3.bf16.msra.mxu1 %v13454_v60  ;;  %8048 = vmatprep.mubr.msk.f32.mxu1 %vm8870_vm0, %v13437_v7  ;;  %v13470_v60 = vld [vmem:[#allocation159_spill] sm:$0xff] }
 0x788   : > { %8420 = vmatprep.subr.bf16.mxu1 %v13438_v24 }
 0x78b   : > { %8422 = vmatpush3.bf16.msra.mxu1 %v13455_v22  ;;  %v13471_v22 = vld [vmem:[#allocation160_spill] sm:$0xff] }
 0x78c   : > { %8423 = vmatprep.subr.bf16.mxu1 %v13438_v24 }
 0x78f   : > { %8425 = vmatpush3.bf16.msra.mxu1 %v13456_v2 }
 0x790   : > { %8426 = vmatprep.subr.bf16.mxu1 %v13438_v24 }
 0x793   : > { %8428 = vmatpush3.bf16.msra.mxu1 %v13457_v26 }
 0x794   : > { %8429 = vmatprep.subr.bf16.mxu1 %v13438_v24 }
 0x797   : > { %8431 = vmatpush3.bf16.msra.mxu1 %v13458_v12 }
 0x798   : > { %8432 = vmatprep.subr.bf16.mxu1 %v13438_v24 }
 0x79b   : > { %8434 = vmatpush3.bf16.msra.mxu1 %v13459_v48 }
 0x79c   : > { %8435 = vmatprep.subr.bf16.mxu1 %v13438_v24 }
 0x79f   : > { %8437 = vmatpush3.bf16.msra.mxu1 %v13460_v18 }
 0x7a0   : > { %8438 = vmatprep.subr.bf16.mxu1 %v13438_v24 }
 0x7a3   : > { %8440 = vmatpush3.bf16.msra.mxu1 %v13461_v56 }
 0x7a4   : > { %8441 = vmatprep.subr.bf16.mxu1 %v13438_v24 }
 0x7a6   : > { %8049 = vmatmul.mubr.f32.vlgmr.msra.gmra.mrb[4].mxu1 %v10888_v34 }
 0x7a7   : > { %8443 = vmatpush3.bf16.msra.mxu1 %v13470_v60  ;;  %8059 = vmatprep.mubr.msk.f32.mxu1 %vm8870_vm0, %v13437_v7 }
 0x7a8   : > { %8444 = vmatprep.subr.bf16.mxu1 %v13438_v24 }
 0x7ab   : > { %8446 = vmatpush3.bf16.msra.mxu1 %v13471_v22 }
 0x7ac   : > { %8447 = vmatprep.subr.bf16.mxu1 %v13438_v24 }
 0x879   : > { %v4796_v2 = vpop.f32.mrb[4].mxu1 }
 0x87a   : > { %v4800_v26 = vmul.f32 0.00048828125, %v4796_v2  ;;  %v8050_v12 = vpop.f32.mrb[5].mxu1  ;;  %v13475_v2 = vld [vmem:[#allocation164_spill] sm:$0xff] }
 0x87b   : > { %v13477_v12 = vld [vmem:[#allocation166_spill] sm:$0xff] }
 0x87c   : > { %v4801_v48 = vadd.f32 1e-05, %v4800_v26  ;;  %v13476_v26 = vld [vmem:[#allocation165_spill] sm:$0xff] }
 0x87e   : > { %8786 = vrsqrt.f32 %v4801_v48  ;;  %v5291_v48 = vld [vmem:[%s12568_s2] sm:$0x1] }
 0x888   : > { %v8787_v18 = vpop.eup %8786 }
 0x889   : > { %v4804_v56 = vsel %vm3277_vm1, %v8787_v18, 0 }
 0x88a   : > { %v4875_v34 = vand.u32 4294901760, %v4804_v56 }
 0x88c   : > { %v4876_v61 = vsub.f32 %v4804_v56, %v4875_v34 }
 0x88e   : > { %v4877_v36 = vand.u32 4294901760, %v4876_v61 }
 0x890   : > { %v4878_v38 = vsub.f32 %v4876_v61, %v4877_v36 }
 0x892   : > { %v4879_v25 = vand.u32 4294901760, %v4878_v38 }
 0x894   : > { %8060 = vmatmul.mubr.f32.vlgmr.msra.gmra.mrb[6].mxu1 %v4879_v25 }
 0x895   : > { %8449 = vmatpush3.bf16.msra.mxu1 %v13472_v50  ;;  %8070 = vmatprep.mubr.msk.f32.mxu1 %vm8870_vm0, %v13437_v7 }
 0x896   : > { %8450 = vmatprep.subr.bf16.mxu1 %v13438_v24 }
 0x899   : > { %8452 = vmatpush3.bf16.msra.mxu1 %v13473_v52 }
 0x89a   : > { %8453 = vmatprep.subr.bf16.mxu1 %v13438_v24 }
 0x89c   : > { %8071 = vmatmul.mubr.f32.vlgmr.msra.gmra.mrb[6].mxu1 %v4875_v34 }
 0x89d   : > { %8455 = vmatpush3.bf16.msra.mxu1 %v13474_v37  ;;  %8081 = vmatprep.mubr.msk.f32.mxu1 %vm8870_vm0, %v13437_v7 }
 0x89e   : > { %8456 = vmatprep.subr.bf16.mxu1 %v13438_v24 }
 0x8a1   : > { %8458 = vmatpush3.bf16.msra.mxu1 %v13475_v2 }
 0x8a2   : > { %8459 = vmatprep.subr.bf16.mxu1 %v13438_v24 }
 0x8a4   : > { %8082 = vmatmul.mubr.f32.vlgmr.msra.gmra.mrb[6].mxu1 %v4876_v61 }
 0x8a5   : > { %8461 = vmatpush3.bf16.msra.mxu1 %v13470_v60  ;;  %8092 = vmatprep.mubr.msk.f32.mxu1 %vm8870_vm0, %v13437_v7 }
 0x8a6   : > { %8462 = vmatprep.subr.bf16.mxu1 %v13438_v24 }
 0x8a9   : > { %8464 = vmatpush3.bf16.msra.mxu1 %v13471_v22 }
 0x8aa   : > { %8465 = vmatprep.subr.bf16.mxu1 %v13438_v24 }
 0x8ac   : > { %8093 = vmatmul.mubr.f32.vlgmr.msra.gmra.mrb[6].mxu1 %v4877_v36  ;;  %v13478_v36 = vld [vmem:[#allocation167_spill] sm:$0xff] }
 0x8ad   : > { %8467 = vmatpush3.bf16.msra.mxu1 %v13476_v26  ;;  %8103 = vmatprep.mubr.msk.f32.mxu1 %vm8870_vm0, %v13437_v7  ;;  %v13479_v38 = vsub.s32 0, %v13478_v36  ;;  %v13488_v36 = vld [vmem:[#allocation10_spill] sm:$0xff] }
 0x8ae   : > { %8468 = vmatprep.subr.bf16.mxu1 %v13438_v24 }
 0x8b1   : > { %8470 = vmatpush3.bf16.msra.mxu1 %v13477_v12 }
 0x8b2   : > { %8471 = vmatprep.subr.bf16.mxu1 %v13438_v24 }
 0x8b4   : > { %8104 = vmatmul.mubr.f32.vlgmr.msra.gmra.mrb[6].mxu1 %v4875_v34 }
 0x8b5   : > { %8473 = vmatpush3.bf16.msra.mxu1 %v13470_v60  ;;  %8114 = vmatprep.mubr.msk.f32.mxu1 %vm8870_vm0, %v13437_v7  ;;  %v13480_v60 = vld [vmem:[#allocation168_spill] sm:$0xff]  ;;  %v13481_v7 = vld [vmem:[#allocation169_spill] sm:$0xff] }
 0x8b6   : > { %8474 = vmatprep.subr.bf16.mxu1 %v13438_v24 }
 0x8b9   : > { %8476 = vmatpush3.bf16.msra.mxu1 %v13471_v22  ;;  %v13482_v22 = vld [vmem:[#allocation170_spill] sm:$0xff] }
 0x8bc   : > { %8115 = vmatmul.mubr.f32.vlgmr.msra.gmra.mrb[6].mxu1 %v4875_v34 }
 0x98f   : > { %v5287_v18 = vpop.f32.mrb[6].mxu1 }
 0x990   : > { %v5292_v56 = vmul.f32 %v5291_v48, %v5287_v18  ;;  %v8116_v61 = vpop.f32.mrb[7].mxu1  ;;  %v13483_v48 = vld [vmem:[#allocation6_spill] sm:$0xff]  ;;  %v13484_v18 = vld [vmem:[#allocation7_spill] sm:$0xff] }
 0x991   : > { %v13486_v61 = vld [vmem:[#allocation9_spill] sm:$0xff] }
 0x992   : > { %v11025_v25 = vrot.slane %v5292_v56, %v13479_v38  ;;  %v13485_v56 = vld [vmem:[#allocation8_spill] sm:$0xff]  ;;  %v13490_v38 = vld [vmem:[#allocation11_spill] sm:$0xff] }
 0x994   : > { %v11029_v50 = vmul.f32 %v11025_v25, %v13480_v60  ;;  %v11033_v24 = vmul.f32 %v11025_v25, %v13481_v7  ;;  %v11037_v34 = vmul.f32 %v11025_v25, %v13482_v22  ;;  %v11041_v52 = vmul.f32 %v11025_v25, %v10134_v40  ;;  %v13492_v7 = vld [vmem:[#allocation12_spill] sm:$0xff] }
 0x995   : > { %v11045_v37 = vmul.f32 %v11025_v25, %v10138_v55  ;;  %v11049_v2 = vmul.f32 %v11025_v25, %v10142_v8  ;;  %v11053_v26 = vmul.f32 %v11025_v25, %v10146_v11  ;;  %v11057_v12 = vmul.f32 %v11025_v25, %v10150_v15 }
 0x996   : > { %v11061_v40 = vmul.f32 %v11025_v25, %v10154_v19  ;;  %v11065_v55 = vmul.f32 %v11025_v25, %v10158_v23  ;;  %v11069_v8 = vmul.f32 %v11025_v25, %v10162_v32  ;;  %v11073_v11 = vmul.f32 %v11025_v25, %v10166_v30 }
 0x997   : > { %v11077_v15 = vmul.f32 %v11025_v25, %v10170_v33  ;;  %v11081_v19 = vmul.f32 %v11025_v25, %v10174_v62  ;;  %v11085_v23 = vmul.f32 %v11025_v25, %v10178_v14  ;;  %v11089_v32 = vmul.f32 %v11025_v25, %v10182_v54 }
 0x998   : > { %v11093_v30 = vmul.f32 %v11025_v25, %v10186_v47  ;;  %v11097_v33 = vmul.f32 %v11025_v25, %v10190_v9  ;;  %v11101_v62 = vmul.f32 %v11025_v25, %v10194_v10  ;;  %v11105_v14 = vmul.f32 %v11025_v25, %v10198_v45 }
 0x999   : > { %v11109_v54 = vmul.f32 %v11025_v25, %v10202_v27  ;;  %v11113_v47 = vmul.f32 %v11025_v25, %v10206_v44  ;;  %v11117_v9 = vmul.f32 %v11025_v25, %v10210_v43  ;;  %v11121_v10 = vmul.f32 %v11025_v25, %v10214_v35 }
 0x99a   : > { %v11125_v45 = vmul.f32 %v11025_v25, %v10218_v31  ;;  %v11129_v27 = vmul.f32 %v11025_v25, %v10222_v51  ;;  %v11133_v44 = vmul.f32 %v11025_v25, %v10226_v59  ;;  %v11137_v43 = vmul.f32 %v11025_v25, %v10230_v5 }
 0x99b   : > { %v11141_v35 = vmul.f32 %v11025_v25, %v10234_v53  ;;  %v11145_v31 = vmul.f32 %v11025_v25, %v10238_v28  ;;  %v11149_v51 = vmul.f32 %v11025_v25, %v10242_v3  ;;  %v11153_v59 = vmul.f32 %v11025_v25, %v10246_v46 }
 0x99c   : > { %v11157_v5 = vmul.f32 %v11025_v25, %v10250_v20  ;;  %v11161_v53 = vmul.f32 %v11025_v25, %v10254_v63  ;;  %v11165_v28 = vmul.f32 %v11025_v25, %v10258_v39  ;;  %v11169_v3 = vmul.f32 %v11025_v25, %v10262_v16 }
 0x99d   : > { %v11173_v46 = vmul.f32 %v11025_v25, %v10266_v1  ;;  %v11177_v20 = vmul.f32 %v11025_v25, %v10270_v4  ;;  %v11181_v63 = vmul.f32 %v11025_v25, %v10274_v57  ;;  %v11185_v39 = vmul.f32 %v11025_v25, %v10278_v49 }
 0x99e   : > { %v11189_v16 = vmul.f32 %v11025_v25, %v10282_v0  ;;  %v11193_v1 = vmul.f32 %v11025_v25, %v10286_v21  ;;  %v11197_v4 = vmul.f32 %v11025_v25, %v10290_v42  ;;  %v11201_v57 = vmul.f32 %v11025_v25, %v10294_v58 }
 0x99f   : > { %v11205_v49 = vmul.f32 %v11025_v25, %v10298_v13  ;;  %v11209_v0 = vmul.f32 %v11025_v25, %v13483_v48  ;;  %v11213_v21 = vmul.f32 %v11025_v25, %v13484_v18  ;;  %v11217_v42 = vmul.f32 %v11025_v25, %v13485_v56  ;;  %v13494_v48 = vld [vmem:[#allocation13_spill] sm:$0xff]  ;;  %v13496_v56 = vld [vmem:[#allocation14_spill] sm:$0xff] }
 0x9a0   : > { %v11221_v58 = vmul.f32 %v11025_v25, %v13486_v61  ;;  %v11225_v13 = vmul.f32 %v11025_v25, %v13488_v36  ;;  %v11229_v60 = vmul.f32 %v11025_v25, %v13490_v38  ;;  %v11233_v22 = vmul.f32 %v11025_v25, %v13492_v7 }
 0x9a1   : > { %v11237_v18 = vmul.f32 %v11025_v25, %v13494_v48  ;;  %v11241_v61 = vmul.f32 %v11025_v25, %v13496_v56 }
 0x9a2   : > { %13487 = vst [vmem:[#allocation88_spill] sm:$0xff] %v11221_v58  ;;  %13489 = vst [vmem:[#allocation89_spill] sm:$0xff] %v11225_v13  ;;  %v13498_v58 = vld [vmem:[#allocation15_spill] sm:$0xff]  ;;  %v13500_v13 = vld [vmem:[#allocation16_spill] sm:$0xff] }
 0x9a3   : > { %13491 = vst [vmem:[#allocation90_spill] sm:$0xff] %v11229_v60  ;;  %13493 = vst [vmem:[#allocation91_spill] sm:$0xff] %v11233_v22  ;;  %v11245_v36 = vmul.f32 %v11025_v25, %v13498_v58  ;;  %v11249_v38 = vmul.f32 %v11025_v25, %v13500_v13  ;;  %v13502_v60 = vld [vmem:[#allocation17_spill] sm:$0xff]  ;;  %v13504_v22 = vld [vmem:[#allocation18_spill] sm:$0xff] }
 0x9a4   : > { %13495 = vst [vmem:[#allocation92_spill] sm:$0xff] %v11237_v18  ;;  %13497 = vst [vmem:[#allocation93_spill] sm:$0xff] %v11241_v61  ;;  %v11253_v7 = vmul.f32 %v11025_v25, %v13502_v60  ;;  %v11257_v48 = vmul.f32 %v11025_v25, %v13504_v22  ;;  %v13506_v18 = vld [vmem:[#allocation19_spill] sm:$0xff]  ;;  %v13508_v61 = vld [vmem:[#allocation20_spill] sm:$0xff] }
 0x9a5   : > { %13499 = vst [vmem:[#allocation95_spill] sm:$0xff] %v11245_v36  ;;  %13501 = vst [vmem:[#allocation97_spill] sm:$0xff] %v11249_v38  ;;  %v11261_v56 = vmul.f32 %v11025_v25, %v13506_v18  ;;  %v11265_v58 = vmul.f32 %v11025_v25, %v13508_v61  ;;  %v13510_v36 = vld [vmem:[#allocation21_spill] sm:$0xff]  ;;  %v13512_v38 = vld [vmem:[#allocation22_spill] sm:$0xff] }
 0x9a6   : > { %13503 = vst [vmem:[#allocation99_spill] sm:$0xff] %v11253_v7  ;;  %13505 = vst [vmem:[#allocation101_spill] sm:$0xff] %v11257_v48  ;;  %v11269_v13 = vmul.f32 %v11025_v25, %v13510_v36  ;;  %v11273_v60 = vmul.f32 %v11025_v25, %v13512_v38  ;;  %v13514_v7 = vld [vmem:[#allocation23_spill] sm:$0xff]  ;;  %v13516_v48 = vld [vmem:[#allocation24_spill] sm:$0xff] }
 0x9a7   : > { %13507 = vst [vmem:[#allocation103_spill] sm:$0xff] %v11261_v56  ;;  %13509 = vst [vmem:[#allocation105_spill] sm:$0xff] %v11265_v58  ;;  %v11277_v22 = vmul.f32 %v11025_v25, %v13514_v7  ;;  %v11281_v18 = vmul.f32 %v11025_v25, %v13516_v48  ;;  %v13518_v56 = vld [vmem:[#allocation25_spill] sm:$0xff]  ;;  %v13520_v58 = vld [vmem:[#allocation26_spill] sm:$0xff] }
 0x9a8   : > { %13511 = vst [vmem:[#allocation107_spill] sm:$0xff] %v11269_v13  ;;  %13513 = vst [vmem:[#allocation109_spill] sm:$0xff] %v11273_v60  ;;  %v11285_v61 = vmul.f32 %v11025_v25, %v13518_v56  ;;  %v11289_v36 = vmul.f32 %v11025_v25, %v13520_v58  ;;  %v13522_v13 = vld [vmem:[#allocation27_spill] sm:$0xff]  ;;  %v13524_v60 = vld [vmem:[#allocation28_spill] sm:$0xff] }
 0x9a9   : > { %13515 = vst [vmem:[#allocation110_spill] sm:$0xff] %v11277_v22  ;;  %13517 = vst [vmem:[#allocation113_spill] sm:$0xff] %v11281_v18  ;;  %v11293_v38 = vmul.f32 %v11025_v25, %v13522_v13  ;;  %v11297_v7 = vmul.f32 %v11025_v25, %v13524_v60  ;;  %v13526_v22 = vld [vmem:[#allocation29_spill] sm:$0xff]  ;;  %v13528_v18 = vld [vmem:[#allocation30_spill] sm:$0xff] }
 0x9aa   : > { %13519 = vst [vmem:[#allocation114_spill] sm:$0xff] %v11285_v61  ;;  %13521 = vst [vmem:[#allocation117_spill] sm:$0xff] %v11289_v36  ;;  %v11301_v48 = vmul.f32 %v11025_v25, %v13526_v22  ;;  %v11305_v56 = vmul.f32 %v11025_v25, %v13528_v18  ;;  %v13530_v61 = vld [vmem:[#allocation31_spill] sm:$0xff]  ;;  %v13532_v36 = vld [vmem:[#allocation32_spill] sm:$0xff] }
 0x9ab   : > { %13523 = vst [vmem:[#allocation118_spill] sm:$0xff] %v11293_v38  ;;  %13525 = vst [vmem:[#allocation121_spill] sm:$0xff] %v11297_v7  ;;  %v11309_v58 = vmul.f32 %v11025_v25, %v13530_v61  ;;  %v11313_v13 = vmul.f32 %v11025_v25, %v13532_v36  ;;  %v13534_v38 = vld [vmem:[#allocation33_spill] sm:$0xff]  ;;  %v13536_v7 = vld [vmem:[#allocation34_spill] sm:$0xff] }
 0x9ac   : > { %13527 = vst [vmem:[#allocation122_spill] sm:$0xff] %v11301_v48  ;;  %13529 = vst [vmem:[#allocation125_spill] sm:$0xff] %v11305_v56  ;;  %v11317_v60 = vmul.f32 %v11025_v25, %v13534_v38  ;;  %v11321_v22 = vmul.f32 %v11025_v25, %v13536_v7  ;;  %v13538_v48 = vld [vmem:[#allocation35_spill] sm:$0xff]  ;;  %v13540_v56 = vld [vmem:[#allocation36_spill] sm:$0xff] }
 0x9ad   : > { %13531 = vst [vmem:[#allocation126_spill] sm:$0xff] %v11309_v58  ;;  %13533 = vst [vmem:[#allocation129_spill] sm:$0xff] %v11313_v13  ;;  %v11325_v18 = vmul.f32 %v11025_v25, %v13538_v48  ;;  %v11329_v61 = vmul.f32 %v11025_v25, %v13540_v56  ;;  %v13542_v58 = vld [vmem:[#allocation37_spill] sm:$0xff]  ;;  %v13544_v13 = vld [vmem:[#allocation38_spill] sm:$0xff] }
 0x9ae   : > { %13535 = vst [vmem:[#allocation131_spill] sm:$0xff] %v11317_v60  ;;  %13537 = vst [vmem:[#allocation133_spill] sm:$0xff] %v11321_v22  ;;  %v11333_v36 = vmul.f32 %v11025_v25, %v13542_v58  ;;  %v11337_v38 = vmul.f32 %v11025_v25, %v13544_v13  ;;  %v13546_v60 = vld [vmem:[#allocation39_spill] sm:$0xff]  ;;  %v13548_v22 = vld [vmem:[#allocation40_spill] sm:$0xff] }
 0x9af   : > { %13539 = vst [vmem:[#allocation135_spill] sm:$0xff] %v11325_v18  ;;  %13541 = vst [vmem:[#allocation137_spill] sm:$0xff] %v11329_v61  ;;  %v11341_v7 = vmul.f32 %v11025_v25, %v13546_v60  ;;  %v11345_v48 = vmul.f32 %v11025_v25, %v13548_v22  ;;  %v13550_v18 = vld [vmem:[#allocation41_spill] sm:$0xff]  ;;  %v13552_v61 = vld [vmem:[#allocation42_spill] sm:$0xff] }
 0x9b0   : > { %13543 = vst [vmem:[#allocation139_spill] sm:$0xff] %v11333_v36  ;;  %13545 = vst [vmem:[#allocation141_spill] sm:$0xff] %v11337_v38  ;;  %v11349_v56 = vmul.f32 %v11025_v25, %v13550_v18  ;;  %v11353_v58 = vmul.f32 %v11025_v25, %v13552_v61  ;;  %v13554_v36 = vld [vmem:[#allocation43_spill] sm:$0xff]  ;;  %v13556_v38 = vld [vmem:[#allocation44_spill] sm:$0xff] }
 0x9b1   : > { %13547 = vst [vmem:[#allocation142_spill] sm:$0xff] %v11341_v7  ;;  %13549 = vst [vmem:[#allocation143_spill] sm:$0xff] %v11345_v48  ;;  %v11357_v13 = vmul.f32 %v11025_v25, %v13554_v36  ;;  %v11361_v60 = vmul.f32 %v11025_v25, %v13556_v38  ;;  %v13558_v7 = vld [vmem:[#allocation45_spill] sm:$0xff]  ;;  %v13560_v48 = vld [vmem:[#allocation46_spill] sm:$0xff] }
 0x9b2   : > { %13551 = vst [vmem:[#allocation144_spill] sm:$0xff] %v11349_v56  ;;  %13553 = vst [vmem:[#allocation145_spill] sm:$0xff] %v11353_v58  ;;  %v11365_v22 = vmul.f32 %v11025_v25, %v13558_v7  ;;  %v11369_v18 = vmul.f32 %v11025_v25, %v13560_v48  ;;  %v13562_v56 = vld [vmem:[#allocation47_spill] sm:$0xff]  ;;  %v13564_v58 = vld [vmem:[#allocation48_spill] sm:$0xff] }
 0x9b3   : > { %13555 = vst [vmem:[#allocation146_spill] sm:$0xff] %v11357_v13  ;;  %13557 = vst [vmem:[#allocation147_spill] sm:$0xff] %v11361_v60  ;;  %v11373_v61 = vmul.f32 %v11025_v25, %v13562_v56  ;;  %v11377_v36 = vmul.f32 %v11025_v25, %v13564_v58  ;;  %v13566_v13 = vld [vmem:[#allocation49_spill] sm:$0xff]  ;;  %v13568_v60 = vld [vmem:[#allocation50_spill] sm:$0xff] }
 0x9b4   : > { %13559 = vst [vmem:[#allocation148_spill] sm:$0xff] %v11365_v22  ;;  %13561 = vst [vmem:[#allocation149_spill] sm:$0xff] %v11369_v18  ;;  %v11381_v38 = vmul.f32 %v11025_v25, %v13566_v13  ;;  %v11385_v7 = vmul.f32 %v11025_v25, %v13568_v60  ;;  %v13570_v22 = vld [vmem:[#allocation51_spill] sm:$0xff]  ;;  %v13572_v18 = vld [vmem:[#allocation52_spill] sm:$0xff] }
 0x9b5   : > { %13563 = vst [vmem:[#allocation150_spill] sm:$0xff] %v11373_v61  ;;  %13565 = vst [vmem:[#allocation76_spill] sm:$0xff] %v11377_v36  ;;  %v11389_v48 = vmul.f32 %v11025_v25, %v13570_v22  ;;  %v11393_v56 = vmul.f32 %v11025_v25, %v13572_v18  ;;  %v13574_v61 = vld [vmem:[#allocation53_spill] sm:$0xff]  ;;  %v13576_v36 = vld [vmem:[#allocation54_spill] sm:$0xff] }
 0x9b6   : > { %13567 = vst [vmem:[#allocation77_spill] sm:$0xff] %v11381_v38  ;;  %13569 = vst [vmem:[#allocation87_spill] sm:$0xff] %v11385_v7  ;;  %v11397_v58 = vmul.f32 %v11025_v25, %v13574_v61  ;;  %v11401_v13 = vmul.f32 %v11025_v25, %v13576_v36  ;;  %v13578_v38 = vld [vmem:[#allocation55_spill] sm:$0xff]  ;;  %v13580_v7 = vld [vmem:[#allocation56_spill] sm:$0xff] }
 0x9b7   : > { %13571 = vst [vmem:[#allocation111_spill] sm:$0xff] %v11389_v48  ;;  %13573 = vst [vmem:[#allocation112_spill] sm:$0xff] %v11393_v56  ;;  %v11405_v60 = vmul.f32 %v11025_v25, %v13578_v38  ;;  %v11409_v22 = vmul.f32 %v11025_v25, %v13580_v7  ;;  %v13582_v48 = vld [vmem:[#allocation57_spill] sm:$0xff]  ;;  %v13584_v56 = vld [vmem:[#allocation58_spill] sm:$0xff] }
 0x9b8   : > { %13575 = vst [vmem:[#allocation115_spill] sm:$0xff] %v11397_v58  ;;  %13577 = vst [vmem:[#allocation116_spill] sm:$0xff] %v11401_v13  ;;  %v11413_v18 = vmul.f32 %v11025_v25, %v13582_v48  ;;  %v11417_v61 = vmul.f32 %v11025_v25, %v13584_v56  ;;  %v13586_v58 = vld [vmem:[#allocation59_spill] sm:$0xff]  ;;  %v13588_v13 = vld [vmem:[#allocation60_spill] sm:$0xff] }
 0x9b9   : > { %13579 = vst [vmem:[#allocation119_spill] sm:$0xff] %v11405_v60  ;;  %13581 = vst [vmem:[#allocation120_spill] sm:$0xff] %v11409_v22  ;;  %v11421_v36 = vmul.f32 %v11025_v25, %v13586_v58  ;;  %v11425_v38 = vmul.f32 %v11025_v25, %v13588_v13  ;;  %v13590_v60 = vld [vmem:[#allocation61_spill] sm:$0xff]  ;;  %v13592_v22 = vld [vmem:[#allocation62_spill] sm:$0xff] }
 0x9ba   : > { %13583 = vst [vmem:[#allocation123_spill] sm:$0xff] %v11413_v18  ;;  %13585 = vst [vmem:[#allocation124_spill] sm:$0xff] %v11417_v61  ;;  %v11429_v7 = vmul.f32 %v11025_v25, %v13590_v60  ;;  %v11433_v48 = vmul.f32 %v11025_v25, %v13592_v22  ;;  %v13594_v18 = vld [vmem:[#allocation63_spill] sm:$0xff]  ;;  %v13596_v61 = vld [vmem:[#allocation64_spill] sm:$0xff] }
 0x9bb   : > { %13587 = vst [vmem:[#allocation127_spill] sm:$0xff] %v11421_v36  ;;  %13589 = vst [vmem:[#allocation128_spill] sm:$0xff] %v11425_v38  ;;  %v11437_v56 = vmul.f32 %v11025_v25, %v13594_v18  ;;  %v11441_v58 = vmul.f32 %v11025_v25, %v13596_v61  ;;  %v13598_v36 = vld [vmem:[#allocation65_spill] sm:$0xff]  ;;  %v13600_v38 = vld [vmem:[#allocation66_spill] sm:$0xff] }
 0x9bc   : > { %13591 = vst [vmem:[#allocation130_spill] sm:$0xff] %v11429_v7  ;;  %13593 = vst [vmem:[#allocation132_spill] sm:$0xff] %v11433_v48  ;;  %v11445_v13 = vmul.f32 %v11025_v25, %v13598_v36  ;;  %v11449_v60 = vmul.f32 %v11025_v25, %v13600_v38  ;;  %v13602_v7 = vld [vmem:[#allocation67_spill] sm:$0xff]  ;;  %v13604_v48 = vld [vmem:[#allocation68_spill] sm:$0xff] }
 0x9bd   : > { %13595 = vst [vmem:[#allocation134_spill] sm:$0xff] %v11437_v56  ;;  %13597 = vst [vmem:[#allocation136_spill] sm:$0xff] %v11441_v58  ;;  %v11453_v22 = vmul.f32 %v11025_v25, %v13602_v7  ;;  %v11457_v18 = vmul.f32 %v11025_v25, %v13604_v48  ;;  %v13606_v56 = vld [vmem:[#allocation69_spill] sm:$0xff]  ;;  %v13608_v58 = vld [vmem:[#allocation70_spill] sm:$0xff] }
 0x9be   : > { %13599 = vst [vmem:[#allocation138_spill] sm:$0xff] %v11445_v13  ;;  %13601 = vst [vmem:[#allocation140_spill] sm:$0xff] %v11449_v60  ;;  %v11461_v61 = vmul.f32 %v11025_v25, %v13606_v56  ;;  %v11465_v36 = vmul.f32 %v11025_v25, %v13608_v58  ;;  %v13609_v13 = vld [vmem:[#allocation71_spill] sm:$0xff]  ;;  %v13611_v60 = vld [vmem:[#allocation72_spill] sm:$0xff] }
 0x9bf   : > { %13603 = vst [vmem:[#allocation94_spill] sm:$0xff] %v11453_v22  ;;  %13605 = vst [vmem:[#allocation96_spill] sm:$0xff] %v11457_v18  ;;  %v11469_v38 = vmul.f32 %v11025_v25, %v13609_v13  ;;  %v11473_v7 = vmul.f32 %v11025_v25, %v13611_v60  ;;  %v13613_v22 = vld [vmem:[#allocation73_spill] sm:$0xff]  ;;  %v13615_v18 = vld [vmem:[#allocation74_spill] sm:$0xff]  ;;  %v11489_v13 = vmul.f32 %v11025_v25, %v13427_v17 }
 0x9c0   : > { %13607 = vst [vmem:[#allocation98_spill] sm:$0xff] %v11461_v61  ;;  %v11477_v48 = vmul.f32 %v11025_v25, %v13613_v22  ;;  %v11481_v56 = vmul.f32 %v11025_v25, %v13615_v18  ;;  %v13617_v61 = vld [vmem:[#allocation75_spill] sm:$0xff]  ;;  %v11494_v60 = vld [vmem:[%s12569_s3] ss:$0 sm:$0xff]  ;;  %v11498_v22 = vmul.f32 %v11025_v25, %v13428_v41 }
 0x9c1   : > { %13610 = vst [vmem:[#allocation100_spill] sm:$0xff] %v11469_v38  ;;  %13612 = vst [vmem:[#allocation102_spill] sm:$0xff] %v11473_v7  ;;  %v11485_v58 = vmul.f32 %v11025_v25, %v13617_v61  ;;  %v13628_v38 = vld [vmem:[#allocation82_spill] sm:$0xff] }
 0x9c2   : > { %13614 = vst [vmem:[#allocation104_spill] sm:$0xff] %v11477_v48  ;;  %13616 = vst [vmem:[#allocation106_spill] sm:$0xff] %v11481_v56  ;;  %v13621_v48 = vld [vmem:[#allocation78_spill] sm:$0xff]  ;;  %v13623_v56 = vld [vmem:[#allocation79_spill] sm:$0xff]  ;;  %v11518_v41 = vmul.f32 %v11025_v25, %v13628_v38  ;;  %v11538_v38 = vmul.f32 %v11025_v25, %v13435_v6  ;;  %v11558_v6 = vadd.f32 %v11494_v60, %v11041_v52 }
 0x9c3   : > { %13618 = vst [vmem:[#allocation108_spill] sm:$0xff] %v11485_v58  ;;  %13619 = vst [vmem:[#allocation151_spill] sm:$0xff] %v11489_v13  ;;  %v11502_v18 = vmul.f32 %v11025_v25, %v13621_v48  ;;  %v11506_v61 = vmul.f32 %v11025_v25, %v13623_v56  ;;  %v13625_v58 = vld [vmem:[#allocation80_spill] sm:$0xff]  ;;  %v13627_v13 = vld [vmem:[#allocation81_spill] sm:$0xff]  ;;  %v11582_v52 = vadd.f32 %v11494_v60, %v11065_v55 }
 0x9c4   : > { %13620 = vst [vmem:[#allocation152_spill] sm:$0xff] %v11498_v22  ;;  %v11510_v17 = vmul.f32 %v11025_v25, %v13625_v58  ;;  %v11514_v7 = vmul.f32 %v11025_v25, %v13627_v13  ;;  %v13629_v22 = vld [vmem:[#allocation83_spill] sm:$0xff]  ;;  %v11606_v55 = vadd.f32 %v11494_v60, %v11089_v32  ;;  %v11630_v32 = vadd.f32 %v11494_v60, %v11113_v47 }
 0x9c5   : > { %13622 = vst [vmem:[#allocation153_spill] sm:$0xff] %v11502_v18  ;;  %13624 = vst [vmem:[#allocation154_spill] sm:$0xff] %v11506_v61  ;;  %v11522_v48 = vmul.f32 %v11025_v25, %v13629_v22  ;;  %v13630_v18 = vld [vmem:[#allocation84_spill] sm:$0xff]  ;;  %v13631_v61 = vld [vmem:[#allocation85_spill] sm:$0xff]  ;;  %v11542_v22 = vmul.f32 %v11025_v25, %v10630_v29  ;;  %v11562_v29 = vadd.f32 %v11494_v60, %v11045_v37 }
 0x9c6   : > { %13626 = vst [vmem:[#allocation155_spill] sm:$0xff] %v11510_v17  ;;  %v11526_v56 = vmul.f32 %v11025_v25, %v13630_v18  ;;  %v11530_v58 = vmul.f32 %v11025_v25, %v13631_v61  ;;  %v13632_v17 = vld [vmem:[#allocation86_spill] sm:$0xff]  ;;  %v11546_v18 = vadd.f32 %v11494_v60, %v11029_v50  ;;  %v11550_v61 = vadd.f32 %v11494_v60, %v11033_v24 }
 0x9c7   : > { %v11534_v13 = vmul.f32 %v11025_v25, %v13632_v17  ;;  %v11554_v17 = vadd.f32 %v11494_v60, %v11037_v34  ;;  %v11566_v25 = vadd.f32 %v11494_v60, %v11049_v2  ;;  %v11570_v50 = vadd.f32 %v11494_v60, %v11053_v26 }
 0x9c8   : > { %v11574_v24 = vadd.f32 %v11494_v60, %v11057_v12  ;;  %v11578_v34 = vadd.f32 %v11494_v60, %v11061_v40  ;;  %v11586_v37 = vadd.f32 %v11494_v60, %v11069_v8  ;;  %v11590_v2 = vadd.f32 %v11494_v60, %v11073_v11 }
 0x9c9   : > { %v11594_v26 = vadd.f32 %v11494_v60, %v11077_v15  ;;  %v11598_v12 = vadd.f32 %v11494_v60, %v11081_v19  ;;  %v11602_v40 = vadd.f32 %v11494_v60, %v11085_v23  ;;  %v11610_v8 = vadd.f32 %v11494_v60, %v11093_v30 }
 0x9ca   : > { %v11614_v11 = vadd.f32 %v11494_v60, %v11097_v33  ;;  %v11618_v15 = vadd.f32 %v11494_v60, %v11101_v62  ;;  %v11622_v19 = vadd.f32 %v11494_v60, %v11105_v14  ;;  %v11626_v23 = vadd.f32 %v11494_v60, %v11109_v54 }
 0x9cb   : > { %v11634_v30 = vadd.f32 %v11494_v60, %v11117_v9  ;;  %v11638_v33 = vadd.f32 %v11494_v60, %v11121_v10  ;;  %v11642_v62 = vadd.f32 %v11494_v60, %v11125_v45  ;;  %v11646_v14 = vadd.f32 %v11494_v60, %v11129_v27 }
 0x9cc   : > { %v11650_v54 = vadd.f32 %v11494_v60, %v11133_v44  ;;  %v11654_v47 = vadd.f32 %v11494_v60, %v11137_v43  ;;  %v11658_v9 = vadd.f32 %v11494_v60, %v11141_v35  ;;  %v11662_v10 = vadd.f32 %v11494_v60, %v11145_v31 }
 0x9cd   : > { %v11666_v45 = vadd.f32 %v11494_v60, %v11149_v51  ;;  %v11670_v27 = vadd.f32 %v11494_v60, %v11153_v59  ;;  %v11674_v44 = vadd.f32 %v11494_v60, %v11157_v5  ;;  %v11678_v43 = vadd.f32 %v11494_v60, %v11161_v53 }
 0x9ce   : > { %v11682_v35 = vadd.f32 %v11494_v60, %v11165_v28  ;;  %v11686_v31 = vadd.f32 %v11494_v60, %v11169_v3  ;;  %v11690_v51 = vadd.f32 %v11494_v60, %v11173_v46  ;;  %v11694_v59 = vadd.f32 %v11494_v60, %v11177_v20 }
 0x9cf   : > { %13633 = vst [vmem:[#allocation156_spill] sm:$0xff] %v11678_v43  ;;  %v11698_v5 = vadd.f32 %v11494_v60, %v11181_v63  ;;  %v11702_v53 = vadd.f32 %v11494_v60, %v11185_v39  ;;  %v11706_v28 = vadd.f32 %v11494_v60, %v11189_v16  ;;  %v11710_v3 = vadd.f32 %v11494_v60, %v11193_v1 }
 0x9d0   : > { %13634 = vst [vmem:[#allocation157_spill] sm:$0xff] %v11682_v35  ;;  %13635 = vst [vmem:[#allocation158_spill] sm:$0xff] %v11686_v31  ;;  %v11714_v46 = vadd.f32 %v11494_v60, %v11197_v4  ;;  %v11718_v20 = vadd.f32 %v11494_v60, %v11201_v57  ;;  %v11722_v63 = vadd.f32 %v11494_v60, %v11205_v49  ;;  %v13648_v4 = vld [vmem:[#allocation88_spill] sm:$0xff]  ;;  %v13868_v31 = vmax.f32 %v11546_v18, 0.0 }
 0x9d1   : > { %13636 = vst [vmem:[#allocation159_spill] sm:$0xff] %v11690_v51  ;;  %13637 = vst [vmem:[#allocation160_spill] sm:$0xff] %v11694_v59  ;;  %v11726_v39 = vadd.f32 %v11494_v60, %v11209_v0  ;;  %v11730_v16 = vadd.f32 %v11494_v60, %v11213_v21  ;;  %v11734_v1 = vadd.f32 %v11494_v60, %v11217_v42  ;;  %v13869_v59 = vmax.f32 %v11550_v61, 0.0 }
 0x9d2   : > { %13638 = vst [vmem:[#allocation161_spill] sm:$0xff] %v11698_v5  ;;  %13639 = vst [vmem:[#allocation162_spill] sm:$0xff] %v11702_v53  ;;  %v11738_v57 = vadd.f32 %v11494_v60, %v13648_v4  ;;  %v13870_v5 = vmax.f32 %v11554_v17, 0.0  ;;  %v13871_v51 = vmax.f32 %v11558_v6, 0.0  ;;  %v13874_v43 = vmax.f32 %v11570_v50, 0.0 }
 0x9d3   : > { %13640 = vst [vmem:[#allocation163_spill] sm:$0xff] %v11706_v28  ;;  %13641 = vst [vmem:[#allocation164_spill] sm:$0xff] %v11710_v3  ;;  %v13876_v18 = vmax.f32 %v11578_v34, 0.0  ;;  %v13877_v61 = vmax.f32 %v11582_v52, 0.0  ;;  %v13878_v17 = vmax.f32 %v11586_v37, 0.0  ;;  %v13879_v6 = vmax.f32 %v11590_v2, 0.0 }
 0x9d4   : > { %13642 = vst [vmem:[#allocation165_spill] sm:$0xff] %v11714_v46  ;;  %13643 = vst [vmem:[#allocation166_spill] sm:$0xff] %v11718_v20  ;;  %v13650_v20 = vld [vmem:[#allocation89_spill] sm:$0xff]  ;;  %v6926_v28 = vpack.c.bf16 %v13871_v51, %v13870_v5  ;;  %v13882_v50 = vmax.f32 %v11602_v40, 0.0  ;;  %v13884_v34 = vmax.f32 %v11610_v8, 0.0  ;;  %v13885_v52 = vmax.f32 %v11614_v11, 0.0 }
 0x9d5   : > { %13644 = vst [vmem:[#allocation167_spill] sm:$0xff] %v11722_v63  ;;  %13645 = vst [vmem:[#allocation168_spill] sm:$0xff] %v11726_v39  ;;  %v11742_v49 = vadd.f32 %v11494_v60, %v13650_v20  ;;  %v13652_v63 = vld [vmem:[#allocation90_spill] sm:$0xff]  ;;  %v13654_v39 = vld [vmem:[#allocation91_spill] sm:$0xff]  ;;  %v6946_v51 = vpack.c.bf16 %v13879_v6, %v13878_v17  ;;  %v13886_v2 = vmax.f32 %v11618_v15, 0.0  ;;  %v13888_v40 = vmax.f32 %v11626_v23, 0.0 }
 0x9d6   : > { %13646 = vst [vmem:[#allocation169_spill] sm:$0xff] %v11730_v16  ;;  %13647 = vst [vmem:[#allocation170_spill] sm:$0xff] %v11734_v1  ;;  %v11746_v0 = vadd.f32 %v11494_v60, %v13652_v63  ;;  %v11750_v21 = vadd.f32 %v11494_v60, %v13654_v39  ;;  %v13656_v16 = vld [vmem:[#allocation92_spill] sm:$0xff]  ;;  %v13658_v1 = vld [vmem:[#allocation93_spill] sm:$0xff]  ;;  %v6961_v37 = vpack.c.bf16 %v13885_v52, %v13884_v34  ;;  %v13892_v8 = vmax.f32 %v11642_v62, 0.0 }
 0x9d7   : > { %13649 = vst [vmem:[#allocation6_spill] sm:$0xff] %v11738_v57  ;;  %13651 = vst [vmem:[#allocation7_spill] sm:$0xff] %v11742_v49  ;;  %v11754_v42 = vadd.f32 %v11494_v60, %v13656_v16  ;;  %v11758_v4 = vadd.f32 %v11494_v60, %v13658_v1  ;;  %v13660_v57 = vld [vmem:[#allocation95_spill] sm:$0xff]  ;;  %v13662_v49 = vld [vmem:[#allocation97_spill] sm:$0xff]  ;;  %v13893_v11 = vmax.f32 %v11646_v14, 0.0  ;;  %v13895_v23 = vmax.f32 %v11654_v47, 0.0 }
 0x9d8   : > { %13653 = vst [vmem:[#allocation8_spill] sm:$0xff] %v11746_v0  ;;  %13655 = vst [vmem:[#allocation9_spill] sm:$0xff] %v11750_v21  ;;  %v11762_v20 = vadd.f32 %v11494_v60, %v13660_v57  ;;  %v11766_v63 = vadd.f32 %v11494_v60, %v13662_v49  ;;  %v13664_v0 = vld [vmem:[#allocation99_spill] sm:$0xff]  ;;  %v13666_v21 = vld [vmem:[#allocation101_spill] sm:$0xff]  ;;  %v13900_v62 = vmax.f32 %v11674_v44, 0.0 }
 0x9d9   : > { %13657 = vst [vmem:[#allocation10_spill] sm:$0xff] %v11754_v42  ;;  %13659 = vst [vmem:[#allocation11_spill] sm:$0xff] %v11758_v4  ;;  %v11770_v39 = vadd.f32 %v11494_v60, %v13664_v0  ;;  %v11774_v16 = vadd.f32 %v11494_v60, %v13666_v21  ;;  %v13668_v42 = vld [vmem:[#allocation103_spill] sm:$0xff]  ;;  %v13670_v4 = vld [vmem:[#allocation105_spill] sm:$0xff]  ;;  %v6981_v15 = vpack.c.bf16 %v13893_v11, %v13892_v8 }
 0x9da   : > { %13661 = vst [vmem:[#allocation12_spill] sm:$0xff] %v11762_v20  ;;  %13663 = vst [vmem:[#allocation13_spill] sm:$0xff] %v11766_v63  ;;  %v11778_v1 = vadd.f32 %v11494_v60, %v13668_v42  ;;  %v11782_v57 = vadd.f32 %v11494_v60, %v13670_v4  ;;  %v13672_v20 = vld [vmem:[#allocation107_spill] sm:$0xff]  ;;  %v13674_v63 = vld [vmem:[#allocation109_spill] sm:$0xff] }
 0x9db   : > { %13665 = vst [vmem:[#allocation14_spill] sm:$0xff] %v11770_v39  ;;  %13667 = vst [vmem:[#allocation15_spill] sm:$0xff] %v11774_v16  ;;  %v11786_v49 = vadd.f32 %v11494_v60, %v13672_v20  ;;  %v11790_v0 = vadd.f32 %v11494_v60, %v13674_v63  ;;  %v13676_v39 = vld [vmem:[#allocation110_spill] sm:$0xff]  ;;  %v13678_v16 = vld [vmem:[#allocation113_spill] sm:$0xff] }
 0x9dc   : > { %13669 = vst [vmem:[#allocation16_spill] sm:$0xff] %v11778_v1  ;;  %13671 = vst [vmem:[#allocation17_spill] sm:$0xff] %v11782_v57  ;;  %v11794_v21 = vadd.f32 %v11494_v60, %v13676_v39  ;;  %v11798_v42 = vadd.f32 %v11494_v60, %v13678_v16  ;;  %v13680_v1 = vld [vmem:[#allocation114_spill] sm:$0xff]  ;;  %v13682_v57 = vld [vmem:[#allocation117_spill] sm:$0xff] }
 0x9dd   : > { %13673 = vst [vmem:[#allocation18_spill] sm:$0xff] %v11786_v49  ;;  %13675 = vst [vmem:[#allocation19_spill] sm:$0xff] %v11790_v0  ;;  %v11802_v4 = vadd.f32 %v11494_v60, %v13680_v1  ;;  %v11806_v20 = vadd.f32 %v11494_v60, %v13682_v57  ;;  %v13684_v49 = vld [vmem:[#allocation118_spill] sm:$0xff]  ;;  %v13686_v0 = vld [vmem:[#allocation121_spill] sm:$0xff] }
 0x9de   : > { %13677 = vst [vmem:[#allocation20_spill] sm:$0xff] %v11794_v21  ;;  %13679 = vst [vmem:[#allocation21_spill] sm:$0xff] %v11798_v42  ;;  %v11810_v63 = vadd.f32 %v11494_v60, %v13684_v49  ;;  %v11814_v39 = vadd.f32 %v11494_v60, %v13686_v0  ;;  %v13688_v21 = vld [vmem:[#allocation122_spill] sm:$0xff]  ;;  %v13690_v42 = vld [vmem:[#allocation125_spill] sm:$0xff] }
 0x9df   : > { %13681 = vst [vmem:[#allocation22_spill] sm:$0xff] %v11802_v4  ;;  %13683 = vst [vmem:[#allocation23_spill] sm:$0xff] %v11806_v20  ;;  %v11818_v16 = vadd.f32 %v11494_v60, %v13688_v21  ;;  %v11822_v1 = vadd.f32 %v11494_v60, %v13690_v42  ;;  %v13692_v4 = vld [vmem:[#allocation126_spill] sm:$0xff]  ;;  %v13694_v20 = vld [vmem:[#allocation129_spill] sm:$0xff] }
 0x9e0   : > { %13685 = vst [vmem:[#allocation24_spill] sm:$0xff] %v11810_v63  ;;  %13687 = vst [vmem:[#allocation25_spill] sm:$0xff] %v11814_v39  ;;  %v11826_v57 = vadd.f32 %v11494_v60, %v13692_v4  ;;  %v11830_v49 = vadd.f32 %v11494_v60, %v13694_v20  ;;  %v13696_v63 = vld [vmem:[#allocation131_spill] sm:$0xff]  ;;  %v13698_v39 = vld [vmem:[#allocation133_spill] sm:$0xff] }
 0x9e1   : > { %13689 = vst [vmem:[#allocation26_spill] sm:$0xff] %v11818_v16  ;;  %13691 = vst [vmem:[#allocation27_spill] sm:$0xff] %v11822_v1  ;;  %v11834_v0 = vadd.f32 %v11494_v60, %v13696_v63  ;;  %v11838_v21 = vadd.f32 %v11494_v60, %v13698_v39  ;;  %v13700_v16 = vld [vmem:[#allocation135_spill] sm:$0xff]  ;;  %v13702_v1 = vld [vmem:[#allocation137_spill] sm:$0xff] }
 0x9e2   : > { %13693 = vst [vmem:[#allocation28_spill] sm:$0xff] %v11826_v57  ;;  %13695 = vst [vmem:[#allocation29_spill] sm:$0xff] %v11830_v49  ;;  %v11842_v42 = vadd.f32 %v11494_v60, %v13700_v16  ;;  %v11846_v4 = vadd.f32 %v11494_v60, %v13702_v1  ;;  %v13704_v57 = vld [vmem:[#allocation139_spill] sm:$0xff]  ;;  %v13706_v49 = vld [vmem:[#allocation141_spill] sm:$0xff] }
 0x9e3   : > { %13697 = vst [vmem:[#allocation30_spill] sm:$0xff] %v11834_v0  ;;  %13699 = vst [vmem:[#allocation31_spill] sm:$0xff] %v11838_v21  ;;  %v11850_v20 = vadd.f32 %v11494_v60, %v13704_v57  ;;  %v11854_v63 = vadd.f32 %v11494_v60, %v13706_v49  ;;  %v13708_v0 = vld [vmem:[#allocation142_spill] sm:$0xff]  ;;  %v13710_v21 = vld [vmem:[#allocation143_spill] sm:$0xff] }
 0x9e4   : > { %13701 = vst [vmem:[#allocation32_spill] sm:$0xff] %v11842_v42  ;;  %13703 = vst [vmem:[#allocation33_spill] sm:$0xff] %v11846_v4  ;;  %v11858_v39 = vadd.f32 %v11494_v60, %v13708_v0  ;;  %v11862_v16 = vadd.f32 %v11494_v60, %v13710_v21  ;;  %v13712_v42 = vld [vmem:[#allocation144_spill] sm:$0xff]  ;;  %v13714_v4 = vld [vmem:[#allocation145_spill] sm:$0xff] }
 0x9e5   : > { %13705 = vst [vmem:[#allocation34_spill] sm:$0xff] %v11850_v20  ;;  %13707 = vst [vmem:[#allocation35_spill] sm:$0xff] %v11854_v63  ;;  %v11866_v1 = vadd.f32 %v11494_v60, %v13712_v42  ;;  %v11870_v57 = vadd.f32 %v11494_v60, %v13714_v4  ;;  %v13716_v20 = vld [vmem:[#allocation146_spill] sm:$0xff]  ;;  %v13718_v63 = vld [vmem:[#allocation147_spill] sm:$0xff] }
 0x9e6   : > { %13709 = vst [vmem:[#allocation36_spill] sm:$0xff] %v11858_v39  ;;  %13711 = vst [vmem:[#allocation37_spill] sm:$0xff] %v11862_v16  ;;  %v11874_v49 = vadd.f32 %v11494_v60, %v13716_v20  ;;  %v11878_v0 = vadd.f32 %v11494_v60, %v13718_v63  ;;  %v13720_v39 = vld [vmem:[#allocation148_spill] sm:$0xff]  ;;  %v13722_v16 = vld [vmem:[#allocation149_spill] sm:$0xff] }
 0x9e7   : > { %13713 = vst [vmem:[#allocation38_spill] sm:$0xff] %v11866_v1  ;;  %13715 = vst [vmem:[#allocation39_spill] sm:$0xff] %v11870_v57  ;;  %v11882_v21 = vadd.f32 %v11494_v60, %v13720_v39  ;;  %v11886_v42 = vadd.f32 %v11494_v60, %v13722_v16  ;;  %v13724_v1 = vld [vmem:[#allocation150_spill] sm:$0xff]  ;;  %v13726_v57 = vld [vmem:[#allocation76_spill] sm:$0xff] }
 0x9e8   : > { %13717 = vst [vmem:[#allocation40_spill] sm:$0xff] %v11874_v49  ;;  %13719 = vst [vmem:[#allocation41_spill] sm:$0xff] %v11878_v0  ;;  %v11890_v4 = vadd.f32 %v11494_v60, %v13724_v1  ;;  %v11894_v20 = vadd.f32 %v11494_v60, %v13726_v57  ;;  %v13728_v49 = vld [vmem:[#allocation77_spill] sm:$0xff]  ;;  %v13730_v0 = vld [vmem:[#allocation87_spill] sm:$0xff] }
 0x9e9   : > { %13721 = vst [vmem:[#allocation42_spill] sm:$0xff] %v11882_v21  ;;  %13723 = vst [vmem:[#allocation43_spill] sm:$0xff] %v11886_v42  ;;  %v11898_v63 = vadd.f32 %v11494_v60, %v13728_v49  ;;  %v11902_v39 = vadd.f32 %v11494_v60, %v13730_v0  ;;  %v13732_v21 = vld [vmem:[#allocation111_spill] sm:$0xff]  ;;  %v13734_v42 = vld [vmem:[#allocation112_spill] sm:$0xff] }
 0x9ea   : > { %13725 = vst [vmem:[#allocation44_spill] sm:$0xff] %v11890_v4  ;;  %13727 = vst [vmem:[#allocation45_spill] sm:$0xff] %v11894_v20  ;;  %v11906_v16 = vadd.f32 %v11494_v60, %v13732_v21  ;;  %v11910_v1 = vadd.f32 %v11494_v60, %v13734_v42  ;;  %v13736_v4 = vld [vmem:[#allocation115_spill] sm:$0xff]  ;;  %v13738_v20 = vld [vmem:[#allocation116_spill] sm:$0xff] }
 0x9eb   : > { %13729 = vst [vmem:[#allocation46_spill] sm:$0xff] %v11898_v63  ;;  %13731 = vst [vmem:[#allocation47_spill] sm:$0xff] %v11902_v39  ;;  %v11914_v57 = vadd.f32 %v11494_v60, %v13736_v4  ;;  %v11918_v49 = vadd.f32 %v11494_v60, %v13738_v20  ;;  %v13740_v63 = vld [vmem:[#allocation119_spill] sm:$0xff]  ;;  %v13742_v39 = vld [vmem:[#allocation120_spill] sm:$0xff] }
 0x9ec   : > { %13733 = vst [vmem:[#allocation48_spill] sm:$0xff] %v11906_v16  ;;  %13735 = vst [vmem:[#allocation49_spill] sm:$0xff] %v11910_v1  ;;  %v11922_v0 = vadd.f32 %v11494_v60, %v13740_v63  ;;  %v11926_v21 = vadd.f32 %v11494_v60, %v13742_v39  ;;  %v13744_v16 = vld [vmem:[#allocation123_spill] sm:$0xff]  ;;  %v13746_v1 = vld [vmem:[#allocation124_spill] sm:$0xff] }
 0x9ed   : > { %13737 = vst [vmem:[#allocation50_spill] sm:$0xff] %v11914_v57  ;;  %13739 = vst [vmem:[#allocation51_spill] sm:$0xff] %v11918_v49  ;;  %v11930_v42 = vadd.f32 %v11494_v60, %v13744_v16  ;;  %v11934_v4 = vadd.f32 %v11494_v60, %v13746_v1  ;;  %v13748_v57 = vld [vmem:[#allocation127_spill] sm:$0xff]  ;;  %v13750_v49 = vld [vmem:[#allocation128_spill] sm:$0xff] }
 0x9ee   : > { %13741 = vst [vmem:[#allocation52_spill] sm:$0xff] %v11922_v0  ;;  %13743 = vst [vmem:[#allocation53_spill] sm:$0xff] %v11926_v21  ;;  %v11938_v20 = vadd.f32 %v11494_v60, %v13748_v57  ;;  %v11942_v63 = vadd.f32 %v11494_v60, %v13750_v49  ;;  %v13752_v0 = vld [vmem:[#allocation130_spill] sm:$0xff]  ;;  %v13754_v21 = vld [vmem:[#allocation132_spill] sm:$0xff] }
 0x9ef   : > { %13745 = vst [vmem:[#allocation54_spill] sm:$0xff] %v11930_v42  ;;  %13747 = vst [vmem:[#allocation55_spill] sm:$0xff] %v11934_v4  ;;  %v11946_v39 = vadd.f32 %v11494_v60, %v13752_v0  ;;  %v11950_v16 = vadd.f32 %v11494_v60, %v13754_v21  ;;  %v13756_v42 = vld [vmem:[#allocation134_spill] sm:$0xff]  ;;  %v13758_v4 = vld [vmem:[#allocation136_spill] sm:$0xff] }
 0x9f0   : > { %13749 = vst [vmem:[#allocation56_spill] sm:$0xff] %v11938_v20  ;;  %13751 = vst [vmem:[#allocation57_spill] sm:$0xff] %v11942_v63  ;;  %v11954_v1 = vadd.f32 %v11494_v60, %v13756_v42  ;;  %v11958_v57 = vadd.f32 %v11494_v60, %v13758_v4  ;;  %v13760_v20 = vld [vmem:[#allocation138_spill] sm:$0xff]  ;;  %v13762_v63 = vld [vmem:[#allocation140_spill] sm:$0xff] }
 0x9f1   : > { %13753 = vst [vmem:[#allocation58_spill] sm:$0xff] %v11946_v39  ;;  %13755 = vst [vmem:[#allocation59_spill] sm:$0xff] %v11950_v16  ;;  %v11962_v49 = vadd.f32 %v11494_v60, %v13760_v20  ;;  %v11966_v0 = vadd.f32 %v11494_v60, %v13762_v63  ;;  %v13764_v39 = vld [vmem:[#allocation94_spill] sm:$0xff]  ;;  %v13766_v16 = vld [vmem:[#allocation96_spill] sm:$0xff]  ;;  %v11982_v20 = vadd.f32 %v11494_v60, %v11465_v36 }
 0x9f2   : > { %13757 = vst [vmem:[#allocation60_spill] sm:$0xff] %v11954_v1  ;;  %13759 = vst [vmem:[#allocation61_spill] sm:$0xff] %v11958_v57  ;;  %v11970_v21 = vadd.f32 %v11494_v60, %v13764_v39  ;;  %v11974_v42 = vadd.f32 %v11494_v60, %v13766_v16  ;;  %v13768_v1 = vld [vmem:[#allocation98_spill] sm:$0xff]  ;;  %v13901_v14 = vld [vmem:[#allocation156_spill] sm:$0xff] }
 0x9f3   : > { %13761 = vst [vmem:[#allocation62_spill] sm:$0xff] %v11962_v49  ;;  %13763 = vst [vmem:[#allocation63_spill] sm:$0xff] %v11966_v0  ;;  %v11978_v4 = vadd.f32 %v11494_v60, %v13768_v1  ;;  %v13771_v49 = vld [vmem:[#allocation100_spill] sm:$0xff]  ;;  %v13773_v0 = vld [vmem:[#allocation102_spill] sm:$0xff] }
 0x9f4   : > { %13765 = vst [vmem:[#allocation64_spill] sm:$0xff] %v11970_v21  ;;  %13767 = vst [vmem:[#allocation65_spill] sm:$0xff] %v11974_v42  ;;  %v11986_v63 = vadd.f32 %v11494_v60, %v13771_v49  ;;  %v11990_v39 = vadd.f32 %v11494_v60, %v13773_v0  ;;  %v13775_v21 = vld [vmem:[#allocation104_spill] sm:$0xff]  ;;  %v13777_v42 = vld [vmem:[#allocation106_spill] sm:$0xff] }
 0x9f5   : > { %13769 = vst [vmem:[#allocation66_spill] sm:$0xff] %v11978_v4  ;;  %13770 = vst [vmem:[#allocation67_spill] sm:$0xff] %v11982_v20  ;;  %v11994_v16 = vadd.f32 %v11494_v60, %v13775_v21  ;;  %v11998_v1 = vadd.f32 %v11494_v60, %v13777_v42  ;;  %v13779_v4 = vld [vmem:[#allocation108_spill] sm:$0xff]  ;;  %v13781_v20 = vld [vmem:[#allocation151_spill] sm:$0xff] }
 0x9f6   : > { %13772 = vst [vmem:[#allocation68_spill] sm:$0xff] %v11986_v63  ;;  %13774 = vst [vmem:[#allocation69_spill] sm:$0xff] %v11990_v39  ;;  %v12002_v36 = vadd.f32 %v11494_v60, %v13779_v4  ;;  %v12006_v49 = vadd.f32 %v11494_v60, %v13781_v20  ;;  %v13783_v63 = vld [vmem:[#allocation152_spill] sm:$0xff]  ;;  %v13784_v39 = vld [vmem:[#allocation153_spill] sm:$0xff]  ;;  %v12026_v20 = vadd.f32 %v11494_v60, %v11514_v7 }
 0x9f7   : > { %13776 = vst [vmem:[#allocation70_spill] sm:$0xff] %v11994_v16  ;;  %13778 = vst [vmem:[#allocation71_spill] sm:$0xff] %v11998_v1  ;;  %v12010_v0 = vadd.f32 %v11494_v60, %v13783_v63  ;;  %v12014_v21 = vadd.f32 %v11494_v60, %v13784_v39  ;;  %v13785_v16 = vld [vmem:[#allocation154_spill] sm:$0xff]  ;;  %v13786_v1 = vld [vmem:[#allocation155_spill] sm:$0xff]  ;;  %v12030_v63 = vadd.f32 %v11494_v60, %v11518_v41 }
 0x9f8   : > { %13780 = vst [vmem:[#allocation72_spill] sm:$0xff] %v12002_v36  ;;  %13782 = vst [vmem:[#allocation73_spill] sm:$0xff] %v12006_v49  ;;  %v12018_v42 = vadd.f32 %v11494_v60, %v13785_v16  ;;  %v12022_v4 = vadd.f32 %v11494_v60, %v13786_v1  ;;  %v12034_v39 = vadd.f32 %v11494_v60, %v11522_v48  ;;  %v13909_v17 = vld [vmem:[#allocation160_spill] sm:$0xff]  ;;  %v13915_v44 = vld [vmem:[#allocation163_spill] sm:$0xff] }
 0x9f9   : > { %v12038_v16 = vadd.f32 %v11494_v60, %v11526_v56  ;;  %v12042_v1 = vadd.f32 %v11494_v60, %v11530_v58  ;;  %v12046_v7 = vadd.f32 %v11494_v60, %v11534_v13  ;;  %v12050_v41 = vadd.f32 %v11494_v60, %v11538_v38  ;;  %v13851_v56 = vld [vmem:[#allocation59_spill] sm:$0xff]  ;;  %7238 = vst [vmem:[%s12219_s8 + $0x8] sm:$0xff] %v6926_v28   ;;  %v13917_v34 = vld [vmem:[#allocation164_spill] sm:$0xff]  ;;  %v13927_v11 = vld [vmem:[#allocation169_spill] sm:$0xff] }
 0x9fa   : > { %13787 = vst [vmem:[#allocation74_spill] sm:$0xff] %v12022_v4  ;;  %13788 = vst [vmem:[#allocation75_spill] sm:$0xff] %v12034_v39  ;;  %v12054_v48 = vadd.f32 %v11494_v60, %v11542_v22  ;;  %v13854_v46 = vld [vmem:[#allocation63_spill] sm:$0xff]  ;;  %v6921_v4 = vpack.c.bf16 %v13869_v59, %v13868_v31  ;;  %v13872_v13 = vmax.f32 %v11562_v29, 0.0  ;;  %v13873_v39 = vmax.f32 %v11566_v25, 0.0 }
 0x9fb   : > { %13789 = vst [vmem:[#allocation78_spill] sm:$0xff] %v12038_v16  ;;  %13790 = vst [vmem:[#allocation79_spill] sm:$0xff] %v12042_v1  ;;  %v13852_v16 = vld [vmem:[#allocation60_spill] sm:$0xff]  ;;  %v13853_v1 = vld [vmem:[#allocation62_spill] sm:$0xff]  ;;  %v13875_v58 = vmax.f32 %v11574_v24, 0.0  ;;  %v6941_v31 = vpack.c.bf16 %v13877_v61, %v13876_v18  ;;  %v13880_v29 = vmax.f32 %v11594_v26, 0.0 }
 0x9fc   : > { %13791 = vst [vmem:[#allocation80_spill] sm:$0xff] %v12046_v7  ;;  %13792 = vst [vmem:[#allocation81_spill] sm:$0xff] %v12050_v41  ;;  %v13838_v41 = vld [vmem:[#allocation46_spill] sm:$0xff]  ;;  %v13855_v3 = vld [vmem:[#allocation64_spill] sm:$0xff]  ;;  %v6931_v57 = vpack.c.bf16 %v13873_v39, %v13872_v13  ;;  %v13881_v25 = vmax.f32 %v11598_v12, 0.0  ;;  %v13883_v24 = vmax.f32 %v11606_v55, 0.0 }
 0x9fd   : > { %v13856_v7 = vld [vmem:[#allocation65_spill] sm:$0xff]  ;;  %v13857_v35 = vld [vmem:[#allocation66_spill] sm:$0xff]  ;;  %v13858_v60 = vld [vmem:[#allocation67_spill] sm:$0xff]  ;;  %v6936_v38 = vpack.c.bf16 %v13875_v58, %v13874_v43  ;;  %6922 = vst [vmem:[%s12219_s8] sm:$0xff] %v6921_v4   ;;  %v13887_v26 = vmax.f32 %v11622_v19, 0.0  ;;  %v13889_v55 = vmax.f32 %v11630_v32, 0.0  ;;  %v13890_v28 = vmax.f32 %v11634_v30, 0.0 }
 0x9fe   : > { %v6951_v59 = vpack.c.bf16 %v13881_v25, %v13880_v29  ;;  %v6956_v43 = vpack.c.bf16 %v13883_v24, %v13882_v50  ;;  %7239 = vst [vmem:[%s12219_s8 + $0x10] sm:$0xff] %v6931_v57   ;;  %v13891_v57 = vmax.f32 %v11638_v33, 0.0  ;;  %7241 = vst [vmem:[%s12219_s8 + $0x20] sm:$0xff] %v6941_v31   ;;  %v13894_v19 = vmax.f32 %v11650_v54, 0.0  ;;  %v13905_v18 = vld [vmem:[#allocation158_spill] sm:$0xff]  ;;  %v13911_v29 = vld [vmem:[#allocation161_spill] sm:$0xff] }
 0x9ff   : > { %7240 = vst [vmem:[%s12219_s8 + $0x18] sm:$0xff] %v6936_v38   ;;  %v6966_v12 = vpack.c.bf16 %v13887_v26, %v13886_v2  ;;  %v6971_v5 = vpack.c.bf16 %v13889_v55, %v13888_v40  ;;  %7242 = vst [vmem:[%s12219_s8 + $0x28] sm:$0xff] %v6946_v51   ;;  %v13896_v30 = vmax.f32 %v11658_v9, 0.0  ;;  %v13897_v33 = vmax.f32 %v11662_v10, 0.0  ;;  %v13903_v9 = vld [vmem:[#allocation157_spill] sm:$0xff] }
 0xa00   : > { %v6976_v4 = vpack.c.bf16 %v13891_v57, %v13890_v28  ;;  %7243 = vst [vmem:[%s12219_s8 + $0x30] sm:$0xff] %v6951_v59   ;;  %7244 = vst [vmem:[%s12219_s8 + $0x38] sm:$0xff] %v6956_v43   ;;  %v6986_v32 = vpack.c.bf16 %v13895_v23, %v13894_v19  ;;  %v13898_v58 = vmax.f32 %v11666_v45, 0.0  ;;  %v13899_v13 = vmax.f32 %v11670_v27, 0.0  ;;  %v13907_v27 = vld [vmem:[#allocation159_spill] sm:$0xff]  ;;  %v13913_v59 = vld [vmem:[#allocation162_spill] sm:$0xff] }
 0xa01   : > { %v13863_v22 = vld [vmem:[#allocation75_spill] sm:$0xff]  ;;  %v6991_v39 = vpack.c.bf16 %v13897_v33, %v13896_v30  ;;  %7245 = vst [vmem:[%s12219_s8 + $0x40] sm:$0xff] %v6961_v37   ;;  %7246 = vst [vmem:[%s12219_s8 + $0x48] sm:$0xff] %v6966_v12   ;;  %v13902_v54 = vmax.f32 %v13901_v14, 0.0  ;;  %v13904_v10 = vmax.f32 %v13903_v9, 0.0  ;;  %v13906_v45 = vmax.f32 %v13905_v18, 0.0 }
 0xa02   : > { %v13864_v53 = vld [vmem:[#allocation78_spill] sm:$0xff]  ;;  %v6996_v38 = vpack.c.bf16 %v13899_v13, %v13898_v58  ;;  %7247 = vst [vmem:[%s12219_s8 + $0x50] sm:$0xff] %v6971_v5   ;;  %7248 = vst [vmem:[%s12219_s8 + $0x58] sm:$0xff] %v6976_v4   ;;  %v13908_v31 = vmax.f32 %v13907_v27, 0.0  ;;  %v13910_v6 = vmax.f32 %v13909_v17, 0.0  ;;  %v13912_v25 = vmax.f32 %v13911_v29, 0.0 }
 0xa03   : > { %v13866_v36 = vld [vmem:[#allocation80_spill] sm:$0xff]  ;;  %v13867_v49 = vld [vmem:[#allocation81_spill] sm:$0xff]  ;;  %v7001_v47 = vpack.c.bf16 %v13902_v54, %v13900_v62  ;;  %v7006_v61 = vpack.c.bf16 %v13906_v45, %v13904_v10  ;;  %v13914_v50 = vmax.f32 %v13913_v59, 0.0  ;;  %7249 = vst [vmem:[%s12219_s8 + $0x60] sm:$0xff] %v6981_v15   ;;  %7250 = vst [vmem:[%s12219_s8 + $0x68] sm:$0xff] %v6986_v32   ;;  %v13916_v43 = vmax.f32 %v13915_v44, 0.0 }
 0xa04   : > { %v7011_v51 = vpack.c.bf16 %v13910_v6, %v13908_v31  ;;  %7251 = vst [vmem:[%s12219_s8 + $0x70] sm:$0xff] %v6991_v39   ;;  %7252 = vst [vmem:[%s12219_s8 + $0x78] sm:$0xff] %v6996_v38   ;;  %v13918_v52 = vmax.f32 %v13917_v34, 0.0  ;;  %v13919_v2 = vld [vmem:[#allocation165_spill] sm:$0xff]  ;;  %v13921_v12 = vld [vmem:[#allocation166_spill] sm:$0xff]  ;;  %v13928_v15 = vmax.f32 %v13927_v11, 0.0 }
 0xa05   : > { %v7016_v24 = vpack.c.bf16 %v13914_v50, %v13912_v25  ;;  %v13920_v26 = vmax.f32 %v13919_v2, 0.0  ;;  %v13922_v40 = vmax.f32 %v13921_v12, 0.0  ;;  %v13923_v5 = vld [vmem:[#allocation167_spill] sm:$0xff]  ;;  %v13925_v57 = vld [vmem:[#allocation168_spill] sm:$0xff]  ;;  %v13929_v19 = vld [vmem:[#allocation170_spill] sm:$0xff]  ;;  %7253 = vst [vmem:[%s12219_s8 + $0x80] sm:$0xff] %v7001_v47  }
 0xa06   : > { %v7021_v37 = vpack.c.bf16 %v13918_v52, %v13916_v43  ;;  %v13924_v28 = vmax.f32 %v13923_v5, 0.0  ;;  %v13926_v4 = vmax.f32 %v13925_v57, 0.0  ;;  %v13930_v23 = vmax.f32 %v13929_v19, 0.0  ;;  %7254 = vst [vmem:[%s12219_s8 + $0x88] sm:$0xff] %v7006_v61   ;;  %7255 = vst [vmem:[%s12219_s8 + $0x90] sm:$0xff] %v7011_v51   ;;  %v13931_v30 = vld [vmem:[#allocation6_spill] sm:$0xff] }
 0xa07   : > { %v7026_v55 = vpack.c.bf16 %v13922_v40, %v13920_v26  ;;  %7256 = vst [vmem:[%s12219_s8 + $0x98] sm:$0xff] %v7016_v24   ;;  %v13932_v33 = vmax.f32 %v13931_v30, 0.0  ;;  %v13933_v39 = vld [vmem:[#allocation7_spill] sm:$0xff]  ;;  %v13935_v38 = vld [vmem:[#allocation8_spill] sm:$0xff]  ;;  %v13937_v14 = vld [vmem:[#allocation9_spill] sm:$0xff] }
 0xa08   : > { %v7031_v8 = vpack.c.bf16 %v13926_v4, %v13924_v28  ;;  %v7036_v32 = vpack.c.bf16 %v13930_v23, %v13928_v15  ;;  %v13934_v58 = vmax.f32 %v13933_v39, 0.0  ;;  %v13936_v62 = vmax.f32 %v13935_v38, 0.0  ;;  %v13939_v10 = vld [vmem:[#allocation10_spill] sm:$0xff]  ;;  %v13941_v47 = vld [vmem:[#allocation11_spill] sm:$0xff]  ;;  %v13943_v27 = vld [vmem:[#allocation12_spill] sm:$0xff]  ;;  %7257 = vst [vmem:[%s12219_s8 + $0xa0] sm:$0xff] %v7021_v37  }
 0xa09   : > { %v13938_v54 = vmax.f32 %v13937_v14, 0.0  ;;  %v13940_v18 = vmax.f32 %v13939_v10, 0.0  ;;  %v13942_v45 = vmax.f32 %v13941_v47, 0.0  ;;  %v13944_v31 = vmax.f32 %v13943_v27, 0.0  ;;  %v13945_v17 = vld [vmem:[#allocation13_spill] sm:$0xff]  ;;  %7258 = vst [vmem:[%s12219_s8 + $0xa8] sm:$0xff] %v7026_v55  }
 0xa0a   : > { %v7041_v13 = vpack.c.bf16 %v13934_v58, %v13932_v33  ;;  %v13946_v6 = vmax.f32 %v13945_v17, 0.0  ;;  %7259 = vst [vmem:[%s12219_s8 + $0xb0] sm:$0xff] %v7031_v8   ;;  %7260 = vst [vmem:[%s12219_s8 + $0xb8] sm:$0xff] %v7036_v32   ;;  %v13947_v29 = vld [vmem:[#allocation14_spill] sm:$0xff]  ;;  %v13949_v59 = vld [vmem:[#allocation15_spill] sm:$0xff] }
 0xa0b   : > { %v7046_v9 = vpack.c.bf16 %v13938_v54, %v13936_v62  ;;  %v7051_v61 = vpack.c.bf16 %v13942_v45, %v13940_v18  ;;  %v13948_v25 = vmax.f32 %v13947_v29, 0.0  ;;  %v13950_v50 = vmax.f32 %v13949_v59, 0.0  ;;  %v13951_v44 = vld [vmem:[#allocation16_spill] sm:$0xff]  ;;  %v13953_v34 = vld [vmem:[#allocation17_spill] sm:$0xff]  ;;  %v13955_v26 = vld [vmem:[#allocation18_spill] sm:$0xff] }
 0xa0c   : > { %v7056_v51 = vpack.c.bf16 %v13946_v6, %v13944_v31  ;;  %v13952_v43 = vmax.f32 %v13951_v44, 0.0  ;;  %v13954_v52 = vmax.f32 %v13953_v34, 0.0  ;;  %v13956_v12 = vmax.f32 %v13955_v26, 0.0  ;;  %v13957_v37 = vld [vmem:[#allocation19_spill] sm:$0xff]  ;;  %v13959_v5 = vld [vmem:[#allocation20_spill] sm:$0xff]  ;;  %v13961_v57 = vld [vmem:[#allocation21_spill] sm:$0xff] }
 0xa0d   : > { %v7061_v24 = vpack.c.bf16 %v13950_v50, %v13948_v25  ;;  %v13958_v40 = vmax.f32 %v13957_v37, 0.0  ;;  %v13960_v28 = vmax.f32 %v13959_v5, 0.0  ;;  %v13962_v4 = vmax.f32 %v13961_v57, 0.0  ;;  %7261 = vst [vmem:[%s12219_s8 + $0xc0] sm:$0xff] %v7041_v13   ;;  %7262 = vst [vmem:[%s12219_s8 + $0xc8] sm:$0xff] %v7046_v9   ;;  %v13963_v11 = vld [vmem:[#allocation22_spill] sm:$0xff] }
 0xa0e   : > { %v7066_v2 = vpack.c.bf16 %v13954_v52, %v13952_v43  ;;  %7263 = vst [vmem:[%s12219_s8 + $0xd0] sm:$0xff] %v7051_v61   ;;  %7264 = vst [vmem:[%s12219_s8 + $0xd8] sm:$0xff] %v7056_v51   ;;  %v13964_v15 = vmax.f32 %v13963_v11, 0.0  ;;  %v13965_v19 = vld [vmem:[#allocation23_spill] sm:$0xff]  ;;  %v13967_v30 = vld [vmem:[#allocation24_spill] sm:$0xff] }
 0xa0f   : > { %v7071_v55 = vpack.c.bf16 %v13958_v40, %v13956_v12  ;;  %v7076_v8 = vpack.c.bf16 %v13962_v4, %v13960_v28  ;;  %v13966_v23 = vmax.f32 %v13965_v19, 0.0  ;;  %v13968_v33 = vmax.f32 %v13967_v30, 0.0  ;;  %v13969_v39 = vld [vmem:[#allocation25_spill] sm:$0xff]  ;;  %v13971_v62 = vld [vmem:[#allocation26_spill] sm:$0xff]  ;;  %v13973_v13 = vld [vmem:[#allocation27_spill] sm:$0xff]  ;;  %7265 = vst [vmem:[%s12219_s8 + $0xe0] sm:$0xff] %v7061_v24  }
 0xa10   : > { %v13970_v58 = vmax.f32 %v13969_v39, 0.0  ;;  %v13972_v14 = vmax.f32 %v13971_v62, 0.0  ;;  %v13974_v54 = vmax.f32 %v13973_v13, 0.0  ;;  %v13975_v10 = vld [vmem:[#allocation28_spill] sm:$0xff]  ;;  %v13977_v47 = vld [vmem:[#allocation29_spill] sm:$0xff]  ;;  %7266 = vst [vmem:[%s12219_s8 + $0xe8] sm:$0xff] %v7066_v2  }
 0xa11   : > { %v7081_v32 = vpack.c.bf16 %v13966_v23, %v13964_v15  ;;  %v13976_v18 = vmax.f32 %v13975_v10, 0.0  ;;  %v13978_v45 = vmax.f32 %v13977_v47, 0.0  ;;  %7267 = vst [vmem:[%s12219_s8 + $0xf0] sm:$0xff] %v7071_v55   ;;  %7268 = vst [vmem:[%s12219_s8 + $0xf8] sm:$0xff] %v7076_v8   ;;  %v13979_v27 = vld [vmem:[#allocation30_spill] sm:$0xff]  ;;  %v13981_v17 = vld [vmem:[#allocation31_spill] sm:$0xff] }
 0xa12   : > { %v7086_v38 = vpack.c.bf16 %v13970_v58, %v13968_v33  ;;  %v7091_v9 = vpack.c.bf16 %v13974_v54, %v13972_v14  ;;  %v13980_v31 = vmax.f32 %v13979_v27, 0.0  ;;  %v13982_v6 = vmax.f32 %v13981_v17, 0.0  ;;  %v13983_v29 = vld [vmem:[#allocation32_spill] sm:$0xff]  ;;  %v13985_v59 = vld [vmem:[#allocation33_spill] sm:$0xff]  ;;  %v13987_v43 = vld [vmem:[#allocation34_spill] sm:$0xff] }
 0xa13   : > { %v7096_v61 = vpack.c.bf16 %v13978_v45, %v13976_v18  ;;  %v13984_v25 = vmax.f32 %v13983_v29, 0.0  ;;  %v13986_v50 = vmax.f32 %v13985_v59, 0.0  ;;  %v13988_v34 = vmax.f32 %v13987_v43, 0.0  ;;  %v13989_v24 = vld [vmem:[#allocation35_spill] sm:$0xff]  ;;  %v13991_v26 = vld [vmem:[#allocation36_spill] sm:$0xff]  ;;  %v13993_v37 = vld [vmem:[#allocation37_spill] sm:$0xff] }
 0xa14   : > { %v7101_v51 = vpack.c.bf16 %v13982_v6, %v13980_v31  ;;  %v13990_v52 = vmax.f32 %v13989_v24, 0.0  ;;  %v13992_v12 = vmax.f32 %v13991_v26, 0.0  ;;  %v13994_v40 = vmax.f32 %v13993_v37, 0.0  ;;  %7269 = vst [vmem:[%s12219_s8 + $0x100] sm:$0xff] %v7081_v32   ;;  %7270 = vst [vmem:[%s12219_s8 + $0x108] sm:$0xff] %v7086_v38   ;;  %v13995_v5 = vld [vmem:[#allocation38_spill] sm:$0xff] }
 0xa15   : > { %v7106_v44 = vpack.c.bf16 %v13986_v50, %v13984_v25  ;;  %7271 = vst [vmem:[%s12219_s8 + $0x110] sm:$0xff] %v7091_v9   ;;  %7272 = vst [vmem:[%s12219_s8 + $0x118] sm:$0xff] %v7096_v61   ;;  %v13996_v28 = vmax.f32 %v13995_v5, 0.0  ;;  %v13997_v57 = vld [vmem:[#allocation39_spill] sm:$0xff]  ;;  %v13999_v11 = vld [vmem:[#allocation40_spill] sm:$0xff]  ;;  %v14011_v10 = vmax.f32 %v13838_v41, 0.0 }
 0xa16   : > { %v7111_v2 = vpack.c.bf16 %v13990_v52, %v13988_v34  ;;  %v7116_v55 = vpack.c.bf16 %v13994_v40, %v13992_v12  ;;  %v13998_v4 = vmax.f32 %v13997_v57, 0.0  ;;  %v14000_v15 = vmax.f32 %v13999_v11, 0.0  ;;  %v14001_v19 = vld [vmem:[#allocation41_spill] sm:$0xff]  ;;  %v14003_v33 = vld [vmem:[#allocation42_spill] sm:$0xff]  ;;  %v14005_v39 = vld [vmem:[#allocation43_spill] sm:$0xff]  ;;  %7273 = vst [vmem:[%s12219_s8 + $0x120] sm:$0xff] %v7101_v51  }
 0xa17   : > { %v14002_v23 = vmax.f32 %v14001_v19, 0.0  ;;  %v14004_v32 = vmax.f32 %v14003_v33, 0.0  ;;  %v14006_v58 = vmax.f32 %v14005_v39, 0.0  ;;  %v14007_v62 = vld [vmem:[#allocation44_spill] sm:$0xff]  ;;  %v14009_v13 = vld [vmem:[#allocation45_spill] sm:$0xff]  ;;  %7274 = vst [vmem:[%s12219_s8 + $0x128] sm:$0xff] %v7106_v44  }
 0xa18   : > { %v7121_v8 = vpack.c.bf16 %v13998_v4, %v13996_v28  ;;  %v14008_v14 = vmax.f32 %v14007_v62, 0.0  ;;  %v14010_v54 = vmax.f32 %v14009_v13, 0.0  ;;  %7275 = vst [vmem:[%s12219_s8 + $0x130] sm:$0xff] %v7111_v2   ;;  %7276 = vst [vmem:[%s12219_s8 + $0x138] sm:$0xff] %v7116_v55   ;;  %v14012_v18 = vld [vmem:[#allocation47_spill] sm:$0xff]  ;;  %v14014_v61 = vld [vmem:[#allocation48_spill] sm:$0xff] }
 0xa19   : > { %v7126_v30 = vpack.c.bf16 %v14002_v23, %v14000_v15  ;;  %v7131_v38 = vpack.c.bf16 %v14006_v58, %v14004_v32  ;;  %v14013_v47 = vmax.f32 %v14012_v18, 0.0  ;;  %v14015_v27 = vmax.f32 %v14014_v61, 0.0  ;;  %v14016_v31 = vld [vmem:[#allocation49_spill] sm:$0xff]  ;;  %v14018_v29 = vld [vmem:[#allocation50_spill] sm:$0xff]  ;;  %v14020_v59 = vld [vmem:[#allocation51_spill] sm:$0xff] }
 0xa1a   : > { %v7136_v9 = vpack.c.bf16 %v14010_v54, %v14008_v14  ;;  %v14017_v17 = vmax.f32 %v14016_v31, 0.0  ;;  %v14019_v25 = vmax.f32 %v14018_v29, 0.0  ;;  %v14021_v51 = vmax.f32 %v14020_v59, 0.0  ;;  %v14022_v44 = vld [vmem:[#allocation52_spill] sm:$0xff]  ;;  %v14024_v34 = vld [vmem:[#allocation53_spill] sm:$0xff]  ;;  %7277 = vst [vmem:[%s12219_s8 + $0x140] sm:$0xff] %v7121_v8  }
 0xa1b   : > { %v7141_v45 = vpack.c.bf16 %v14013_v47, %v14011_v10  ;;  %v14023_v43 = vmax.f32 %v14022_v44, 0.0  ;;  %v14025_v41 = vmax.f32 %v14024_v34, 0.0  ;;  %7278 = vst [vmem:[%s12219_s8 + $0x148] sm:$0xff] %v7126_v30   ;;  %7279 = vst [vmem:[%s12219_s8 + $0x150] sm:$0xff] %v7131_v38   ;;  %v14026_v52 = vld [vmem:[#allocation54_spill] sm:$0xff]  ;;  %v14028_v26 = vld [vmem:[#allocation55_spill] sm:$0xff] }
 0xa1c   : > { %v7146_v6 = vpack.c.bf16 %v14017_v17, %v14015_v27  ;;  %v7151_v50 = vpack.c.bf16 %v14021_v51, %v14019_v25  ;;  %7280 = vst [vmem:[%s12219_s8 + $0x158] sm:$0xff] %v7136_v9   ;;  %v14027_v2 = vmax.f32 %v14026_v52, 0.0  ;;  %v14029_v12 = vmax.f32 %v14028_v26, 0.0  ;;  %v14030_v40 = vld [vmem:[#allocation56_spill] sm:$0xff]  ;;  %v14032_v5 = vld [vmem:[#allocation57_spill] sm:$0xff]  ;;  %v14034_v4 = vld [vmem:[#allocation58_spill] sm:$0xff] }
 0xa1d   : > { %v7156_v24 = vpack.c.bf16 %v14025_v41, %v14023_v43  ;;  %v14031_v55 = vmax.f32 %v14030_v40, 0.0  ;;  %v14033_v28 = vmax.f32 %v14032_v5, 0.0  ;;  %v14035_v11 = vmax.f32 %v14034_v4, 0.0  ;;  %v14038_v23 = vld [vmem:[#allocation61_spill] sm:$0xff]  ;;  %7281 = vst [vmem:[%s12219_s8 + $0x160] sm:$0xff] %v7141_v45   ;;  %v14046_v54 = vld [vmem:[#allocation68_spill] sm:$0xff] }
 0xa1e   : > { %v7161_v37 = vpack.c.bf16 %v14029_v12, %v14027_v2  ;;  %v14036_v8 = vmax.f32 %v13851_v56, 0.0  ;;  %v14037_v19 = vmax.f32 %v13852_v16, 0.0  ;;  %v14039_v30 = vmax.f32 %v14038_v23, 0.0  ;;  %7282 = vst [vmem:[%s12219_s8 + $0x168] sm:$0xff] %v7146_v6   ;;  %7283 = vst [vmem:[%s12219_s8 + $0x170] sm:$0xff] %v7151_v50   ;;  %v14048_v10 = vld [vmem:[#allocation69_spill] sm:$0xff] }
 0xa1f   : > { %v7166_v57 = vpack.c.bf16 %v14033_v28, %v14031_v55  ;;  %7284 = vst [vmem:[%s12219_s8 + $0x178] sm:$0xff] %v7156_v24   ;;  %v14040_v32 = vmax.f32 %v13853_v1, 0.0  ;;  %v14041_v39 = vmax.f32 %v13854_v46, 0.0  ;;  %v14042_v38 = vmax.f32 %v13855_v3, 0.0  ;;  %v14050_v3 = vld [vmem:[#allocation70_spill] sm:$0xff]  ;;  %v14054_v45 = vld [vmem:[#allocation72_spill] sm:$0xff] }
 0xa20   : > { %v7171_v15 = vpack.c.bf16 %v14036_v8, %v14035_v11  ;;  %v7176_v33 = vpack.c.bf16 %v14039_v30, %v14037_v19  ;;  %v14043_v56 = vmax.f32 %v13856_v7, 0.0  ;;  %v14044_v62 = vmax.f32 %v13857_v35, 0.0  ;;  %7285 = vst [vmem:[%s12219_s8 + $0x180] sm:$0xff] %v7161_v37   ;;  %v14052_v7 = vld [vmem:[#allocation71_spill] sm:$0xff]  ;;  %v14056_v61 = vld [vmem:[#allocation73_spill] sm:$0xff]  ;;  %v14061_v59 = vld [vmem:[#allocation74_spill] sm:$0xff] }
 0xa21   : > { %v7181_v58 = vpack.c.bf16 %v14041_v39, %v14040_v32  ;;  %v14045_v14 = vmax.f32 %v13858_v60, 0.0  ;;  %v14047_v9 = vmax.f32 %v14046_v54, 0.0  ;;  %v14049_v1 = vmax.f32 %v14048_v10, 0.0  ;;  %7286 = vst [vmem:[%s12219_s8 + $0x188] sm:$0xff] %v7166_v57   ;;  %v14067_v41 = vld [vmem:[#allocation79_spill] sm:$0xff] }
 0xa22   : > { %v7186_v16 = vpack.c.bf16 %v14043_v56, %v14042_v38  ;;  %7287 = vst [vmem:[%s12219_s8 + $0x190] sm:$0xff] %v7171_v15   ;;  %7288 = vst [vmem:[%s12219_s8 + $0x198] sm:$0xff] %v7176_v33   ;;  %v14051_v46 = vmax.f32 %v14050_v3, 0.0  ;;  %v14053_v47 = vmax.f32 %v14052_v7, 0.0  ;;  %v14055_v60 = vmax.f32 %v14054_v45, 0.0 }
 0xa23   : > { %v7191_v13 = vpack.c.bf16 %v14045_v14, %v14044_v62  ;;  %v7196_v18 = vpack.c.bf16 %v14049_v1, %v14047_v9  ;;  %v14057_v27 = vmax.f32 %v14056_v61, 0.0  ;;  %v14058_v17 = vmax.f32 %v12010_v0, 0.0  ;;  %7289 = vst [vmem:[%s12219_s8 + $0x1a0] sm:$0xff] %v7181_v58  }
 0xa24   : > { %v7201_v35 = vpack.c.bf16 %v14053_v47, %v14051_v46  ;;  %v14059_v6 = vmax.f32 %v12014_v21, 0.0  ;;  %v14060_v25 = vmax.f32 %v12018_v42, 0.0  ;;  %v14062_v51 = vmax.f32 %v14061_v59, 0.0  ;;  %7290 = vst [vmem:[%s12219_s8 + $0x1a8] sm:$0xff] %v7186_v16  }
 0xa25   : > { %v7206_v31 = vpack.c.bf16 %v14057_v27, %v14055_v60  ;;  %7291 = vst [vmem:[%s12219_s8 + $0x1b0] sm:$0xff] %v7191_v13   ;;  %7292 = vst [vmem:[%s12219_s8 + $0x1b8] sm:$0xff] %v7196_v18   ;;  %v14063_v0 = vmax.f32 %v12026_v20, 0.0  ;;  %v14064_v21 = vmax.f32 %v12030_v63, 0.0  ;;  %v14065_v44 = vmax.f32 %v13863_v22, 0.0 }
 0xa26   : > { %v7211_v29 = vpack.c.bf16 %v14059_v6, %v14058_v17  ;;  %v7216_v50 = vpack.c.bf16 %v14062_v51, %v14060_v25  ;;  %v14066_v43 = vmax.f32 %v13864_v53, 0.0  ;;  %v14068_v24 = vmax.f32 %v14067_v41, 0.0  ;;  %7293 = vst [vmem:[%s12219_s8 + $0x1c0] sm:$0xff] %v7201_v35  }
 0xa27   : > { %v7221_v42 = vpack.c.bf16 %v14064_v21, %v14063_v0  ;;  %v14069_v52 = vmax.f32 %v13866_v36, 0.0  ;;  %v14070_v26 = vmax.f32 %v13867_v49, 0.0  ;;  %v14071_v12 = vmax.f32 %v12054_v48, 0.0  ;;  %7294 = vst [vmem:[%s12219_s8 + $0x1c8] sm:$0xff] %v7206_v31  }
 0xa28   : > { %v7226_v34 = vpack.c.bf16 %v14066_v43, %v14065_v44  ;;  %7295 = vst [vmem:[%s12219_s8 + $0x1d0] sm:$0xff] %v7211_v29   ;;  %7296 = vst [vmem:[%s12219_s8 + $0x1d8] sm:$0xff] %v7216_v50  }
 0xa29   : > { %v7231_v2 = vpack.c.bf16 %v14069_v52, %v14068_v24  ;;  %v7236_v37 = vpack.c.bf16 %v14071_v12, %v14070_v26  ;;  %7297 = vst [vmem:[%s12219_s8 + $0x1e0] sm:$0xff] %v7221_v42  }
 0xa2a   : > { %7298 = vst [vmem:[%s12219_s8 + $0x1e8] sm:$0xff] %v7226_v34  }
 0xa2b   : > { %7299 = vst [vmem:[%s12219_s8 + $0x1f0] sm:$0xff] %v7231_v2   ;;  %7300 = vst [vmem:[%s12219_s8 + $0x1f8] sm:$0xff] %v7236_v37  }
 0xa2c   : > { %8801 = shalt.err (!%p8798_p5)
}
 0xa2d   : > { %s8802_s11 = scalar_lea.hbm %s12486_s15, 8192  ;;  %s8806_s30 = scalar_lea.hbm %s12572_s6, 16384 }
 0xa2e   : > { %p8803_p6 = scmp.ne.s32.totalorder %s12486_s15, %s8802_s11  ;;  %p8807_p10 = scmp.lt.u32.totalorder %s12486_s15, %s12572_s6 }
 0xa2f   : > { %p8808_p11 = scmp.lt.u32.totalorder %s8806_s30, %s8802_s11  ;;  %p8810_p13 = scmp.lt.u32.totalorder %s8802_s11, %s12486_s15 }
 0xa30   : > { %p8804_p7 = pnand %p8803_p6, %p8950_p4 }
 0xa31   : > { %p8809_p12 = por %p8808_p11, %p8807_p10 }
 0xa32   : > { %p8805_p9 = pneg %p8804_p7 }
 0xa33   : > { %p8811_p0 = por %p8810_p13, %p8809_p12 }
 0xa35   : > { %p8812_p1 = pnand %p8811_p0, %p8805_p9 }
 0xa37   : > { %8815 = shalt.err (!%p8812_p1)
}
 0xa38   : > { %s8873_s24 = smov 64   ;;  %s8874_s13 = smov 4  }
 0xa39   : > { %8517 = dma.vmem_to_hbm [thread:$0]  (%p8950_p4), %s12488_s14, 8192, %s12486_s15, %s12520_s16, %s8873_s24, %s8873_s24, %s8874_s13  }
 0xa3a PF: > { %p8523_p2 = scmp.ge.s32.totalorder %s8866_s26, 2  ;;  %s6358_s17 = sand.u32 1, %s8846_s21  }
 0xa3b   : > { %s6359_s18 = scalar_lea.sflag [#allocation4], %s6358_s17 }
 0xa3c   : > { %p8520_p3 = pnand %p8523_p2, %p8957_p8 }
 0xa3e   : > { %8841 = dma.done.wait (!%p8520_p3), %s6359_s18, 8192  }
 0xa3f   : > { %8843 = vsyncadd (!%p8520_p3), %s6359_s18, 4294959104  ;;  %s19_s26 = sadd.s32 1, %s8866_s26   ;;  %s14072_s21 = smov %s8850_s22 }
 0xa40   : > { %p16_p5 = scmp.ge.s32.totalorder %s19_s26, 4   ;;  %s14073_s22 = smov %s8854_s23 }
 0xa41   : > { %s14074_s23 = smov %s8963_s10  ;;  %s14075_s24 = smov %s8862_s25 }
 0xa42   : > { %s14076_s25 = smov %s14078_s29  ;;  %18 = sbr.rel (!%p16_p5) target bundleno = 4 (0x4), region = 102 }
 0xa49   :  { %6364 = vsyncpa [#allocation4], 1 }
 0xa4a   :  { %6366 = vsyncpa [#allocation4 + $0x1], 1 }

</bundles_post_ra>
